<compile_context>
chip_gen: v7x
topology: tpu7x:2x2x1
jax: 0.10.0
libtpu: 0.0.40
codegen_flags: <defaults>
</compile_context>

<pallas_src>
import functools

import jax
import jax.numpy as jnp
import numpy as np
from jax.experimental import pallas as pl
from jax.experimental.pallas import tpu as pltpu


def _round_up(n, m):
    return (n + m - 1) // m * m


# ------------------------------ Pallas kernel ------------------------------ #
def _switchhead_kernel(x_ref, wall_ref, wo_ref, out_ref, *,
                       B_BLK, T, H, DH, E, SEL,
                       OFF_Q, OFF_K, OFF_GV, OFF_GD, OFF_V):
    HDH = H * DH
    HE = H * E

    # ---- fused projection: one wide bf16 MXU matmul, (M,K)@(K,N), f32 acc ----
    xf = x_ref[...]                                            # (M, DIM) bf16
    proj = jax.lax.dot_general(                                # (M, N_padded) f32
        xf, wall_ref[...], (((1,), (0,)), ((), ())),
        preferred_element_type=jnp.float32)

    # Every group offset is a multiple of 128 lanes (padded at weight-prep time).
    # Scale is already folded into the Wq rows; cast q/k to bf16 once, full-width.
    q_all = proj[:, OFF_Q:OFF_Q + HDH].astype(jnp.bfloat16)    # (M, H*DH)
    k_all = proj[:, OFF_K:OFF_K + HDH].astype(jnp.bfloat16)    # (M, H*DH)
    gate_v = proj[:, OFF_GV:OFF_GV + HE]                       # (M, H*E) f32
    gate_d = proj[:, OFF_GD:OFF_GD + HE]                       # (M, H*E) f32
    v_exp = proj[:, OFF_V:OFF_V + E * DH]                      # (M, E*DH) f32

    def topk_mask(g):
        # g: (M, E). rank[:, e] = #{j : g[:, j] > g[:, e]}; select if rank < SEL.
        # E full-width compares per head, reused for every expert.
        rank = jnp.zeros_like(g)
        for j in range(E):
            rank = rank + (g[:, j:j + 1] > g).astype(jnp.float32)
        return (rank < float(SEL)).astype(jnp.float32)

    # E running accumulators per batch element: live state bounded to E*(T,DH) f32
    # per batch (no B_BLK*H attn slabs kept around for a later loop).
    acc = [[jnp.zeros((T, DH), jnp.float32) for _ in range(E)]
           for _ in range(B_BLK)]

    for h in range(H):
        gv_h = gate_v[:, h * E:(h + 1) * E]                    # (M, E)
        gd_h = gate_d[:, h * E:(h + 1) * E]                    # (M, E)
        wv_h = jax.nn.sigmoid(gv_h) * topk_mask(gv_h)          # sigmoid-weighted sel
        sd_h = topk_mask(gd_h)                                 # unweighted sel

        # moe_v: per-head value = weighted sum of the E shared expert projections
        v_h = wv_h[:, 0:1] * v_exp[:, 0:DH]
        for e in range(1, E):
            v_h = v_h + wv_h[:, e:e + 1] * v_exp[:, e * DH:(e + 1) * DH]
        vh = v_h.astype(jnp.bfloat16)

        qh = q_all[:, h * DH:(h + 1) * DH]
        kh = k_all[:, h * DH:(h + 1) * DH]

        # scaled dot-product attention, per sequence in the batch block
        for b in range(B_BLK):
            rows = slice(b * T, (b + 1) * T)
            scores = jax.lax.dot_general(                       # (T, T) f32
                qh[rows], kh[rows], (((1,), (1,)), ((), ())),
                preferred_element_type=jnp.float32)
            m = jnp.max(scores, axis=-1, keepdims=True)
            p = jnp.exp(scores - m)
            inv = pl.reciprocal(jnp.sum(p, axis=-1, keepdims=True), approx=True)
            probs = (p * inv).astype(jnp.bfloat16)
            attn_bh = jnp.dot(probs, vh[rows],                  # (T, DH) f32
                              preferred_element_type=jnp.float32)
            # moe_out accumulation fused in (selection commutes with the linear
            # output expert): A_e += sel_d[:, h, e] * attn_h
            for e in range(E):
                acc[b][e] = acc[b][e] + sd_h[rows, e:e + 1] * attn_bh

    # Build (M, E*DH) stacked accumulator in registers (no VMEM scratch round-trip)
    # and do a SINGLE stacked output projection for the whole slab.
    a_stacked = jnp.concatenate(
        [jnp.concatenate(acc[b], axis=-1) for b in range(B_BLK)], axis=0)
    out = jax.lax.dot_general(                                  # (M, DIM) f32
        a_stacked.astype(jnp.bfloat16), wo_ref[...],
        (((1,), (0,)), ((), ())),
        preferred_element_type=jnp.float32)
    out_ref[...] = out.astype(out_ref.dtype)


# -------------------------- one-time weight prep ---------------------------- #
def prepare_switchhead_weights(wq, wk, ws, wd, wv, wo, *, num_heads, dim_head,
                               num_experts):
    """Stack/transpose/pad/cast all weights once (NOT per forward call)."""
    H, DH, E = num_heads, dim_head, num_experts
    DIM = wq.shape[1]
    HDH, HE = H * DH, H * E
    scale = DH ** (-0.5)

    # (weight (rows, DIM), logical width); scale folded into Wq rows.
    groups = [(wq * scale, HDH), (wk, HDH), (ws, HE), (wd, HE),
              (wv.reshape(E * DH, DIM), E * DH)]
    cols, offsets, off = [], [], 0
    for w, width in groups:
        padded = _round_up(width, 128)       # lane-align every group start
        offsets.append(off)
        wt = jnp.transpose(w)                # (DIM, width) — MXU-native (K, N)
        if padded != width:
            wt = jnp.concatenate(
                [wt, jnp.zeros((DIM, padded - width), wt.dtype)], axis=1)
        cols.append(wt)
        off += padded
    w_all = jnp.concatenate(cols, axis=1).astype(jnp.bfloat16)   # (DIM, N_padded)

    # Output experts stacked so sum_e A_e @ wo[e]^T == A_stacked @ wo_big.
    wo_big = jnp.transpose(wo, (0, 2, 1)).reshape(E * DH, DIM).astype(jnp.bfloat16)
    return w_all, wo_big, tuple(offsets)


# ------------------------------ wrapper ------------------------------------ #
def switchhead_attention(x, w_all, wo_big, offsets, *,
                         num_heads, dim_head, num_experts, sel_experts,
                         batch_block=1):
    B, T, D = x.shape
    H, DH, E = num_heads, dim_head, num_experts
    assert B % batch_block == 0, "batch must be divisible by batch_block"
    M = batch_block * T
    N_ALL = w_all.shape[1]

    # Flatten (B, T, D) -> (B*T, D): kernel works on a lane-dense 2-D slab.
    x2 = x.reshape(B * T, D).astype(jnp.bfloat16)

    kernel = functools.partial(
        _switchhead_kernel, B_BLK=batch_block, T=T, H=H, DH=DH, E=E,
        SEL=sel_experts, OFF_Q=offsets[0], OFF_K=offsets[1],
        OFF_GV=offsets[2], OFF_GD=offsets[3], OFF_V=offsets[4])

    out2 = pl.pallas_call(
        kernel,
        out_shape=jax.ShapeDtypeStruct((B * T, D), jnp.bfloat16),
        grid=(B // batch_block,),
        in_specs=[
            pl.BlockSpec((M, D), lambda i: (i, 0)),              # x slab
            # Grid-invariant weights: constant index map -> fetched once.
            pl.BlockSpec((D, N_ALL), lambda i: (0, 0)),
            pl.BlockSpec((E * DH, D), lambda i: (0, 0)),
        ],
        out_specs=pl.BlockSpec((M, D), lambda i: (i, 0)),
        compiler_params=pltpu.CompilerParams(
            dimension_semantics=("parallel",),
            vmem_limit_bytes=64 * 1024 * 1024),
    )(x2, w_all, wo_big)
    return out2.reshape(B, T, D)


# --------------------------- pure-JAX reference ----------------------------- #
def reference(x, wq, wk, ws, wd, wv, wo, *, H, DH, E, SEL):
    B, T, D = x.shape
    scale = DH ** (-0.5)
    q = (x @ wq.T).reshape(B, T, H, DH).transpose(0, 2, 1, 3)
    k = (x @ wk.T).reshape(B, T, H, DH).transpose(0, 2, 1, 3)

    gate_v = (x @ ws.T).reshape(B, T, H, E)
    rank_v = jnp.sum((gate_v[..., None, :] > gate_v[..., :, None]), axis=-1)
    gv = jax.nn.sigmoid(gate_v) * (rank_v < SEL).astype(jnp.float32)
    v_exp = jnp.einsum('btd,ekd->btek', x, wv)          # (B,T,E,DH)
    v = jnp.einsum('bthe,btek->bhtk', gv, v_exp)        # (B,H,T,DH)

    scores = jnp.einsum('bhid,bhjd->bhij', q * scale, k)
    probs = jax.nn.softmax(scores, axis=-1)
    attn = jnp.einsum('bhij,bhjd->bihd', probs, v)      # (B,T,H,DH)

    gate_d = (x @ wd.T).reshape(B, T, H, E)
    rank_d = jnp.sum((gate_d[..., None, :] > gate_d[..., :, None]), axis=-1)
    gd = (rank_d < SEL).astype(jnp.float32)             # unweighted selection
    out_exp = jnp.einsum('bthk,edk->bthed', attn, wo)   # (B,T,H,E,D)
    out = jnp.einsum('bthe,bthed->bthd', gd, out_exp)   # (B,T,H,D)
    return out.sum(axis=2)                              # (B,T,D)


# ------------------------------- main --------------------------------------- #
if __name__ == "__main__":
    B, T = 4, 8
    DIM, H, DH, E, SEL = 32, 4, 16, 4, 2

    key = jax.random.PRNGKey(0)
    kx, kq, kk, ks, kd, kv, ko = jax.random.split(key, 7)

    def bf16_round(a):
        # Pre-round inputs to bf16-representable values so kernel (bf16 MXU) and
        # f32 reference see identical logits and make identical top-k selections.
        return a.astype(jnp.bfloat16).astype(jnp.float32)

    s = 1.0 / np.sqrt(DIM)
    x = bf16_round(jax.random.normal(kx, (B, T, DIM), dtype=jnp.float32))
    wq = bf16_round(jax.random.normal(kq, (H * DH, DIM), dtype=jnp.float32) * s)
    wk = bf16_round(jax.random.normal(kk, (H * DH, DIM), dtype=jnp.float32) * s)
    ws = bf16_round(jax.random.normal(ks, (H * E, DIM), dtype=jnp.float32) * s)
    wd = bf16_round(jax.random.normal(kd, (H * E, DIM), dtype=jnp.float32) * s)
    wv = bf16_round(jax.random.normal(kv, (E, DH, DIM), dtype=jnp.float32) * s)
    wo = bf16_round(jax.random.normal(ko, (E, DIM, DH), dtype=jnp.float32)
                    * (1.0 / np.sqrt(DH)))

    # One-time weight preparation (hoisted out of the forward call).
    w_all, wo_big, offsets = prepare_switchhead_weights(
        wq, wk, ws, wd, wv, wo, num_heads=H, dim_head=DH, num_experts=E)

    out = switchhead_attention(
        x, w_all, wo_big, offsets,
        num_heads=H, dim_head=DH, num_experts=E, sel_experts=SEL,
        batch_block=2)                                   # grid = 2 (even, v7x)
    out = jax.block_until_ready(out)

    ref = reference(x, wq, wk, ws, wd, wv, wo, H=H, DH=DH, E=E, SEL=SEL)
    ref = jax.block_until_ready(ref)

    # Tolerance sized for bf16 MXU matmuls + bf16 output + approx reciprocal
    # vs. an f32 reference.
    np.testing.assert_allclose(np.asarray(out.astype(jnp.float32)),
                               np.asarray(ref), rtol=3e-2, atol=3e-2)
    print("KERNEL_OK")
</pallas_src>

<mosaic_0001>
module attributes {stable_mosaic.version = 11 : i64} {
  func.func @_switchhead_kernel(%arg0: i32, %arg1: memref<16x32xbf16, #tpu.memory_space<vmem>>, %arg2: memref<32x640xbf16, #tpu.memory_space<vmem>>, %arg3: memref<64x32xbf16, #tpu.memory_space<vmem>>, %arg4: memref<16x32xbf16, #tpu.memory_space<vmem>>) attributes {dimension_semantics = [#tpu.dimension_semantics<parallel>], iteration_bounds = array<i64: 2>, scalar_prefetch = 0 : i64, scratch_operands = 0 : i64, tpu.core_type = #tpu.core_type<tc>, window_params = [{transform_indices = @transform_0, window_bounds = array<i64: 16, 32>}, {pipeline_mode = #tpu.pipeline_mode<synchronous>, transform_indices = @transform_1, window_bounds = array<i64: 32, 640>}, {pipeline_mode = #tpu.pipeline_mode<synchronous>, transform_indices = @transform_2, window_bounds = array<i64: 64, 32>}, {transform_indices = @transform_3, window_bounds = array<i64: 16, 32>}]} {
    %c0 = arith.constant 0 : index
    %c0_0 = arith.constant 0 : index
    %0 = vector.load %arg1[%c0, %c0_0] : memref<16x32xbf16, #tpu.memory_space<vmem>>, vector<16x32xbf16>
    %c0_1 = arith.constant 0 : index
    %c0_2 = arith.constant 0 : index
    %1 = vector.load %arg2[%c0_1, %c0_2] : memref<32x640xbf16, #tpu.memory_space<vmem>>, vector<32x640xbf16>
    %cst = arith.constant dense<0.000000e+00> : vector<16x640xf32>
    %2 = tpu.matmul %0, %1, %cst {dimension_numbers = #tpu.dot_dimension_numbers<[1], [0], [0], [1], [0, 0, 1, 1], [], []>} : vector<16x32xbf16>, vector<32x640xbf16>, vector<16x640xf32> -> vector<16x640xf32>
    %3 = vector.extract_strided_slice %2 {offsets = [0, 0], sizes = [16, 64], strides = [1, 1]} : vector<16x640xf32> to vector<16x64xf32>
    %4 = arith.truncf %3 : vector<16x64xf32> to vector<16x64xbf16>
    %5 = vector.extract_strided_slice %2 {offsets = [0, 128], sizes = [16, 64], strides = [1, 1]} : vector<16x640xf32> to vector<16x64xf32>
    %6 = arith.truncf %5 : vector<16x64xf32> to vector<16x64xbf16>
    %7 = vector.extract_strided_slice %2 {offsets = [0, 256], sizes = [16, 16], strides = [1, 1]} : vector<16x640xf32> to vector<16x16xf32>
    %8 = vector.extract_strided_slice %2 {offsets = [0, 384], sizes = [16, 16], strides = [1, 1]} : vector<16x640xf32> to vector<16x16xf32>
    %9 = vector.extract_strided_slice %2 {offsets = [0, 512], sizes = [16, 64], strides = [1, 1]} : vector<16x640xf32> to vector<16x64xf32>
    %cst_3 = arith.constant 0.000000e+00 : f32
    %10 = vector.broadcast %cst_3 : f32 to vector<8x16xf32>
    %cst_4 = arith.constant 0.000000e+00 : f32
    %11 = vector.broadcast %cst_4 : f32 to vector<8x16xf32>
    %cst_5 = arith.constant 0.000000e+00 : f32
    %12 = vector.broadcast %cst_5 : f32 to vector<8x16xf32>
    %cst_6 = arith.constant 0.000000e+00 : f32
    %13 = vector.broadcast %cst_6 : f32 to vector<8x16xf32>
    %cst_7 = arith.constant 0.000000e+00 : f32
    %14 = vector.broadcast %cst_7 : f32 to vector<8x16xf32>
    %cst_8 = arith.constant 0.000000e+00 : f32
    %15 = vector.broadcast %cst_8 : f32 to vector<8x16xf32>
    %cst_9 = arith.constant 0.000000e+00 : f32
    %16 = vector.broadcast %cst_9 : f32 to vector<8x16xf32>
    %cst_10 = arith.constant 0.000000e+00 : f32
    %17 = vector.broadcast %cst_10 : f32 to vector<8x16xf32>
    %18 = vector.extract_strided_slice %7 {offsets = [0, 0], sizes = [16, 4], strides = [1, 1]} : vector<16x16xf32> to vector<16x4xf32>
    %19 = vector.extract_strided_slice %8 {offsets = [0, 0], sizes = [16, 4], strides = [1, 1]} : vector<16x16xf32> to vector<16x4xf32>
    %20 = arith.negf %18 : vector<16x4xf32>
    %21 = math.exp %20 : vector<16x4xf32>
    %cst_11 = arith.constant 1.000000e+00 : f32
    %22 = vector.broadcast %cst_11 : f32 to vector<16x4xf32>
    %23 = arith.addf %22, %21 : vector<16x4xf32>
    %24 = arith.divf %22, %23 : vector<16x4xf32>
    %cst_12 = arith.constant 0.000000e+00 : f32
    %25 = vector.broadcast %cst_12 : f32 to vector<16x4xf32>
    %26 = vector.extract_strided_slice %18 {offsets = [0, 0], sizes = [16, 1], strides = [1, 1]} : vector<16x4xf32> to vector<16x1xf32>
    %27 = vector.broadcast %26 : vector<16x1xf32> to vector<16x4xf32>
    %28 = arith.cmpf ogt, %27, %18 : vector<16x4xf32>
    %29 = arith.extui %28 : vector<16x4xi1> to vector<16x4xi32>
    %30 = arith.sitofp %29 : vector<16x4xi32> to vector<16x4xf32>
    %31 = arith.addf %25, %30 : vector<16x4xf32>
    %32 = vector.extract_strided_slice %18 {offsets = [0, 1], sizes = [16, 1], strides = [1, 1]} : vector<16x4xf32> to vector<16x1xf32>
    %33 = vector.broadcast %32 : vector<16x1xf32> to vector<16x4xf32>
    %34 = arith.cmpf ogt, %33, %18 : vector<16x4xf32>
    %35 = arith.extui %34 : vector<16x4xi1> to vector<16x4xi32>
    %36 = arith.sitofp %35 : vector<16x4xi32> to vector<16x4xf32>
    %37 = arith.addf %31, %36 : vector<16x4xf32>
    %38 = vector.extract_strided_slice %18 {offsets = [0, 2], sizes = [16, 1], strides = [1, 1]} : vector<16x4xf32> to vector<16x1xf32>
    %39 = vector.broadcast %38 : vector<16x1xf32> to vector<16x4xf32>
    %40 = arith.cmpf ogt, %39, %18 : vector<16x4xf32>
    %41 = arith.extui %40 : vector<16x4xi1> to vector<16x4xi32>
    %42 = arith.sitofp %41 : vector<16x4xi32> to vector<16x4xf32>
    %43 = arith.addf %37, %42 : vector<16x4xf32>
    %44 = vector.extract_strided_slice %18 {offsets = [0, 3], sizes = [16, 1], strides = [1, 1]} : vector<16x4xf32> to vector<16x1xf32>
    %45 = vector.broadcast %44 : vector<16x1xf32> to vector<16x4xf32>
    %46 = arith.cmpf ogt, %45, %18 : vector<16x4xf32>
    %47 = arith.extui %46 : vector<16x4xi1> to vector<16x4xi32>
    %48 = arith.sitofp %47 : vector<16x4xi32> to vector<16x4xf32>
    %49 = arith.addf %43, %48 : vector<16x4xf32>
    %cst_13 = arith.constant 2.000000e+00 : f32
    %50 = vector.broadcast %cst_13 : f32 to vector<16x4xf32>
    %51 = arith.cmpf olt, %49, %50 : vector<16x4xf32>
    %52 = arith.extui %51 : vector<16x4xi1> to vector<16x4xi32>
    %53 = arith.sitofp %52 : vector<16x4xi32> to vector<16x4xf32>
    %54 = arith.mulf %24, %53 : vector<16x4xf32>
    %cst_14 = arith.constant 0.000000e+00 : f32
    %55 = vector.broadcast %cst_14 : f32 to vector<16x4xf32>
    %56 = vector.extract_strided_slice %19 {offsets = [0, 0], sizes = [16, 1], strides = [1, 1]} : vector<16x4xf32> to vector<16x1xf32>
    %57 = vector.broadcast %56 : vector<16x1xf32> to vector<16x4xf32>
    %58 = arith.cmpf ogt, %57, %19 : vector<16x4xf32>
    %59 = arith.extui %58 : vector<16x4xi1> to vector<16x4xi32>
    %60 = arith.sitofp %59 : vector<16x4xi32> to vector<16x4xf32>
    %61 = arith.addf %55, %60 : vector<16x4xf32>
    %62 = vector.extract_strided_slice %19 {offsets = [0, 1], sizes = [16, 1], strides = [1, 1]} : vector<16x4xf32> to vector<16x1xf32>
    %63 = vector.broadcast %62 : vector<16x1xf32> to vector<16x4xf32>
    %64 = arith.cmpf ogt, %63, %19 : vector<16x4xf32>
    %65 = arith.extui %64 : vector<16x4xi1> to vector<16x4xi32>
    %66 = arith.sitofp %65 : vector<16x4xi32> to vector<16x4xf32>
    %67 = arith.addf %61, %66 : vector<16x4xf32>
    %68 = vector.extract_strided_slice %19 {offsets = [0, 2], sizes = [16, 1], strides = [1, 1]} : vector<16x4xf32> to vector<16x1xf32>
    %69 = vector.broadcast %68 : vector<16x1xf32> to vector<16x4xf32>
    %70 = arith.cmpf ogt, %69, %19 : vector<16x4xf32>
    %71 = arith.extui %70 : vector<16x4xi1> to vector<16x4xi32>
    %72 = arith.sitofp %71 : vector<16x4xi32> to vector<16x4xf32>
    %73 = arith.addf %67, %72 : vector<16x4xf32>
    %74 = vector.extract_strided_slice %19 {offsets = [0, 3], sizes = [16, 1], strides = [1, 1]} : vector<16x4xf32> to vector<16x1xf32>
    %75 = vector.broadcast %74 : vector<16x1xf32> to vector<16x4xf32>
    %76 = arith.cmpf ogt, %75, %19 : vector<16x4xf32>
    %77 = arith.extui %76 : vector<16x4xi1> to vector<16x4xi32>
    %78 = arith.sitofp %77 : vector<16x4xi32> to vector<16x4xf32>
    %79 = arith.addf %73, %78 : vector<16x4xf32>
    %cst_15 = arith.constant 2.000000e+00 : f32
    %80 = vector.broadcast %cst_15 : f32 to vector<16x4xf32>
    %81 = arith.cmpf olt, %79, %80 : vector<16x4xf32>
    %82 = arith.extui %81 : vector<16x4xi1> to vector<16x4xi32>
    %83 = arith.sitofp %82 : vector<16x4xi32> to vector<16x4xf32>
    %84 = vector.extract_strided_slice %54 {offsets = [0, 0], sizes = [16, 1], strides = [1, 1]} : vector<16x4xf32> to vector<16x1xf32>
    %85 = vector.extract_strided_slice %9 {offsets = [0, 0], sizes = [16, 16], strides = [1, 1]} : vector<16x64xf32> to vector<16x16xf32>
    %86 = vector.broadcast %84 : vector<16x1xf32> to vector<16x16xf32>
    %87 = arith.mulf %86, %85 : vector<16x16xf32>
    %88 = vector.extract_strided_slice %54 {offsets = [0, 1], sizes = [16, 1], strides = [1, 1]} : vector<16x4xf32> to vector<16x1xf32>
    %89 = vector.extract_strided_slice %9 {offsets = [0, 16], sizes = [16, 16], strides = [1, 1]} : vector<16x64xf32> to vector<16x16xf32>
    %90 = vector.broadcast %88 : vector<16x1xf32> to vector<16x16xf32>
    %91 = arith.mulf %90, %89 : vector<16x16xf32>
    %92 = arith.addf %87, %91 : vector<16x16xf32>
    %93 = vector.extract_strided_slice %54 {offsets = [0, 2], sizes = [16, 1], strides = [1, 1]} : vector<16x4xf32> to vector<16x1xf32>
    %94 = vector.extract_strided_slice %9 {offsets = [0, 32], sizes = [16, 16], strides = [1, 1]} : vector<16x64xf32> to vector<16x16xf32>
    %95 = vector.broadcast %93 : vector<16x1xf32> to vector<16x16xf32>
    %96 = arith.mulf %95, %94 : vector<16x16xf32>
    %97 = arith.addf %92, %96 : vector<16x16xf32>
    %98 = vector.extract_strided_slice %54 {offsets = [0, 3], sizes = [16, 1], strides = [1, 1]} : vector<16x4xf32> to vector<16x1xf32>
    %99 = vector.extract_strided_slice %9 {offsets = [0, 48], sizes = [16, 16], strides = [1, 1]} : vector<16x64xf32> to vector<16x16xf32>
    %100 = vector.broadcast %98 : vector<16x1xf32> to vector<16x16xf32>
    %101 = arith.mulf %100, %99 : vector<16x16xf32>
    %102 = arith.addf %97, %101 : vector<16x16xf32>
    %103 = arith.truncf %102 : vector<16x16xf32> to vector<16x16xbf16>
    %104 = vector.extract_strided_slice %4 {offsets = [0, 0], sizes = [16, 16], strides = [1, 1]} : vector<16x64xbf16> to vector<16x16xbf16>
    %105 = vector.extract_strided_slice %6 {offsets = [0, 0], sizes = [16, 16], strides = [1, 1]} : vector<16x64xbf16> to vector<16x16xbf16>
    %106 = vector.extract_strided_slice %104 {offsets = [0, 0], sizes = [8, 16], strides = [1, 1]} : vector<16x16xbf16> to vector<8x16xbf16>
    %107 = vector.extract_strided_slice %105 {offsets = [0, 0], sizes = [8, 16], strides = [1, 1]} : vector<16x16xbf16> to vector<8x16xbf16>
    %cst_16 = arith.constant dense<0.000000e+00> : vector<8x8xf32>
    %108 = tpu.matmul %106, %107, %cst_16 {dimension_numbers = #tpu.dot_dimension_numbers<[1], [1], [0], [0], [0, 0, 1, 0], [], []>} : vector<8x16xbf16>, vector<8x16xbf16>, vector<8x8xf32> -> vector<8x8xf32>
    %cst_17 = arith.constant dense<0xFF800000> : vector<8xf32>
    %109 = vector.multi_reduction <maximumf>, %108, %cst_17 [1] : vector<8x8xf32> to vector<8xf32>
    %110 = vector.shape_cast %109 : vector<8xf32> to vector<8x1xf32>
    %111 = vector.broadcast %110 : vector<8x1xf32> to vector<8x8xf32>
    %112 = arith.subf %108, %111 : vector<8x8xf32>
    %113 = math.exp %112 : vector<8x8xf32>
    %cst_18 = arith.constant dense<0.000000e+00> : vector<8xf32>
    %114 = vector.multi_reduction <add>, %113, %cst_18 [1] : vector<8x8xf32> to vector<8xf32>
    %115 = vector.shape_cast %114 : vector<8xf32> to vector<8x1xf32>
    %116 = tpu.reciprocal %115 {approx = true} : vector<8x1xf32> -> vector<8x1xf32>
    %117 = vector.broadcast %116 : vector<8x1xf32> to vector<8x8xf32>
    %118 = arith.mulf %113, %117 : vector<8x8xf32>
    %119 = arith.truncf %118 : vector<8x8xf32> to vector<8x8xbf16>
    %120 = vector.extract_strided_slice %103 {offsets = [0, 0], sizes = [8, 16], strides = [1, 1]} : vector<16x16xbf16> to vector<8x16xbf16>
    %cst_19 = arith.constant dense<0.000000e+00> : vector<8x16xf32>
    %121 = tpu.matmul %119, %120, %cst_19 {dimension_numbers = #tpu.dot_dimension_numbers<[1], [0], [0], [1], [0, 0, 1, 1], [], []>} : vector<8x8xbf16>, vector<8x16xbf16>, vector<8x16xf32> -> vector<8x16xf32>
    %122 = vector.extract_strided_slice %83 {offsets = [0, 0], sizes = [8, 1], strides = [1, 1]} : vector<16x4xf32> to vector<8x1xf32>
    %123 = vector.broadcast %122 : vector<8x1xf32> to vector<8x16xf32>
    %124 = arith.mulf %123, %121 : vector<8x16xf32>
    %125 = arith.addf %10, %124 : vector<8x16xf32>
    %126 = vector.extract_strided_slice %83 {offsets = [0, 1], sizes = [8, 1], strides = [1, 1]} : vector<16x4xf32> to vector<8x1xf32>
    %127 = vector.broadcast %126 : vector<8x1xf32> to vector<8x16xf32>
    %128 = arith.mulf %127, %121 : vector<8x16xf32>
    %129 = arith.addf %11, %128 : vector<8x16xf32>
    %130 = vector.extract_strided_slice %83 {offsets = [0, 2], sizes = [8, 1], strides = [1, 1]} : vector<16x4xf32> to vector<8x1xf32>
    %131 = vector.broadcast %130 : vector<8x1xf32> to vector<8x16xf32>
    %132 = arith.mulf %131, %121 : vector<8x16xf32>
    %133 = arith.addf %12, %132 : vector<8x16xf32>
    %134 = vector.extract_strided_slice %83 {offsets = [0, 3], sizes = [8, 1], strides = [1, 1]} : vector<16x4xf32> to vector<8x1xf32>
    %135 = vector.broadcast %134 : vector<8x1xf32> to vector<8x16xf32>
    %136 = arith.mulf %135, %121 : vector<8x16xf32>
    %137 = arith.addf %13, %136 : vector<8x16xf32>
    %138 = vector.extract_strided_slice %104 {offsets = [8, 0], sizes = [8, 16], strides = [1, 1]} : vector<16x16xbf16> to vector<8x16xbf16>
    %139 = vector.extract_strided_slice %105 {offsets = [8, 0], sizes = [8, 16], strides = [1, 1]} : vector<16x16xbf16> to vector<8x16xbf16>
    %cst_20 = arith.constant dense<0.000000e+00> : vector<8x8xf32>
    %140 = tpu.matmul %138, %139, %cst_20 {dimension_numbers = #tpu.dot_dimension_numbers<[1], [1], [0], [0], [0, 0, 1, 0], [], []>} : vector<8x16xbf16>, vector<8x16xbf16>, vector<8x8xf32> -> vector<8x8xf32>
    %cst_21 = arith.constant dense<0xFF800000> : vector<8xf32>
    %141 = vector.multi_reduction <maximumf>, %140, %cst_21 [1] : vector<8x8xf32> to vector<8xf32>
    %142 = vector.shape_cast %141 : vector<8xf32> to vector<8x1xf32>
    %143 = vector.broadcast %142 : vector<8x1xf32> to vector<8x8xf32>
    %144 = arith.subf %140, %143 : vector<8x8xf32>
    %145 = math.exp %144 : vector<8x8xf32>
    %cst_22 = arith.constant dense<0.000000e+00> : vector<8xf32>
    %146 = vector.multi_reduction <add>, %145, %cst_22 [1] : vector<8x8xf32> to vector<8xf32>
    %147 = vector.shape_cast %146 : vector<8xf32> to vector<8x1xf32>
    %148 = tpu.reciprocal %147 {approx = true} : vector<8x1xf32> -> vector<8x1xf32>
    %149 = vector.broadcast %148 : vector<8x1xf32> to vector<8x8xf32>
    %150 = arith.mulf %145, %149 : vector<8x8xf32>
    %151 = arith.truncf %150 : vector<8x8xf32> to vector<8x8xbf16>
    %152 = vector.extract_strided_slice %103 {offsets = [8, 0], sizes = [8, 16], strides = [1, 1]} : vector<16x16xbf16> to vector<8x16xbf16>
    %cst_23 = arith.constant dense<0.000000e+00> : vector<8x16xf32>
    %153 = tpu.matmul %151, %152, %cst_23 {dimension_numbers = #tpu.dot_dimension_numbers<[1], [0], [0], [1], [0, 0, 1, 1], [], []>} : vector<8x8xbf16>, vector<8x16xbf16>, vector<8x16xf32> -> vector<8x16xf32>
    %154 = vector.extract_strided_slice %83 {offsets = [8, 0], sizes = [8, 1], strides = [1, 1]} : vector<16x4xf32> to vector<8x1xf32>
    %155 = vector.broadcast %154 : vector<8x1xf32> to vector<8x16xf32>
    %156 = arith.mulf %155, %153 : vector<8x16xf32>
    %157 = arith.addf %14, %156 : vector<8x16xf32>
    %158 = vector.extract_strided_slice %83 {offsets = [8, 1], sizes = [8, 1], strides = [1, 1]} : vector<16x4xf32> to vector<8x1xf32>
    %159 = vector.broadcast %158 : vector<8x1xf32> to vector<8x16xf32>
    %160 = arith.mulf %159, %153 : vector<8x16xf32>
    %161 = arith.addf %15, %160 : vector<8x16xf32>
    %162 = vector.extract_strided_slice %83 {offsets = [8, 2], sizes = [8, 1], strides = [1, 1]} : vector<16x4xf32> to vector<8x1xf32>
    %163 = vector.broadcast %162 : vector<8x1xf32> to vector<8x16xf32>
    %164 = arith.mulf %163, %153 : vector<8x16xf32>
    %165 = arith.addf %16, %164 : vector<8x16xf32>
    %166 = vector.extract_strided_slice %83 {offsets = [8, 3], sizes = [8, 1], strides = [1, 1]} : vector<16x4xf32> to vector<8x1xf32>
    %167 = vector.broadcast %166 : vector<8x1xf32> to vector<8x16xf32>
    %168 = arith.mulf %167, %153 : vector<8x16xf32>
    %169 = arith.addf %17, %168 : vector<8x16xf32>
    %170 = vector.extract_strided_slice %7 {offsets = [0, 4], sizes = [16, 4], strides = [1, 1]} : vector<16x16xf32> to vector<16x4xf32>
    %171 = vector.extract_strided_slice %8 {offsets = [0, 4], sizes = [16, 4], strides = [1, 1]} : vector<16x16xf32> to vector<16x4xf32>
    %172 = arith.negf %170 : vector<16x4xf32>
    %173 = math.exp %172 : vector<16x4xf32>
    %cst_24 = arith.constant 1.000000e+00 : f32
    %174 = vector.broadcast %cst_24 : f32 to vector<16x4xf32>
    %175 = arith.addf %174, %173 : vector<16x4xf32>
    %176 = arith.divf %174, %175 : vector<16x4xf32>
    %cst_25 = arith.constant 0.000000e+00 : f32
    %177 = vector.broadcast %cst_25 : f32 to vector<16x4xf32>
    %178 = vector.extract_strided_slice %170 {offsets = [0, 0], sizes = [16, 1], strides = [1, 1]} : vector<16x4xf32> to vector<16x1xf32>
    %179 = vector.broadcast %178 : vector<16x1xf32> to vector<16x4xf32>
    %180 = arith.cmpf ogt, %179, %170 : vector<16x4xf32>
    %181 = arith.extui %180 : vector<16x4xi1> to vector<16x4xi32>
    %182 = arith.sitofp %181 : vector<16x4xi32> to vector<16x4xf32>
    %183 = arith.addf %177, %182 : vector<16x4xf32>
    %184 = vector.extract_strided_slice %170 {offsets = [0, 1], sizes = [16, 1], strides = [1, 1]} : vector<16x4xf32> to vector<16x1xf32>
    %185 = vector.broadcast %184 : vector<16x1xf32> to vector<16x4xf32>
    %186 = arith.cmpf ogt, %185, %170 : vector<16x4xf32>
    %187 = arith.extui %186 : vector<16x4xi1> to vector<16x4xi32>
    %188 = arith.sitofp %187 : vector<16x4xi32> to vector<16x4xf32>
    %189 = arith.addf %183, %188 : vector<16x4xf32>
    %190 = vector.extract_strided_slice %170 {offsets = [0, 2], sizes = [16, 1], strides = [1, 1]} : vector<16x4xf32> to vector<16x1xf32>
    %191 = vector.broadcast %190 : vector<16x1xf32> to vector<16x4xf32>
    %192 = arith.cmpf ogt, %191, %170 : vector<16x4xf32>
    %193 = arith.extui %192 : vector<16x4xi1> to vector<16x4xi32>
    %194 = arith.sitofp %193 : vector<16x4xi32> to vector<16x4xf32>
    %195 = arith.addf %189, %194 : vector<16x4xf32>
    %196 = vector.extract_strided_slice %170 {offsets = [0, 3], sizes = [16, 1], strides = [1, 1]} : vector<16x4xf32> to vector<16x1xf32>
    %197 = vector.broadcast %196 : vector<16x1xf32> to vector<16x4xf32>
    %198 = arith.cmpf ogt, %197, %170 : vector<16x4xf32>
    %199 = arith.extui %198 : vector<16x4xi1> to vector<16x4xi32>
    %200 = arith.sitofp %199 : vector<16x4xi32> to vector<16x4xf32>
    %201 = arith.addf %195, %200 : vector<16x4xf32>
    %cst_26 = arith.constant 2.000000e+00 : f32
    %202 = vector.broadcast %cst_26 : f32 to vector<16x4xf32>
    %203 = arith.cmpf olt, %201, %202 : vector<16x4xf32>
    %204 = arith.extui %203 : vector<16x4xi1> to vector<16x4xi32>
    %205 = arith.sitofp %204 : vector<16x4xi32> to vector<16x4xf32>
    %206 = arith.mulf %176, %205 : vector<16x4xf32>
    %cst_27 = arith.constant 0.000000e+00 : f32
    %207 = vector.broadcast %cst_27 : f32 to vector<16x4xf32>
    %208 = vector.extract_strided_slice %171 {offsets = [0, 0], sizes = [16, 1], strides = [1, 1]} : vector<16x4xf32> to vector<16x1xf32>
    %209 = vector.broadcast %208 : vector<16x1xf32> to vector<16x4xf32>
    %210 = arith.cmpf ogt, %209, %171 : vector<16x4xf32>
    %211 = arith.extui %210 : vector<16x4xi1> to vector<16x4xi32>
    %212 = arith.sitofp %211 : vector<16x4xi32> to vector<16x4xf32>
    %213 = arith.addf %207, %212 : vector<16x4xf32>
    %214 = vector.extract_strided_slice %171 {offsets = [0, 1], sizes = [16, 1], strides = [1, 1]} : vector<16x4xf32> to vector<16x1xf32>
    %215 = vector.broadcast %214 : vector<16x1xf32> to vector<16x4xf32>
    %216 = arith.cmpf ogt, %215, %171 : vector<16x4xf32>
    %217 = arith.extui %216 : vector<16x4xi1> to vector<16x4xi32>
    %218 = arith.sitofp %217 : vector<16x4xi32> to vector<16x4xf32>
    %219 = arith.addf %213, %218 : vector<16x4xf32>
    %220 = vector.extract_strided_slice %171 {offsets = [0, 2], sizes = [16, 1], strides = [1, 1]} : vector<16x4xf32> to vector<16x1xf32>
    %221 = vector.broadcast %220 : vector<16x1xf32> to vector<16x4xf32>
    %222 = arith.cmpf ogt, %221, %171 : vector<16x4xf32>
    %223 = arith.extui %222 : vector<16x4xi1> to vector<16x4xi32>
    %224 = arith.sitofp %223 : vector<16x4xi32> to vector<16x4xf32>
    %225 = arith.addf %219, %224 : vector<16x4xf32>
    %226 = vector.extract_strided_slice %171 {offsets = [0, 3], sizes = [16, 1], strides = [1, 1]} : vector<16x4xf32> to vector<16x1xf32>
    %227 = vector.broadcast %226 : vector<16x1xf32> to vector<16x4xf32>
    %228 = arith.cmpf ogt, %227, %171 : vector<16x4xf32>
    %229 = arith.extui %228 : vector<16x4xi1> to vector<16x4xi32>
    %230 = arith.sitofp %229 : vector<16x4xi32> to vector<16x4xf32>
    %231 = arith.addf %225, %230 : vector<16x4xf32>
    %cst_28 = arith.constant 2.000000e+00 : f32
    %232 = vector.broadcast %cst_28 : f32 to vector<16x4xf32>
    %233 = arith.cmpf olt, %231, %232 : vector<16x4xf32>
    %234 = arith.extui %233 : vector<16x4xi1> to vector<16x4xi32>
    %235 = arith.sitofp %234 : vector<16x4xi32> to vector<16x4xf32>
    %236 = vector.extract_strided_slice %206 {offsets = [0, 0], sizes = [16, 1], strides = [1, 1]} : vector<16x4xf32> to vector<16x1xf32>
    %237 = vector.extract_strided_slice %9 {offsets = [0, 0], sizes = [16, 16], strides = [1, 1]} : vector<16x64xf32> to vector<16x16xf32>
    %238 = vector.broadcast %236 : vector<16x1xf32> to vector<16x16xf32>
    %239 = arith.mulf %238, %237 : vector<16x16xf32>
    %240 = vector.extract_strided_slice %206 {offsets = [0, 1], sizes = [16, 1], strides = [1, 1]} : vector<16x4xf32> to vector<16x1xf32>
    %241 = vector.extract_strided_slice %9 {offsets = [0, 16], sizes = [16, 16], strides = [1, 1]} : vector<16x64xf32> to vector<16x16xf32>
    %242 = vector.broadcast %240 : vector<16x1xf32> to vector<16x16xf32>
    %243 = arith.mulf %242, %241 : vector<16x16xf32>
    %244 = arith.addf %239, %243 : vector<16x16xf32>
    %245 = vector.extract_strided_slice %206 {offsets = [0, 2], sizes = [16, 1], strides = [1, 1]} : vector<16x4xf32> to vector<16x1xf32>
    %246 = vector.extract_strided_slice %9 {offsets = [0, 32], sizes = [16, 16], strides = [1, 1]} : vector<16x64xf32> to vector<16x16xf32>
    %247 = vector.broadcast %245 : vector<16x1xf32> to vector<16x16xf32>
    %248 = arith.mulf %247, %246 : vector<16x16xf32>
    %249 = arith.addf %244, %248 : vector<16x16xf32>
    %250 = vector.extract_strided_slice %206 {offsets = [0, 3], sizes = [16, 1], strides = [1, 1]} : vector<16x4xf32> to vector<16x1xf32>
    %251 = vector.extract_strided_slice %9 {offsets = [0, 48], sizes = [16, 16], strides = [1, 1]} : vector<16x64xf32> to vector<16x16xf32>
    %252 = vector.broadcast %250 : vector<16x1xf32> to vector<16x16xf32>
    %253 = arith.mulf %252, %251 : vector<16x16xf32>
    %254 = arith.addf %249, %253 : vector<16x16xf32>
    %255 = arith.truncf %254 : vector<16x16xf32> to vector<16x16xbf16>
    %256 = vector.extract_strided_slice %4 {offsets = [0, 16], sizes = [16, 16], strides = [1, 1]} : vector<16x64xbf16> to vector<16x16xbf16>
    %257 = vector.extract_strided_slice %6 {offsets = [0, 16], sizes = [16, 16], strides = [1, 1]} : vector<16x64xbf16> to vector<16x16xbf16>
    %258 = vector.extract_strided_slice %256 {offsets = [0, 0], sizes = [8, 16], strides = [1, 1]} : vector<16x16xbf16> to vector<8x16xbf16>
    %259 = vector.extract_strided_slice %257 {offsets = [0, 0], sizes = [8, 16], strides = [1, 1]} : vector<16x16xbf16> to vector<8x16xbf16>
    %cst_29 = arith.constant dense<0.000000e+00> : vector<8x8xf32>
    %260 = tpu.matmul %258, %259, %cst_29 {dimension_numbers = #tpu.dot_dimension_numbers<[1], [1], [0], [0], [0, 0, 1, 0], [], []>} : vector<8x16xbf16>, vector<8x16xbf16>, vector<8x8xf32> -> vector<8x8xf32>
    %cst_30 = arith.constant dense<0xFF800000> : vector<8xf32>
    %261 = vector.multi_reduction <maximumf>, %260, %cst_30 [1] : vector<8x8xf32> to vector<8xf32>
    %262 = vector.shape_cast %261 : vector<8xf32> to vector<8x1xf32>
    %263 = vector.broadcast %262 : vector<8x1xf32> to vector<8x8xf32>
    %264 = arith.subf %260, %263 : vector<8x8xf32>
    %265 = math.exp %264 : vector<8x8xf32>
    %cst_31 = arith.constant dense<0.000000e+00> : vector<8xf32>
    %266 = vector.multi_reduction <add>, %265, %cst_31 [1] : vector<8x8xf32> to vector<8xf32>
    %267 = vector.shape_cast %266 : vector<8xf32> to vector<8x1xf32>
    %268 = tpu.reciprocal %267 {approx = true} : vector<8x1xf32> -> vector<8x1xf32>
    %269 = vector.broadcast %268 : vector<8x1xf32> to vector<8x8xf32>
    %270 = arith.mulf %265, %269 : vector<8x8xf32>
    %271 = arith.truncf %270 : vector<8x8xf32> to vector<8x8xbf16>
    %272 = vector.extract_strided_slice %255 {offsets = [0, 0], sizes = [8, 16], strides = [1, 1]} : vector<16x16xbf16> to vector<8x16xbf16>
    %cst_32 = arith.constant dense<0.000000e+00> : vector<8x16xf32>
    %273 = tpu.matmul %271, %272, %cst_32 {dimension_numbers = #tpu.dot_dimension_numbers<[1], [0], [0], [1], [0, 0, 1, 1], [], []>} : vector<8x8xbf16>, vector<8x16xbf16>, vector<8x16xf32> -> vector<8x16xf32>
    %274 = vector.extract_strided_slice %235 {offsets = [0, 0], sizes = [8, 1], strides = [1, 1]} : vector<16x4xf32> to vector<8x1xf32>
    %275 = vector.broadcast %274 : vector<8x1xf32> to vector<8x16xf32>
    %276 = arith.mulf %275, %273 : vector<8x16xf32>
    %277 = arith.addf %125, %276 : vector<8x16xf32>
    %278 = vector.extract_strided_slice %235 {offsets = [0, 1], sizes = [8, 1], strides = [1, 1]} : vector<16x4xf32> to vector<8x1xf32>
    %279 = vector.broadcast %278 : vector<8x1xf32> to vector<8x16xf32>
    %280 = arith.mulf %279, %273 : vector<8x16xf32>
    %281 = arith.addf %129, %280 : vector<8x16xf32>
    %282 = vector.extract_strided_slice %235 {offsets = [0, 2], sizes = [8, 1], strides = [1, 1]} : vector<16x4xf32> to vector<8x1xf32>
    %283 = vector.broadcast %282 : vector<8x1xf32> to vector<8x16xf32>
    %284 = arith.mulf %283, %273 : vector<8x16xf32>
    %285 = arith.addf %133, %284 : vector<8x16xf32>
    %286 = vector.extract_strided_slice %235 {offsets = [0, 3], sizes = [8, 1], strides = [1, 1]} : vector<16x4xf32> to vector<8x1xf32>
    %287 = vector.broadcast %286 : vector<8x1xf32> to vector<8x16xf32>
    %288 = arith.mulf %287, %273 : vector<8x16xf32>
    %289 = arith.addf %137, %288 : vector<8x16xf32>
    %290 = vector.extract_strided_slice %256 {offsets = [8, 0], sizes = [8, 16], strides = [1, 1]} : vector<16x16xbf16> to vector<8x16xbf16>
    %291 = vector.extract_strided_slice %257 {offsets = [8, 0], sizes = [8, 16], strides = [1, 1]} : vector<16x16xbf16> to vector<8x16xbf16>
    %cst_33 = arith.constant dense<0.000000e+00> : vector<8x8xf32>
    %292 = tpu.matmul %290, %291, %cst_33 {dimension_numbers = #tpu.dot_dimension_numbers<[1], [1], [0], [0], [0, 0, 1, 0], [], []>} : vector<8x16xbf16>, vector<8x16xbf16>, vector<8x8xf32> -> vector<8x8xf32>
    %cst_34 = arith.constant dense<0xFF800000> : vector<8xf32>
    %293 = vector.multi_reduction <maximumf>, %292, %cst_34 [1] : vector<8x8xf32> to vector<8xf32>
    %294 = vector.shape_cast %293 : vector<8xf32> to vector<8x1xf32>
    %295 = vector.broadcast %294 : vector<8x1xf32> to vector<8x8xf32>
    %296 = arith.subf %292, %295 : vector<8x8xf32>
    %297 = math.exp %296 : vector<8x8xf32>
    %cst_35 = arith.constant dense<0.000000e+00> : vector<8xf32>
    %298 = vector.multi_reduction <add>, %297, %cst_35 [1] : vector<8x8xf32> to vector<8xf32>
    %299 = vector.shape_cast %298 : vector<8xf32> to vector<8x1xf32>
    %300 = tpu.reciprocal %299 {approx = true} : vector<8x1xf32> -> vector<8x1xf32>
    %301 = vector.broadcast %300 : vector<8x1xf32> to vector<8x8xf32>
    %302 = arith.mulf %297, %301 : vector<8x8xf32>
    %303 = arith.truncf %302 : vector<8x8xf32> to vector<8x8xbf16>
    %304 = vector.extract_strided_slice %255 {offsets = [8, 0], sizes = [8, 16], strides = [1, 1]} : vector<16x16xbf16> to vector<8x16xbf16>
    %cst_36 = arith.constant dense<0.000000e+00> : vector<8x16xf32>
    %305 = tpu.matmul %303, %304, %cst_36 {dimension_numbers = #tpu.dot_dimension_numbers<[1], [0], [0], [1], [0, 0, 1, 1], [], []>} : vector<8x8xbf16>, vector<8x16xbf16>, vector<8x16xf32> -> vector<8x16xf32>
    %306 = vector.extract_strided_slice %235 {offsets = [8, 0], sizes = [8, 1], strides = [1, 1]} : vector<16x4xf32> to vector<8x1xf32>
    %307 = vector.broadcast %306 : vector<8x1xf32> to vector<8x16xf32>
    %308 = arith.mulf %307, %305 : vector<8x16xf32>
    %309 = arith.addf %157, %308 : vector<8x16xf32>
    %310 = vector.extract_strided_slice %235 {offsets = [8, 1], sizes = [8, 1], strides = [1, 1]} : vector<16x4xf32> to vector<8x1xf32>
    %311 = vector.broadcast %310 : vector<8x1xf32> to vector<8x16xf32>
    %312 = arith.mulf %311, %305 : vector<8x16xf32>
    %313 = arith.addf %161, %312 : vector<8x16xf32>
    %314 = vector.extract_strided_slice %235 {offsets = [8, 2], sizes = [8, 1], strides = [1, 1]} : vector<16x4xf32> to vector<8x1xf32>
    %315 = vector.broadcast %314 : vector<8x1xf32> to vector<8x16xf32>
    %316 = arith.mulf %315, %305 : vector<8x16xf32>
    %317 = arith.addf %165, %316 : vector<8x16xf32>
    %318 = vector.extract_strided_slice %235 {offsets = [8, 3], sizes = [8, 1], strides = [1, 1]} : vector<16x4xf32> to vector<8x1xf32>
    %319 = vector.broadcast %318 : vector<8x1xf32> to vector<8x16xf32>
    %320 = arith.mulf %319, %305 : vector<8x16xf32>
    %321 = arith.addf %169, %320 : vector<8x16xf32>
    %322 = vector.extract_strided_slice %7 {offsets = [0, 8], sizes = [16, 4], strides = [1, 1]} : vector<16x16xf32> to vector<16x4xf32>
    %323 = vector.extract_strided_slice %8 {offsets = [0, 8], sizes = [16, 4], strides = [1, 1]} : vector<16x16xf32> to vector<16x4xf32>
    %324 = arith.negf %322 : vector<16x4xf32>
    %325 = math.exp %324 : vector<16x4xf32>
    %cst_37 = arith.constant 1.000000e+00 : f32
    %326 = vector.broadcast %cst_37 : f32 to vector<16x4xf32>
    %327 = arith.addf %326, %325 : vector<16x4xf32>
    %328 = arith.divf %326, %327 : vector<16x4xf32>
    %cst_38 = arith.constant 0.000000e+00 : f32
    %329 = vector.broadcast %cst_38 : f32 to vector<16x4xf32>
    %330 = vector.extract_strided_slice %322 {offsets = [0, 0], sizes = [16, 1], strides = [1, 1]} : vector<16x4xf32> to vector<16x1xf32>
    %331 = vector.broadcast %330 : vector<16x1xf32> to vector<16x4xf32>
    %332 = arith.cmpf ogt, %331, %322 : vector<16x4xf32>
    %333 = arith.extui %332 : vector<16x4xi1> to vector<16x4xi32>
    %334 = arith.sitofp %333 : vector<16x4xi32> to vector<16x4xf32>
    %335 = arith.addf %329, %334 : vector<16x4xf32>
    %336 = vector.extract_strided_slice %322 {offsets = [0, 1], sizes = [16, 1], strides = [1, 1]} : vector<16x4xf32> to vector<16x1xf32>
    %337 = vector.broadcast %336 : vector<16x1xf32> to vector<16x4xf32>
    %338 = arith.cmpf ogt, %337, %322 : vector<16x4xf32>
    %339 = arith.extui %338 : vector<16x4xi1> to vector<16x4xi32>
    %340 = arith.sitofp %339 : vector<16x4xi32> to vector<16x4xf32>
    %341 = arith.addf %335, %340 : vector<16x4xf32>
    %342 = vector.extract_strided_slice %322 {offsets = [0, 2], sizes = [16, 1], strides = [1, 1]} : vector<16x4xf32> to vector<16x1xf32>
    %343 = vector.broadcast %342 : vector<16x1xf32> to vector<16x4xf32>
    %344 = arith.cmpf ogt, %343, %322 : vector<16x4xf32>
    %345 = arith.extui %344 : vector<16x4xi1> to vector<16x4xi32>
    %346 = arith.sitofp %345 : vector<16x4xi32> to vector<16x4xf32>
    %347 = arith.addf %341, %346 : vector<16x4xf32>
    %348 = vector.extract_strided_slice %322 {offsets = [0, 3], sizes = [16, 1], strides = [1, 1]} : vector<16x4xf32> to vector<16x1xf32>
    %349 = vector.broadcast %348 : vector<16x1xf32> to vector<16x4xf32>
    %350 = arith.cmpf ogt, %349, %322 : vector<16x4xf32>
    %351 = arith.extui %350 : vector<16x4xi1> to vector<16x4xi32>
    %352 = arith.sitofp %351 : vector<16x4xi32> to vector<16x4xf32>
    %353 = arith.addf %347, %352 : vector<16x4xf32>
    %cst_39 = arith.constant 2.000000e+00 : f32
    %354 = vector.broadcast %cst_39 : f32 to vector<16x4xf32>
    %355 = arith.cmpf olt, %353, %354 : vector<16x4xf32>
    %356 = arith.extui %355 : vector<16x4xi1> to vector<16x4xi32>
    %357 = arith.sitofp %356 : vector<16x4xi32> to vector<16x4xf32>
    %358 = arith.mulf %328, %357 : vector<16x4xf32>
    %cst_40 = arith.constant 0.000000e+00 : f32
    %359 = vector.broadcast %cst_40 : f32 to vector<16x4xf32>
    %360 = vector.extract_strided_slice %323 {offsets = [0, 0], sizes = [16, 1], strides = [1, 1]} : vector<16x4xf32> to vector<16x1xf32>
    %361 = vector.broadcast %360 : vector<16x1xf32> to vector<16x4xf32>
    %362 = arith.cmpf ogt, %361, %323 : vector<16x4xf32>
    %363 = arith.extui %362 : vector<16x4xi1> to vector<16x4xi32>
    %364 = arith.sitofp %363 : vector<16x4xi32> to vector<16x4xf32>
    %365 = arith.addf %359, %364 : vector<16x4xf32>
    %366 = vector.extract_strided_slice %323 {offsets = [0, 1], sizes = [16, 1], strides = [1, 1]} : vector<16x4xf32> to vector<16x1xf32>
    %367 = vector.broadcast %366 : vector<16x1xf32> to vector<16x4xf32>
    %368 = arith.cmpf ogt, %367, %323 : vector<16x4xf32>
    %369 = arith.extui %368 : vector<16x4xi1> to vector<16x4xi32>
    %370 = arith.sitofp %369 : vector<16x4xi32> to vector<16x4xf32>
    %371 = arith.addf %365, %370 : vector<16x4xf32>
    %372 = vector.extract_strided_slice %323 {offsets = [0, 2], sizes = [16, 1], strides = [1, 1]} : vector<16x4xf32> to vector<16x1xf32>
    %373 = vector.broadcast %372 : vector<16x1xf32> to vector<16x4xf32>
    %374 = arith.cmpf ogt, %373, %323 : vector<16x4xf32>
    %375 = arith.extui %374 : vector<16x4xi1> to vector<16x4xi32>
    %376 = arith.sitofp %375 : vector<16x4xi32> to vector<16x4xf32>
    %377 = arith.addf %371, %376 : vector<16x4xf32>
    %378 = vector.extract_strided_slice %323 {offsets = [0, 3], sizes = [16, 1], strides = [1, 1]} : vector<16x4xf32> to vector<16x1xf32>
    %379 = vector.broadcast %378 : vector<16x1xf32> to vector<16x4xf32>
    %380 = arith.cmpf ogt, %379, %323 : vector<16x4xf32>
    %381 = arith.extui %380 : vector<16x4xi1> to vector<16x4xi32>
    %382 = arith.sitofp %381 : vector<16x4xi32> to vector<16x4xf32>
    %383 = arith.addf %377, %382 : vector<16x4xf32>
    %cst_41 = arith.constant 2.000000e+00 : f32
    %384 = vector.broadcast %cst_41 : f32 to vector<16x4xf32>
    %385 = arith.cmpf olt, %383, %384 : vector<16x4xf32>
    %386 = arith.extui %385 : vector<16x4xi1> to vector<16x4xi32>
    %387 = arith.sitofp %386 : vector<16x4xi32> to vector<16x4xf32>
    %388 = vector.extract_strided_slice %358 {offsets = [0, 0], sizes = [16, 1], strides = [1, 1]} : vector<16x4xf32> to vector<16x1xf32>
    %389 = vector.extract_strided_slice %9 {offsets = [0, 0], sizes = [16, 16], strides = [1, 1]} : vector<16x64xf32> to vector<16x16xf32>
    %390 = vector.broadcast %388 : vector<16x1xf32> to vector<16x16xf32>
    %391 = arith.mulf %390, %389 : vector<16x16xf32>
    %392 = vector.extract_strided_slice %358 {offsets = [0, 1], sizes = [16, 1], strides = [1, 1]} : vector<16x4xf32> to vector<16x1xf32>
    %393 = vector.extract_strided_slice %9 {offsets = [0, 16], sizes = [16, 16], strides = [1, 1]} : vector<16x64xf32> to vector<16x16xf32>
    %394 = vector.broadcast %392 : vector<16x1xf32> to vector<16x16xf32>
    %395 = arith.mulf %394, %393 : vector<16x16xf32>
    %396 = arith.addf %391, %395 : vector<16x16xf32>
    %397 = vector.extract_strided_slice %358 {offsets = [0, 2], sizes = [16, 1], strides = [1, 1]} : vector<16x4xf32> to vector<16x1xf32>
    %398 = vector.extract_strided_slice %9 {offsets = [0, 32], sizes = [16, 16], strides = [1, 1]} : vector<16x64xf32> to vector<16x16xf32>
    %399 = vector.broadcast %397 : vector<16x1xf32> to vector<16x16xf32>
    %400 = arith.mulf %399, %398 : vector<16x16xf32>
    %401 = arith.addf %396, %400 : vector<16x16xf32>
    %402 = vector.extract_strided_slice %358 {offsets = [0, 3], sizes = [16, 1], strides = [1, 1]} : vector<16x4xf32> to vector<16x1xf32>
    %403 = vector.extract_strided_slice %9 {offsets = [0, 48], sizes = [16, 16], strides = [1, 1]} : vector<16x64xf32> to vector<16x16xf32>
    %404 = vector.broadcast %402 : vector<16x1xf32> to vector<16x16xf32>
    %405 = arith.mulf %404, %403 : vector<16x16xf32>
    %406 = arith.addf %401, %405 : vector<16x16xf32>
    %407 = arith.truncf %406 : vector<16x16xf32> to vector<16x16xbf16>
    %408 = vector.extract_strided_slice %4 {offsets = [0, 32], sizes = [16, 16], strides = [1, 1]} : vector<16x64xbf16> to vector<16x16xbf16>
    %409 = vector.extract_strided_slice %6 {offsets = [0, 32], sizes = [16, 16], strides = [1, 1]} : vector<16x64xbf16> to vector<16x16xbf16>
    %410 = vector.extract_strided_slice %408 {offsets = [0, 0], sizes = [8, 16], strides = [1, 1]} : vector<16x16xbf16> to vector<8x16xbf16>
    %411 = vector.extract_strided_slice %409 {offsets = [0, 0], sizes = [8, 16], strides = [1, 1]} : vector<16x16xbf16> to vector<8x16xbf16>
    %cst_42 = arith.constant dense<0.000000e+00> : vector<8x8xf32>
    %412 = tpu.matmul %410, %411, %cst_42 {dimension_numbers = #tpu.dot_dimension_numbers<[1], [1], [0], [0], [0, 0, 1, 0], [], []>} : vector<8x16xbf16>, vector<8x16xbf16>, vector<8x8xf32> -> vector<8x8xf32>
    %cst_43 = arith.constant dense<0xFF800000> : vector<8xf32>
    %413 = vector.multi_reduction <maximumf>, %412, %cst_43 [1] : vector<8x8xf32> to vector<8xf32>
    %414 = vector.shape_cast %413 : vector<8xf32> to vector<8x1xf32>
    %415 = vector.broadcast %414 : vector<8x1xf32> to vector<8x8xf32>
    %416 = arith.subf %412, %415 : vector<8x8xf32>
    %417 = math.exp %416 : vector<8x8xf32>
    %cst_44 = arith.constant dense<0.000000e+00> : vector<8xf32>
    %418 = vector.multi_reduction <add>, %417, %cst_44 [1] : vector<8x8xf32> to vector<8xf32>
    %419 = vector.shape_cast %418 : vector<8xf32> to vector<8x1xf32>
    %420 = tpu.reciprocal %419 {approx = true} : vector<8x1xf32> -> vector<8x1xf32>
    %421 = vector.broadcast %420 : vector<8x1xf32> to vector<8x8xf32>
    %422 = arith.mulf %417, %421 : vector<8x8xf32>
    %423 = arith.truncf %422 : vector<8x8xf32> to vector<8x8xbf16>
    %424 = vector.extract_strided_slice %407 {offsets = [0, 0], sizes = [8, 16], strides = [1, 1]} : vector<16x16xbf16> to vector<8x16xbf16>
    %cst_45 = arith.constant dense<0.000000e+00> : vector<8x16xf32>
    %425 = tpu.matmul %423, %424, %cst_45 {dimension_numbers = #tpu.dot_dimension_numbers<[1], [0], [0], [1], [0, 0, 1, 1], [], []>} : vector<8x8xbf16>, vector<8x16xbf16>, vector<8x16xf32> -> vector<8x16xf32>
    %426 = vector.extract_strided_slice %387 {offsets = [0, 0], sizes = [8, 1], strides = [1, 1]} : vector<16x4xf32> to vector<8x1xf32>
    %427 = vector.broadcast %426 : vector<8x1xf32> to vector<8x16xf32>
    %428 = arith.mulf %427, %425 : vector<8x16xf32>
    %429 = arith.addf %277, %428 : vector<8x16xf32>
    %430 = vector.extract_strided_slice %387 {offsets = [0, 1], sizes = [8, 1], strides = [1, 1]} : vector<16x4xf32> to vector<8x1xf32>
    %431 = vector.broadcast %430 : vector<8x1xf32> to vector<8x16xf32>
    %432 = arith.mulf %431, %425 : vector<8x16xf32>
    %433 = arith.addf %281, %432 : vector<8x16xf32>
    %434 = vector.extract_strided_slice %387 {offsets = [0, 2], sizes = [8, 1], strides = [1, 1]} : vector<16x4xf32> to vector<8x1xf32>
    %435 = vector.broadcast %434 : vector<8x1xf32> to vector<8x16xf32>
    %436 = arith.mulf %435, %425 : vector<8x16xf32>
    %437 = arith.addf %285, %436 : vector<8x16xf32>
    %438 = vector.extract_strided_slice %387 {offsets = [0, 3], sizes = [8, 1], strides = [1, 1]} : vector<16x4xf32> to vector<8x1xf32>
    %439 = vector.broadcast %438 : vector<8x1xf32> to vector<8x16xf32>
    %440 = arith.mulf %439, %425 : vector<8x16xf32>
    %441 = arith.addf %289, %440 : vector<8x16xf32>
    %442 = vector.extract_strided_slice %408 {offsets = [8, 0], sizes = [8, 16], strides = [1, 1]} : vector<16x16xbf16> to vector<8x16xbf16>
    %443 = vector.extract_strided_slice %409 {offsets = [8, 0], sizes = [8, 16], strides = [1, 1]} : vector<16x16xbf16> to vector<8x16xbf16>
    %cst_46 = arith.constant dense<0.000000e+00> : vector<8x8xf32>
    %444 = tpu.matmul %442, %443, %cst_46 {dimension_numbers = #tpu.dot_dimension_numbers<[1], [1], [0], [0], [0, 0, 1, 0], [], []>} : vector<8x16xbf16>, vector<8x16xbf16>, vector<8x8xf32> -> vector<8x8xf32>
    %cst_47 = arith.constant dense<0xFF800000> : vector<8xf32>
    %445 = vector.multi_reduction <maximumf>, %444, %cst_47 [1] : vector<8x8xf32> to vector<8xf32>
    %446 = vector.shape_cast %445 : vector<8xf32> to vector<8x1xf32>
    %447 = vector.broadcast %446 : vector<8x1xf32> to vector<8x8xf32>
    %448 = arith.subf %444, %447 : vector<8x8xf32>
    %449 = math.exp %448 : vector<8x8xf32>
    %cst_48 = arith.constant dense<0.000000e+00> : vector<8xf32>
    %450 = vector.multi_reduction <add>, %449, %cst_48 [1] : vector<8x8xf32> to vector<8xf32>
    %451 = vector.shape_cast %450 : vector<8xf32> to vector<8x1xf32>
    %452 = tpu.reciprocal %451 {approx = true} : vector<8x1xf32> -> vector<8x1xf32>
    %453 = vector.broadcast %452 : vector<8x1xf32> to vector<8x8xf32>
    %454 = arith.mulf %449, %453 : vector<8x8xf32>
    %455 = arith.truncf %454 : vector<8x8xf32> to vector<8x8xbf16>
    %456 = vector.extract_strided_slice %407 {offsets = [8, 0], sizes = [8, 16], strides = [1, 1]} : vector<16x16xbf16> to vector<8x16xbf16>
    %cst_49 = arith.constant dense<0.000000e+00> : vector<8x16xf32>
    %457 = tpu.matmul %455, %456, %cst_49 {dimension_numbers = #tpu.dot_dimension_numbers<[1], [0], [0], [1], [0, 0, 1, 1], [], []>} : vector<8x8xbf16>, vector<8x16xbf16>, vector<8x16xf32> -> vector<8x16xf32>
    %458 = vector.extract_strided_slice %387 {offsets = [8, 0], sizes = [8, 1], strides = [1, 1]} : vector<16x4xf32> to vector<8x1xf32>
    %459 = vector.broadcast %458 : vector<8x1xf32> to vector<8x16xf32>
    %460 = arith.mulf %459, %457 : vector<8x16xf32>
    %461 = arith.addf %309, %460 : vector<8x16xf32>
    %462 = vector.extract_strided_slice %387 {offsets = [8, 1], sizes = [8, 1], strides = [1, 1]} : vector<16x4xf32> to vector<8x1xf32>
    %463 = vector.broadcast %462 : vector<8x1xf32> to vector<8x16xf32>
    %464 = arith.mulf %463, %457 : vector<8x16xf32>
    %465 = arith.addf %313, %464 : vector<8x16xf32>
    %466 = vector.extract_strided_slice %387 {offsets = [8, 2], sizes = [8, 1], strides = [1, 1]} : vector<16x4xf32> to vector<8x1xf32>
    %467 = vector.broadcast %466 : vector<8x1xf32> to vector<8x16xf32>
    %468 = arith.mulf %467, %457 : vector<8x16xf32>
    %469 = arith.addf %317, %468 : vector<8x16xf32>
    %470 = vector.extract_strided_slice %387 {offsets = [8, 3], sizes = [8, 1], strides = [1, 1]} : vector<16x4xf32> to vector<8x1xf32>
    %471 = vector.broadcast %470 : vector<8x1xf32> to vector<8x16xf32>
    %472 = arith.mulf %471, %457 : vector<8x16xf32>
    %473 = arith.addf %321, %472 : vector<8x16xf32>
    %474 = vector.extract_strided_slice %7 {offsets = [0, 12], sizes = [16, 4], strides = [1, 1]} : vector<16x16xf32> to vector<16x4xf32>
    %475 = vector.extract_strided_slice %8 {offsets = [0, 12], sizes = [16, 4], strides = [1, 1]} : vector<16x16xf32> to vector<16x4xf32>
    %476 = arith.negf %474 : vector<16x4xf32>
    %477 = math.exp %476 : vector<16x4xf32>
    %cst_50 = arith.constant 1.000000e+00 : f32
    %478 = vector.broadcast %cst_50 : f32 to vector<16x4xf32>
    %479 = arith.addf %478, %477 : vector<16x4xf32>
    %480 = arith.divf %478, %479 : vector<16x4xf32>
    %cst_51 = arith.constant 0.000000e+00 : f32
    %481 = vector.broadcast %cst_51 : f32 to vector<16x4xf32>
    %482 = vector.extract_strided_slice %474 {offsets = [0, 0], sizes = [16, 1], strides = [1, 1]} : vector<16x4xf32> to vector<16x1xf32>
    %483 = vector.broadcast %482 : vector<16x1xf32> to vector<16x4xf32>
    %484 = arith.cmpf ogt, %483, %474 : vector<16x4xf32>
    %485 = arith.extui %484 : vector<16x4xi1> to vector<16x4xi32>
    %486 = arith.sitofp %485 : vector<16x4xi32> to vector<16x4xf32>
    %487 = arith.addf %481, %486 : vector<16x4xf32>
    %488 = vector.extract_strided_slice %474 {offsets = [0, 1], sizes = [16, 1], strides = [1, 1]} : vector<16x4xf32> to vector<16x1xf32>
    %489 = vector.broadcast %488 : vector<16x1xf32> to vector<16x4xf32>
    %490 = arith.cmpf ogt, %489, %474 : vector<16x4xf32>
    %491 = arith.extui %490 : vector<16x4xi1> to vector<16x4xi32>
    %492 = arith.sitofp %491 : vector<16x4xi32> to vector<16x4xf32>
    %493 = arith.addf %487, %492 : vector<16x4xf32>
    %494 = vector.extract_strided_slice %474 {offsets = [0, 2], sizes = [16, 1], strides = [1, 1]} : vector<16x4xf32> to vector<16x1xf32>
    %495 = vector.broadcast %494 : vector<16x1xf32> to vector<16x4xf32>
    %496 = arith.cmpf ogt, %495, %474 : vector<16x4xf32>
    %497 = arith.extui %496 : vector<16x4xi1> to vector<16x4xi32>
    %498 = arith.sitofp %497 : vector<16x4xi32> to vector<16x4xf32>
    %499 = arith.addf %493, %498 : vector<16x4xf32>
    %500 = vector.extract_strided_slice %474 {offsets = [0, 3], sizes = [16, 1], strides = [1, 1]} : vector<16x4xf32> to vector<16x1xf32>
    %501 = vector.broadcast %500 : vector<16x1xf32> to vector<16x4xf32>
    %502 = arith.cmpf ogt, %501, %474 : vector<16x4xf32>
    %503 = arith.extui %502 : vector<16x4xi1> to vector<16x4xi32>
    %504 = arith.sitofp %503 : vector<16x4xi32> to vector<16x4xf32>
    %505 = arith.addf %499, %504 : vector<16x4xf32>
    %cst_52 = arith.constant 2.000000e+00 : f32
    %506 = vector.broadcast %cst_52 : f32 to vector<16x4xf32>
    %507 = arith.cmpf olt, %505, %506 : vector<16x4xf32>
    %508 = arith.extui %507 : vector<16x4xi1> to vector<16x4xi32>
    %509 = arith.sitofp %508 : vector<16x4xi32> to vector<16x4xf32>
    %510 = arith.mulf %480, %509 : vector<16x4xf32>
    %cst_53 = arith.constant 0.000000e+00 : f32
    %511 = vector.broadcast %cst_53 : f32 to vector<16x4xf32>
    %512 = vector.extract_strided_slice %475 {offsets = [0, 0], sizes = [16, 1], strides = [1, 1]} : vector<16x4xf32> to vector<16x1xf32>
    %513 = vector.broadcast %512 : vector<16x1xf32> to vector<16x4xf32>
    %514 = arith.cmpf ogt, %513, %475 : vector<16x4xf32>
    %515 = arith.extui %514 : vector<16x4xi1> to vector<16x4xi32>
    %516 = arith.sitofp %515 : vector<16x4xi32> to vector<16x4xf32>
    %517 = arith.addf %511, %516 : vector<16x4xf32>
    %518 = vector.extract_strided_slice %475 {offsets = [0, 1], sizes = [16, 1], strides = [1, 1]} : vector<16x4xf32> to vector<16x1xf32>
    %519 = vector.broadcast %518 : vector<16x1xf32> to vector<16x4xf32>
    %520 = arith.cmpf ogt, %519, %475 : vector<16x4xf32>
    %521 = arith.extui %520 : vector<16x4xi1> to vector<16x4xi32>
    %522 = arith.sitofp %521 : vector<16x4xi32> to vector<16x4xf32>
    %523 = arith.addf %517, %522 : vector<16x4xf32>
    %524 = vector.extract_strided_slice %475 {offsets = [0, 2], sizes = [16, 1], strides = [1, 1]} : vector<16x4xf32> to vector<16x1xf32>
    %525 = vector.broadcast %524 : vector<16x1xf32> to vector<16x4xf32>
    %526 = arith.cmpf ogt, %525, %475 : vector<16x4xf32>
    %527 = arith.extui %526 : vector<16x4xi1> to vector<16x4xi32>
    %528 = arith.sitofp %527 : vector<16x4xi32> to vector<16x4xf32>
    %529 = arith.addf %523, %528 : vector<16x4xf32>
    %530 = vector.extract_strided_slice %475 {offsets = [0, 3], sizes = [16, 1], strides = [1, 1]} : vector<16x4xf32> to vector<16x1xf32>
    %531 = vector.broadcast %530 : vector<16x1xf32> to vector<16x4xf32>
    %532 = arith.cmpf ogt, %531, %475 : vector<16x4xf32>
    %533 = arith.extui %532 : vector<16x4xi1> to vector<16x4xi32>
    %534 = arith.sitofp %533 : vector<16x4xi32> to vector<16x4xf32>
    %535 = arith.addf %529, %534 : vector<16x4xf32>
    %cst_54 = arith.constant 2.000000e+00 : f32
    %536 = vector.broadcast %cst_54 : f32 to vector<16x4xf32>
    %537 = arith.cmpf olt, %535, %536 : vector<16x4xf32>
    %538 = arith.extui %537 : vector<16x4xi1> to vector<16x4xi32>
    %539 = arith.sitofp %538 : vector<16x4xi32> to vector<16x4xf32>
    %540 = vector.extract_strided_slice %510 {offsets = [0, 0], sizes = [16, 1], strides = [1, 1]} : vector<16x4xf32> to vector<16x1xf32>
    %541 = vector.extract_strided_slice %9 {offsets = [0, 0], sizes = [16, 16], strides = [1, 1]} : vector<16x64xf32> to vector<16x16xf32>
    %542 = vector.broadcast %540 : vector<16x1xf32> to vector<16x16xf32>
    %543 = arith.mulf %542, %541 : vector<16x16xf32>
    %544 = vector.extract_strided_slice %510 {offsets = [0, 1], sizes = [16, 1], strides = [1, 1]} : vector<16x4xf32> to vector<16x1xf32>
    %545 = vector.extract_strided_slice %9 {offsets = [0, 16], sizes = [16, 16], strides = [1, 1]} : vector<16x64xf32> to vector<16x16xf32>
    %546 = vector.broadcast %544 : vector<16x1xf32> to vector<16x16xf32>
    %547 = arith.mulf %546, %545 : vector<16x16xf32>
    %548 = arith.addf %543, %547 : vector<16x16xf32>
    %549 = vector.extract_strided_slice %510 {offsets = [0, 2], sizes = [16, 1], strides = [1, 1]} : vector<16x4xf32> to vector<16x1xf32>
    %550 = vector.extract_strided_slice %9 {offsets = [0, 32], sizes = [16, 16], strides = [1, 1]} : vector<16x64xf32> to vector<16x16xf32>
    %551 = vector.broadcast %549 : vector<16x1xf32> to vector<16x16xf32>
    %552 = arith.mulf %551, %550 : vector<16x16xf32>
    %553 = arith.addf %548, %552 : vector<16x16xf32>
    %554 = vector.extract_strided_slice %510 {offsets = [0, 3], sizes = [16, 1], strides = [1, 1]} : vector<16x4xf32> to vector<16x1xf32>
    %555 = vector.extract_strided_slice %9 {offsets = [0, 48], sizes = [16, 16], strides = [1, 1]} : vector<16x64xf32> to vector<16x16xf32>
    %556 = vector.broadcast %554 : vector<16x1xf32> to vector<16x16xf32>
    %557 = arith.mulf %556, %555 : vector<16x16xf32>
    %558 = arith.addf %553, %557 : vector<16x16xf32>
    %559 = arith.truncf %558 : vector<16x16xf32> to vector<16x16xbf16>
    %560 = vector.extract_strided_slice %4 {offsets = [0, 48], sizes = [16, 16], strides = [1, 1]} : vector<16x64xbf16> to vector<16x16xbf16>
    %561 = vector.extract_strided_slice %6 {offsets = [0, 48], sizes = [16, 16], strides = [1, 1]} : vector<16x64xbf16> to vector<16x16xbf16>
    %562 = vector.extract_strided_slice %560 {offsets = [0, 0], sizes = [8, 16], strides = [1, 1]} : vector<16x16xbf16> to vector<8x16xbf16>
    %563 = vector.extract_strided_slice %561 {offsets = [0, 0], sizes = [8, 16], strides = [1, 1]} : vector<16x16xbf16> to vector<8x16xbf16>
    %cst_55 = arith.constant dense<0.000000e+00> : vector<8x8xf32>
    %564 = tpu.matmul %562, %563, %cst_55 {dimension_numbers = #tpu.dot_dimension_numbers<[1], [1], [0], [0], [0, 0, 1, 0], [], []>} : vector<8x16xbf16>, vector<8x16xbf16>, vector<8x8xf32> -> vector<8x8xf32>
    %cst_56 = arith.constant dense<0xFF800000> : vector<8xf32>
    %565 = vector.multi_reduction <maximumf>, %564, %cst_56 [1] : vector<8x8xf32> to vector<8xf32>
    %566 = vector.shape_cast %565 : vector<8xf32> to vector<8x1xf32>
    %567 = vector.broadcast %566 : vector<8x1xf32> to vector<8x8xf32>
    %568 = arith.subf %564, %567 : vector<8x8xf32>
    %569 = math.exp %568 : vector<8x8xf32>
    %cst_57 = arith.constant dense<0.000000e+00> : vector<8xf32>
    %570 = vector.multi_reduction <add>, %569, %cst_57 [1] : vector<8x8xf32> to vector<8xf32>
    %571 = vector.shape_cast %570 : vector<8xf32> to vector<8x1xf32>
    %572 = tpu.reciprocal %571 {approx = true} : vector<8x1xf32> -> vector<8x1xf32>
    %573 = vector.broadcast %572 : vector<8x1xf32> to vector<8x8xf32>
    %574 = arith.mulf %569, %573 : vector<8x8xf32>
    %575 = arith.truncf %574 : vector<8x8xf32> to vector<8x8xbf16>
    %576 = vector.extract_strided_slice %559 {offsets = [0, 0], sizes = [8, 16], strides = [1, 1]} : vector<16x16xbf16> to vector<8x16xbf16>
    %cst_58 = arith.constant dense<0.000000e+00> : vector<8x16xf32>
    %577 = tpu.matmul %575, %576, %cst_58 {dimension_numbers = #tpu.dot_dimension_numbers<[1], [0], [0], [1], [0, 0, 1, 1], [], []>} : vector<8x8xbf16>, vector<8x16xbf16>, vector<8x16xf32> -> vector<8x16xf32>
    %578 = vector.extract_strided_slice %539 {offsets = [0, 0], sizes = [8, 1], strides = [1, 1]} : vector<16x4xf32> to vector<8x1xf32>
    %579 = vector.broadcast %578 : vector<8x1xf32> to vector<8x16xf32>
    %580 = arith.mulf %579, %577 : vector<8x16xf32>
    %581 = arith.addf %429, %580 : vector<8x16xf32>
    %582 = vector.extract_strided_slice %539 {offsets = [0, 1], sizes = [8, 1], strides = [1, 1]} : vector<16x4xf32> to vector<8x1xf32>
    %583 = vector.broadcast %582 : vector<8x1xf32> to vector<8x16xf32>
    %584 = arith.mulf %583, %577 : vector<8x16xf32>
    %585 = arith.addf %433, %584 : vector<8x16xf32>
    %586 = vector.extract_strided_slice %539 {offsets = [0, 2], sizes = [8, 1], strides = [1, 1]} : vector<16x4xf32> to vector<8x1xf32>
    %587 = vector.broadcast %586 : vector<8x1xf32> to vector<8x16xf32>
    %588 = arith.mulf %587, %577 : vector<8x16xf32>
    %589 = arith.addf %437, %588 : vector<8x16xf32>
    %590 = vector.extract_strided_slice %539 {offsets = [0, 3], sizes = [8, 1], strides = [1, 1]} : vector<16x4xf32> to vector<8x1xf32>
    %591 = vector.broadcast %590 : vector<8x1xf32> to vector<8x16xf32>
    %592 = arith.mulf %591, %577 : vector<8x16xf32>
    %593 = arith.addf %441, %592 : vector<8x16xf32>
    %594 = vector.extract_strided_slice %560 {offsets = [8, 0], sizes = [8, 16], strides = [1, 1]} : vector<16x16xbf16> to vector<8x16xbf16>
    %595 = vector.extract_strided_slice %561 {offsets = [8, 0], sizes = [8, 16], strides = [1, 1]} : vector<16x16xbf16> to vector<8x16xbf16>
    %cst_59 = arith.constant dense<0.000000e+00> : vector<8x8xf32>
    %596 = tpu.matmul %594, %595, %cst_59 {dimension_numbers = #tpu.dot_dimension_numbers<[1], [1], [0], [0], [0, 0, 1, 0], [], []>} : vector<8x16xbf16>, vector<8x16xbf16>, vector<8x8xf32> -> vector<8x8xf32>
    %cst_60 = arith.constant dense<0xFF800000> : vector<8xf32>
    %597 = vector.multi_reduction <maximumf>, %596, %cst_60 [1] : vector<8x8xf32> to vector<8xf32>
    %598 = vector.shape_cast %597 : vector<8xf32> to vector<8x1xf32>
    %599 = vector.broadcast %598 : vector<8x1xf32> to vector<8x8xf32>
    %600 = arith.subf %596, %599 : vector<8x8xf32>
    %601 = math.exp %600 : vector<8x8xf32>
    %cst_61 = arith.constant dense<0.000000e+00> : vector<8xf32>
    %602 = vector.multi_reduction <add>, %601, %cst_61 [1] : vector<8x8xf32> to vector<8xf32>
    %603 = vector.shape_cast %602 : vector<8xf32> to vector<8x1xf32>
    %604 = tpu.reciprocal %603 {approx = true} : vector<8x1xf32> -> vector<8x1xf32>
    %605 = vector.broadcast %604 : vector<8x1xf32> to vector<8x8xf32>
    %606 = arith.mulf %601, %605 : vector<8x8xf32>
    %607 = arith.truncf %606 : vector<8x8xf32> to vector<8x8xbf16>
    %608 = vector.extract_strided_slice %559 {offsets = [8, 0], sizes = [8, 16], strides = [1, 1]} : vector<16x16xbf16> to vector<8x16xbf16>
    %cst_62 = arith.constant dense<0.000000e+00> : vector<8x16xf32>
    %609 = tpu.matmul %607, %608, %cst_62 {dimension_numbers = #tpu.dot_dimension_numbers<[1], [0], [0], [1], [0, 0, 1, 1], [], []>} : vector<8x8xbf16>, vector<8x16xbf16>, vector<8x16xf32> -> vector<8x16xf32>
    %610 = vector.extract_strided_slice %539 {offsets = [8, 0], sizes = [8, 1], strides = [1, 1]} : vector<16x4xf32> to vector<8x1xf32>
    %611 = vector.broadcast %610 : vector<8x1xf32> to vector<8x16xf32>
    %612 = arith.mulf %611, %609 : vector<8x16xf32>
    %613 = arith.addf %461, %612 : vector<8x16xf32>
    %614 = vector.extract_strided_slice %539 {offsets = [8, 1], sizes = [8, 1], strides = [1, 1]} : vector<16x4xf32> to vector<8x1xf32>
    %615 = vector.broadcast %614 : vector<8x1xf32> to vector<8x16xf32>
    %616 = arith.mulf %615, %609 : vector<8x16xf32>
    %617 = arith.addf %465, %616 : vector<8x16xf32>
    %618 = vector.extract_strided_slice %539 {offsets = [8, 2], sizes = [8, 1], strides = [1, 1]} : vector<16x4xf32> to vector<8x1xf32>
    %619 = vector.broadcast %618 : vector<8x1xf32> to vector<8x16xf32>
    %620 = arith.mulf %619, %609 : vector<8x16xf32>
    %621 = arith.addf %469, %620 : vector<8x16xf32>
    %622 = vector.extract_strided_slice %539 {offsets = [8, 3], sizes = [8, 1], strides = [1, 1]} : vector<16x4xf32> to vector<8x1xf32>
    %623 = vector.broadcast %622 : vector<8x1xf32> to vector<8x16xf32>
    %624 = arith.mulf %623, %609 : vector<8x16xf32>
    %625 = arith.addf %473, %624 : vector<8x16xf32>
    %626 = tpu.concatenate %581, %585, %589, %593 in 1 : vector<8x16xf32>, vector<8x16xf32>, vector<8x16xf32>, vector<8x16xf32> -> vector<8x64xf32>
    %627 = tpu.concatenate %613, %617, %621, %625 in 1 : vector<8x16xf32>, vector<8x16xf32>, vector<8x16xf32>, vector<8x16xf32> -> vector<8x64xf32>
    %628 = tpu.concatenate %626, %627 in 0 : vector<8x64xf32>, vector<8x64xf32> -> vector<16x64xf32>
    %629 = arith.truncf %628 : vector<16x64xf32> to vector<16x64xbf16>
    %c0_63 = arith.constant 0 : index
    %c0_64 = arith.constant 0 : index
    %630 = vector.load %arg3[%c0_63, %c0_64] : memref<64x32xbf16, #tpu.memory_space<vmem>>, vector<64x32xbf16>
    %cst_65 = arith.constant dense<0.000000e+00> : vector<16x32xf32>
    %631 = tpu.matmul %629, %630, %cst_65 {dimension_numbers = #tpu.dot_dimension_numbers<[1], [0], [0], [1], [0, 0, 1, 1], [], []>} : vector<16x64xbf16>, vector<64x32xbf16>, vector<16x32xf32> -> vector<16x32xf32>
    %632 = arith.truncf %631 : vector<16x32xf32> to vector<16x32xbf16>
    %c0_66 = arith.constant 0 : index
    %c0_67 = arith.constant 0 : index
    %633 = vector.load %arg4[%c0_66, %c0_67] : memref<16x32xbf16, #tpu.memory_space<vmem>>, vector<16x32xbf16>
    tpu.vector_store %arg4[%c0_66, %c0_67], %632 {strides = array<i32>} : memref<16x32xbf16, #tpu.memory_space<vmem>>, vector<16x32xbf16>,
    return
  }
  func.func @transform_0(%arg0: i32) -> (i32, i32) {
    %c0_i32 = arith.constant 0 : i32
    %c0_i32_0 = arith.constant 0 : i32
    return %arg0, %c0_i32 : i32, i32
  }
  func.func @transform_1(%arg0: i32) -> (i32, i32) {
    %c0_i32 = arith.constant 0 : i32
    %c0_i32_0 = arith.constant 0 : i32
    %c0_i32_1 = arith.constant 0 : i32
    return %c0_i32, %c0_i32_0 : i32, i32
  }
  func.func @transform_2(%arg0: i32) -> (i32, i32) {
    %c0_i32 = arith.constant 0 : i32
    %c0_i32_0 = arith.constant 0 : i32
    %c0_i32_1 = arith.constant 0 : i32
    return %c0_i32, %c0_i32_0 : i32, i32
  }
  func.func @transform_3(%arg0: i32) -> (i32, i32) {
    %c0_i32 = arith.constant 0 : i32
    %c0_i32_0 = arith.constant 0 : i32
    return %arg0, %c0_i32 : i32, i32
  }
}

</mosaic_0001>

<bundles_post_ra>
// kernel: tpu_custom_call.1
= control target key start
LH: loop header
LB: loop body
LE: loop exit
PB: predicated region body
PF: predicated region fallthrough
CT: control target
= control target key end

     0   :  { %8 = vsyncpa [#allocation3], 0  ;;  %s4468_s0 = inlined_call_operand.hbm [shape: bf16[32,32], index: 0, kind: input, shape index: {}]   ;;  %s4469_s1 = inlined_call_operand.hbm [shape: bf16[32,640], index: 1, kind: input, shape index: {}]   ;;  %s4470_s2 = inlined_call_operand.hbm [shape: bf16[64,32], index: 2, kind: input, shape index: {}]   ;;  %s4471_s3 = inlined_call_operand.hbm [shape: bf16[32,32], index: 3, kind: output, shape index: {}]  }
   0x1   :  { %10 = vsyncpa [#allocation3 + $0x1], 0 }
   0x2   :  { %11 = vsyncpa [#allocation6], 0 }
   0x3   :  { %12 = vsyncpa [#allocation4], 0 }
   0x4   :  { %14 = vsyncpa [#allocation4 + $0x1], 0  ;;  %s3456_s12 = smov 0   ;;  %s3458_s13 = smov 0  }
   0x5   :  { %s3460_s14 = smov 0   ;;  %s3462_s15 = smov 0  }
   0x6 LB: > { %s3477_s16 = sadd.s32 4294967295, %s3400_s15   ;;  %s2598_s17 = sadd.s32 4294967294, %s3400_s15   ;;  %s3400_s15 = sphi %s3462_s15, %s4491_s15   ;;  %s3396_s14 = sphi %s3460_s14, %s4490_s14   ;;  %s3392_s13 = sphi %s3458_s13, %s4489_s13   ;;  %s3388_s12 = sphi %s3456_s12, %s4488_s12  }
   0x7   : > { %p40_p0 = scmp.ne.s32.totalorder %s3392_s13, %s3388_s12  ;;  %p4472_p1 = scmp.eq.s32.totalorder %s3477_s16, 0 }
   0x8   : > { %p112_p3 = scmp.eq.s32.totalorder %s2598_s17, 1  ;;  %p2599_p5 = scmp.ge.s32.totalorder %s3400_s15, 1 }
   0x9   : > { %p3486_p4 = por %p4472_p1, %p40_p0  ;;  %p119_p7 = scmp.lt.s32.totalorder %s3400_s15, 3 }
   0xa   : > { %p3491_p6 = por %p112_p3, %p40_p0  ;;  %s3402_s21 = smov [#allocation5]  }
   0xb   : > { %s4475_s18 = scalar_select %p3486_p4, 1, 0 }
   0xc   : > { %s4476_s19 = scalar_select %p3491_p6, 1, 0 }
   0xd   : > { %p3496_p8 = pnand %p2599_p5, %p119_p7  ;;  %s131_s22 = sshll.u32 %s3402_s21, 4  ;;  %s3500_s22 = int_to_ptr.vmem [resolvable:$true] %s131_s22 }
   0xe   : > { %s3403_s24 = smov [#allocation7]   ;;  %s3244_s28 = scalar_lea.hbm %s4469_s1, 1280 }
   0xf   : > { %p2907_p9 = pneg %p3496_p8  ;;  %s144_s25 = sshll.u32 %s3403_s24, 4  ;;  %s3511_s25 = int_to_ptr.vmem [resolvable:$true] %s144_s25 }
  0x10   : > { %p3245_p12 = scmp.ne.s32.totalorder %s4469_s1, %s3244_s28  ;;  %p3251_p5 = scmp.lt.u32.totalorder %s3244_s28, %s4469_s1 }
  0x11   : > { %p3507_p11 = pnand %p2907_p9, %p4472_p1 }
  0x13   : > { %p3246_p13 = pneg %p3507_p11 }
  0x15   : > { %p3247_p0 = pnand %p3246_p13, %p3245_p12 }
  0x17   : > { %p3248_p3 = pneg %p3247_p0 }
  0x19   : > { %p3253_p7 = pnand %p3251_p5, %p3248_p3 }
  0x1b   : > { %3256 = shalt.err (!%p3253_p7)
}
  0x1c   : > { %s3257_s6 = scalar_lea.vmem %s3500_s22, 1280  ;;  %p3265_p2 = scmp.lt.s32.totalorder %s3500_s22, %s3500_s22 }
  0x1d   : > { %p3258_p9 = scmp.ne.s32.totalorder %s3500_s22, %s3257_s6  ;;  %p3266_p12 = scmp.lt.s32.totalorder %s3257_s6, %s3257_s6 }
  0x1f   : > { %p3260_p10 = pnand %p3258_p9, %p3246_p13  ;;  %p3267_p0 = por %p3266_p12, %p3265_p2 }
  0x21   : > { %p3261_p1 = pneg %p3260_p10 }
  0x23   : > { %p3268_p6 = pnand %p3267_p0, %p3261_p1 }
  0x25   : > { %3271 = shalt.err (!%p3268_p6)
}
  0x26   : > { %s3404_s7 = smov 320   ;;  %s3405_s8 = smov 20  }
  0x27   : > { %2910 = dma.hbm_to_vmem [thread:$0]  (!%p3507_p11), %s4469_s1, 1280, %s3500_s22, [#allocation6], %s3404_s7, %s3404_s7, %s3405_s8  }
  0x28   : > { %s3272_s21 = scalar_lea.hbm %s4470_s2, 512 }
  0x29   : > { %p3273_p2 = scmp.ne.s32.totalorder %s4470_s2, %s3272_s21  ;;  %p3279_p10 = scmp.lt.u32.totalorder %s3272_s21, %s4470_s2 }
  0x2b   : > { %p3275_p1 = pnand %p3273_p2, %p3246_p13 }
  0x2d   : > { %p3276_p6 = pneg %p3275_p1 }
  0x2f   : > { %p3281_p3 = pnand %p3279_p10, %p3276_p6 }
  0x31   : > { %3284 = shalt.err (!%p3281_p3)
}
  0x32   : > { %s3285_s22 = scalar_lea.vmem %s3511_s25, 512  ;;  %p3293_p12 = scmp.lt.s32.totalorder %s3511_s25, %s3511_s25 }
  0x33   : > { %p3286_p5 = scmp.ne.s32.totalorder %s3511_s25, %s3285_s22  ;;  %p3294_p0 = scmp.lt.s32.totalorder %s3285_s22, %s3285_s22 }
  0x35   : > { %p3288_p7 = pnand %p3286_p5, %p3246_p13  ;;  %p3295_p2 = por %p3294_p0, %p3293_p12 }
  0x37   : > { %p3289_p9 = pneg %p3288_p7 }
  0x39   : > { %p3296_p1 = pnand %p3295_p2, %p3289_p9 }
  0x3b   : > { %3299 = shalt.err (!%p3296_p1)
}
  0x3c   : > { %s3406_s29 = smov 64   ;;  %s3407_s30 = smov 4  }
  0x3d   : > { %2913 = dma.hbm_to_vmem [thread:$0]  (!%p3507_p11), %s4470_s2, 512, %s3511_s25, [#allocation6], %s3406_s29, %s3406_s29, %s3407_s30  }
  0x3e   : > { %s3569_s6 = sadd.s32 1, %s3400_s15   ;;  %s27_s8 = sadd.s32 1, %s3396_s14 }
  0x3f   : > { %s24_s7 = ssub.s32 %s3400_s15, %s3569_s6  ;;  %p34_p6 = scmp.ne.s32.totalorder %s3396_s14, %s3392_s13 }
  0x40   : > { %p25_p13 = scmp.eq.s32.totalorder %s24_s7, 0  ;;  %p35_p10 = scmp.eq.s32.totalorder %s3400_s15, 0 }
  0x41   : > { %p4479_p5 = scmp.eq.s32.totalorder %s3477_s16, 1  ;;  %p2924_p9 = scmp.lt.s32.totalorder %s3400_s15, 2 }
  0x42   : > { %s3578_s9 = scalar_select %p25_p13, %s3396_s14, %s27_s8  }
  0x43   : > { %p36_p3 = por %p35_p10, %p34_p6  ;;  %p3582_p7 = por %p4479_p5, %p34_p6 }
  0x44   : > { %s158_s10 = sand.u32 1, %s3396_s14   ;;  %s2735_s25 = sshll.u32 %s3400_s15, 7 }
  0x45   : > { %s4480_s23 = scalar_select %p3582_p7, 1, 0 }
  0x46   : > { %s2603_s11 = sshll.u32 %s158_s10, 3  ;;  %s3592_s24 = scalar_lea.hbm %s4468_s0, %s2735_s25 }
  0x47   : > { %s162_s26 = scalar_lea.vmem [#allocation2], %s2603_s11  ;;  %p3596_p11 = pnand %p2924_p9, %p36_p3 }
  0x48   : > { %s169_s27 = sshll.u32 %s162_s26, 4  ;;  %s3600_s22 = scalar_lea.sflag [#allocation3], %s158_s10  ;;  %s3594_s27 = int_to_ptr.vmem [resolvable:$true] %s169_s27 }
  0x49   : > { %s3300_s4 = scalar_lea.hbm %s3592_s24, 128  ;;  %p3302_p0 = pneg %p3596_p11 }
  0x4a   : > { %p3301_p12 = scmp.ne.s32.totalorder %s3592_s24, %s3300_s4  ;;  %s3305_s8 = scalar_lea.hbm %s4468_s0, 256 }
  0x4b   : > { %p3306_p13 = scmp.lt.u32.totalorder %s3592_s24, %s4468_s0  ;;  %p3307_p6 = scmp.lt.u32.totalorder %s3305_s8, %s3300_s4 }
  0x4c   : > { %p3303_p2 = pnand %p3302_p0, %p3301_p12  ;;  %p3309_p3 = scmp.lt.u32.totalorder %s3300_s4, %s3592_s24 }
  0x4d   : > { %p3308_p10 = por %p3307_p6, %p3306_p13 }
  0x4e   : > { %p3304_p1 = pneg %p3303_p2 }
  0x4f   : > { %p3310_p5 = por %p3309_p3, %p3308_p10 }
  0x51   : > { %p3311_p9 = pnand %p3310_p5, %p3304_p1 }
  0x53   : > { %3314 = shalt.err (!%p3311_p9)
}
  0x54   : > { %s3315_s10 = scalar_lea.vmem %s3594_s27, 128  ;;  %s3408_s17 = smov [#allocation2]  }
  0x55   : > { %p3316_p12 = scmp.ne.s32.totalorder %s3594_s27, %s3315_s10  ;;  %s3320_s21 = sshll.u32 %s3408_s17, 4  ;;  %s3321_s21 = int_to_ptr.vmem [resolvable:$false] %s3320_s21 }
  0x56   : > { %s3322_s26 = scalar_lea.vmem %s3321_s21, 256  ;;  %p3323_p4 = scmp.lt.s32.totalorder %s3594_s27, %s3321_s21 }
  0x57   : > { %p3318_p2 = pnand %p3316_p12, %p3302_p0  ;;  %p3324_p13 = scmp.lt.s32.totalorder %s3322_s26, %s3315_s10 }
  0x59   : > { %p3319_p7 = pneg %p3318_p2  ;;  %p3325_p6 = por %p3324_p13, %p3323_p4 }
  0x5b   : > { %p3326_p10 = pnand %p3325_p6, %p3319_p7 }
  0x5d   : > { %3329 = shalt.err (!%p3326_p10)
}
  0x5e   : > { %2917 = dma.hbm_to_vmem [thread:$0]  (!%p3596_p11), %s3592_s24, 128, %s3594_s27, %s3600_s22, %s3406_s29, %s3406_s29, %s3407_s30  }
  0x5f   : > { %181 = sbr.rel (%p3496_p8) target bundleno = 1765 (0x6e5), region = 32  ;;  %s3634_s4 = sand.u32 (!%p3496_p8), 1, %s3392_s13  }
  0x60   : > { %s2607_s5 = sshll.u32 (!%p3496_p8), %s3634_s4, 3  ;;  %s184_s7 = scalar_lea.sflag (!%p3496_p8), [#allocation3], %s3634_s4 }
  0x61   : > { %s187_s28 = scalar_lea.vmem (!%p3496_p8), [#allocation2], %s2607_s5  ;;  %p4482_p4 = scmp.ne.s32.totalorder (!%p3496_p8), %s4475_s18, 0 }
  0x66   : > { %3375 = dma.done.wait (%p4482_p4), %s184_s7, 128  }
  0x67   : > { %3377 = vsyncadd (%p4482_p4), %s184_s7, 4294967168  ;;  %p4483_p7 = scmp.eq.s32.totalorder %s3477_s16, 0 }
  0x69   : > { %3379 = dma.done.wait (%p4483_p7), [#allocation6], 1792   ;;  %p4484_p8 = pmov %p4483_p7 }
  0x6a   : > { %v3409_v0 = vmov 0   ;;  %v3185_v1 = vld [vmem:[#allocation5 + $0x4] ss:$20 sps:$4 sm:$0xff]   ;;  %v3187_v2 = vld [vmem:[#allocation5] ss:$20 sps:$4 sm:$0xff]   ;;  %vm292_vm0 = vcmask 261120  }
  0x6b   : > { %3381 = vsyncadd (%p4484_p8), [#allocation6], 4294965504  ;;  %328 = vmatprep.mubr.bf16.mxu0 %v3409_v0  ;;  %371 = vmatprep.mubr.bf16.mxu1 %v3409_v0  ;;  %v3188_v3 = vld [vmem:[#allocation5 + $0x2c] ss:$20 sps:$4 sm:$0xff]   ;;  %v3190_v4 = vld [vmem:[#allocation5 + $0x28] ss:$20 sps:$4 sm:$0xff]  }
  0x6c   : > { %2992 = vset.pattern.permute.xlu0 %v3409_v0  ;;  %2993 = vset.pattern.permute.xlu1 %v3409_v0  ;;  %v3191_v5 = vld [vmem:[%s187_s28] sm:$0xff]   ;;  %v3192_v6 = vld [vmem:[#allocation5 + $0xc] ss:$20 sps:$4 sm:$0xff]   ;;  %v3410_v10 = vmov 0.0   ;;  %vm3411_vm1 = vmmov 0   ;;  %vm656_vm2 = vcmask 130048  }
  0x6d   : > { %296 = vmatprep.subr.bf16.mxu0 %v3185_v1  ;;  %v3194_v7 = vld [vmem:[#allocation5 + $0x8] ss:$20 sps:$4 sm:$0xff]   ;;  %339 = vmatprep.subr.bf16.mxu1 %v3192_v6  ;;  %v3197_v9 = vld [vmem:[#allocation5 + $0x30] ss:$20 sps:$4 sm:$0xff]   ;;  %v3199_v12 = vld [vmem:[#allocation5 + $0x38] ss:$20 sps:$4 sm:$0xff]  }
  0x6e   : > { %297 = vmatpush1.bf16.msra.mxu0 %v3187_v2  ;;  %v3195_v8 = vld [vmem:[#allocation5 + $0x34] ss:$20 sps:$4 sm:$0xff]   ;;  %340 = vmatpush1.bf16.msra.mxu1 %v3194_v7  ;;  %v3198_v11 = vld [vmem:[#allocation5 + $0x10] ss:$20 sps:$4 sm:$0xff]   ;;  %s3412_s18 = smov 112   ;;  %s3413_s20 = smov 96  }
  0x6f   : > { %298 = vmatprep.subr.bf16.mxu0 %v3188_v3  ;;  %341 = vmatprep.subr.bf16.mxu1 %v3195_v8  ;;  %s3414_s29 = smov 80   ;;  %v3415_v27 = vmov 2   ;;  %v3416_v28 = vmov 3   ;;  %v3417_v29 = vmov 1   ;;  %v3418_v30 = vmov 4   ;;  %s3430_s30 = smov 48  }
  0x70   : > { %v3419_v31 = vmov 6   ;;  %v3420_v32 = vmov 7   ;;  %v3421_v33 = vmov 9   ;;  %v3422_v34 = vmov 10   ;;  %s3431_s24 = smov 16   ;;  %s3432_s27 = smov 32  }
  0x71   : > { %v3423_v35 = vmov 12   ;;  %v3424_v36 = vmov 5   ;;  %v3425_v37 = vmov 8   ;;  %v3426_v39 = vmov 11   ;;  %s217_s22 = scalar_lea.vmem [#allocation8], %s2607_s5  ;;  %s2738_s11 = sshll.u32 %s3477_s16, 7 }
  0x72   : > { %299 = vmatpush1.bf16.msra.mxu0 %v3190_v4  ;;  %342 = vmatpush1.bf16.msra.mxu1 %v3197_v9  ;;  %v3427_v45 = vmov 13   ;;  %v3428_v51 = vmov 14   ;;  %v3429_v56 = vmov 15   ;;  %s2506_s8 = sshll.u32 %s217_s22, 4  ;;  %s4424_s17 = scalar_lea.hbm %s4471_s3, %s2738_s11  ;;  %s4419_s8 = int_to_ptr.vmem [resolvable:$true] %s2506_s8 }
  0x73   : > { %2787 = vmatprep.subr.bf16.mxu1 %v3410_v10  ;;  %2779 = vmatprep.subr.bf16.mxu0 %v3410_v10  ;;  %s2493_s16 = scalar_lea.sflag [#allocation4], %s3634_s4  ;;  %s3330_s21 = scalar_lea.vmem %s4419_s8, 128 }
  0x74   : > { %p3331_p11 = scmp.ne.s32.totalorder %s4419_s8, %s3330_s21  ;;  %p4485_p0 = scmp.ne.s32.totalorder %s4480_s23, 0 }
  0x75   : > { %2622 = vmatmul.mubr.msk.bf16.vlgmr.msra.gmra.mrb[0].mxu0 %vm292_vm0, %v3191_v5  ;;  %2623 = vmatmul.mubr.msk.bf16.vlgmr.msra.gmra.mrb[0].mxu1 %vm292_vm0, %v3191_v5  ;;  %s3433_s26 = smov [#allocation8]  }
  0x76   : > { %2789 = vmatprep.mubr.msk.bf16.mxu1 %vm3411_vm1, %v3410_v10  ;;  %2783 = vmatprep.mubr.msk.bf16.mxu0 %vm3411_vm1, %v3410_v10  ;;  %p3332_p1 = pnand %p3331_p11, %p4485_p0  ;;  %s3334_s5 = sshll.u32 %s3433_s26, 4  ;;  %s3335_s5 = int_to_ptr.vmem [resolvable:$false] %s3334_s5 }
  0x77   : > { %2780 = vmatpush3.bf16.msra.mxu0 %v3198_v11  ;;  %s3336_s7 = scalar_lea.vmem %s3335_s5, 256  ;;  %p3337_p5 = scmp.lt.s32.totalorder %s4419_s8, %s3335_s5 }
  0x78   : > { %2781 = vmatprep.subr.bf16.mxu0 %v3410_v10  ;;  %p3333_p3 = pneg %p3332_p1  ;;  %p3338_p9 = scmp.lt.s32.totalorder %s3336_s7, %s3330_s21 }
  0x7a   : > { %p3339_p12 = por %p3338_p9, %p3337_p5 }
  0x7b   : > { %2782 = vmatpush3.bf16.msra.mxu0 %v3199_v12 }
  0x7c   : > { %2793 = vmatprep.subr.bf16.mxu0 %v3410_v10  ;;  %p3340_p2 = pnand %p3339_p12, %p3333_p3 }
  0x7e   : > { %2784 = vmatmul.mubr.msk.bf16.vlgmr.msra.gmra.mrb[4].mxu0 %vm292_vm0, %v3191_v5 }
  0x7f   : > { %2795 = vmatprep.mubr.msk.bf16.mxu0 %vm3411_vm1, %v3410_v10 }
 0x148   : > { %v330_v13 = vpop.f32.mrb[0].mxu0  ;;  %v3665_v19 = vpop.f32.mrb[0].mxu1 }
 0x149   : > { %v332_v14 = vpop.f32.mrb[1].mxu0  ;;  %v3668_v21 = vpop.f32.mrb[1].mxu1  ;;  %v2625_v52 = vmul.f32 -1.442695, %v3665_v19 }
 0x14a   : > { %v334_v15 = vpop.f32.mrb[2].mxu0  ;;  %v3671_v23 = vpop.f32.mrb[2].mxu1 }
 0x14b   : > { %v423_v16 = vpack.c.bf16 %v334_v15, %v330_v13  ;;  %v336_v17 = vpop.f32.mrb[3].mxu0  ;;  %v3674_v24 = vpop.f32.mrb[3].mxu1  ;;  %3204 = vpow2.f32 %v2625_v52 }
 0x14c   : > { %v424_v18 = vpack.c.bf16 %v336_v17, %v332_v14 }
 0x14d   : > { %1138 = vrot.lane.b32.xlu0 %v423_v16, %s3412_s18  ;;  %v789_v20 = vrot.slane %v423_v16, 4 }
 0x14e   : > { %v661_v22 = vsel %vm656_vm2, %v424_v18, 0  ;;  %v3678_v25 = vrot.slane %v424_v18, 4 }
 0x14f   : > { %1271 = vrot.lane.b32.xlu1 %v789_v20, %s3412_s18  ;;  %2788 = vmatpush3.bf16.xpose.msra.mxu1 %v661_v22 }
 0x150   : > { %2799 = vmatprep.subr.bf16.mxu1 %v3410_v10  ;;  %v796_v26 = vsel %vm656_vm2, %v3678_v25, 0 }
 0x151   : > { %1140 = vrot.lane.b32.xlu0 %v424_v18, %s3412_s18 }
 0x153   : > { %1273 = vrot.lane.b32.xlu1 %v3678_v25, %s3412_s18 }
 0x155   : > { %1623 = vrot.lane.b32.xlu0 %v424_v18, %s3413_s20  ;;  %v3205_v60 = vpop.eup %3204 }
 0x156   : > { %2790 = vmatmul.mubr.msk.bf16.vlgmr.msra.gmra.mrb[4].mxu1 %vm656_vm2, %v423_v16  ;;  %v431_v62 = vadd.f32 1.0, %v3205_v60 }
 0x157   : > { %1621 = vrot.lane.b32.xlu1 %v423_v16, %s3413_s20  ;;  %2800 = vmatpush3.bf16.xpose.msra.mxu1 %v796_v26 }
 0x158   : > { %2801 = vmatprep.mubr.msk.bf16.mxu1 %vm3411_vm1, %v3410_v10  ;;  %2811 = vmatprep.subr.bf16.mxu1 %v3410_v10  ;;  %3206 = vrcp.f32 %v431_v62 }
 0x159   : > { %2106 = vrot.lane.b32.xlu0 %v424_v18, %s3414_s29  ;;  %v3818_v18 = vpop.f32.mrb[4].mxu0 }
 0x15b   : > { %1754 = vrot.lane.b32.xlu1 %v789_v20, %s3413_s20 }
 0x15d   : > { %439 = vperm.xlu0 %2992, %v3665_v19  }
 0x15e   : > { %2802 = vmatmul.mubr.msk.bf16.vlgmr.msra.gmra.mrb[8].mxu1 %vm656_vm2, %v789_v20 }
 0x15f   : > { %2104 = vrot.lane.b32.xlu1 %v423_v16, %s3414_s29  ;;  %2813 = vmatprep.mubr.msk.bf16.mxu1 %vm3411_vm1, %v3410_v10 }
 0x161   : > { %518 = vperm.xlu0 %2992, %v3674_v24  }
 0x162   : > { %v3810_v13 = vpop.eup %3206 }
 0x163   : > { %2237 = vrot.lane.b32.xlu1 %v789_v20, %s3414_s29  ;;  %v2785_v20 = vpop.f32.mrb[5].mxu0 }
 0x165   : > { %2999 = vset.pattern.permute.xlu0 %v3415_v27 }
 0x166   : > { %546 = vperm.xlu0 %2999, %v3668_v21  }
 0x167   : > { %444 = vperm.xlu1 %2993, %v3671_v23  }
 0x16a   : > { %3000 = vset.pattern.permute.xlu0 %v3416_v28 }
 0x16b   : > { %488 = vperm.xlu0 %3000, %v3665_v19   ;;  %2994 = vset.pattern.permute.xlu1 %v3417_v29 }
 0x16c   : > { %456 = vperm.xlu1 %2994, %v3665_v19  }
 0x16f   : > { %566 = vperm.xlu0 %3000, %v3674_v24  }
 0x170   : > { %2995 = vset.pattern.permute.xlu1 %v3415_v27 }
 0x171   : > { %472 = vperm.xlu1 %2995, %v3665_v19  }
 0x173   : > { %3004 = vset.pattern.permute.xlu0 %v3418_v30 }
 0x174   : > { %928 = vperm.xlu0 %3004, %v3671_v23  }
 0x175   : > { %476 = vperm.xlu1 %2995, %v3671_v23  }
 0x178   : > { %3006 = vset.pattern.permute.xlu0 %v3419_v31 }
 0x179   : > { %956 = vperm.xlu0 %3006, %v3665_v19   ;;  %2996 = vset.pattern.permute.xlu1 %v3416_v28 }
 0x17a   : > { %492 = vperm.xlu1 %2996, %v3671_v23  }
 0x17d   : > { %3009 = vset.pattern.permute.xlu0 %v3420_v32 }
 0x17e   : > { %976 = vperm.xlu0 %3009, %v3671_v23   ;;  %2997 = vset.pattern.permute.xlu1 %v3409_v0 }
 0x17f   : > { %513 = vperm.xlu1 %2997, %v3668_v21  }
 0x182   : > { %3011 = vset.pattern.permute.xlu0 %v3421_v33 }
 0x183   : > { %1423 = vperm.xlu0 %3011, %v3665_v19   ;;  %2998 = vset.pattern.permute.xlu1 %v3417_v29 }
 0x184   : > { %530 = vperm.xlu1 %2998, %v3668_v21  }
 0x187   : > { %3014 = vset.pattern.permute.xlu0 %v3422_v34 }
 0x188   : > { %1443 = vperm.xlu0 %3014, %v3671_v23   ;;  %534 = vperm.xlu1 %2998, %v3674_v24  }
 0x18c   : > { %3016 = vset.pattern.permute.xlu0 %v3423_v35  ;;  %3001 = vset.pattern.permute.xlu1 %v3415_v27 }
 0x18d   : > { %1890 = vperm.xlu0 %3016, %v3665_v19   ;;  %550 = vperm.xlu1 %3001, %v3674_v24  }
 0x191   : > { %3017 = vset.pattern.permute.xlu0 %v3417_v29  ;;  %3002 = vset.pattern.permute.xlu1 %v3416_v28 }
 0x192   : > { %460 = vperm.xlu0 %3017, %v3671_v23   ;;  %562 = vperm.xlu1 %3002, %v3668_v21  }
 0x196   : > { %1756 = vrot.lane.b32.xlu0 %v3678_v25, %s3413_s20  ;;  %3003 = vset.pattern.permute.xlu1 %v3418_v30 }
 0x197   : > { %924 = vperm.xlu1 %3003, %v3665_v19  }
 0x19a   : > { %2239 = vrot.lane.b32.xlu0 %v3678_v25, %s3414_s29 }
 0x19b   : > { %3005 = vset.pattern.permute.xlu1 %v3424_v36 }
 0x19c   : > { %940 = vperm.xlu1 %3005, %v3665_v19  }
 0x1a0   : > { %944 = vperm.xlu1 %3005, %v3671_v23  }
 0x1a4   : > { %3007 = vset.pattern.permute.xlu1 %v3419_v31 }
 0x1a5   : > { %960 = vperm.xlu1 %3007, %v3671_v23  }
 0x1a9   : > { %3008 = vset.pattern.permute.xlu1 %v3420_v32 }
 0x1aa   : > { %972 = vperm.xlu1 %3008, %v3665_v19  }
 0x1ae   : > { %3010 = vset.pattern.permute.xlu1 %v3425_v37 }
 0x1af   : > { %1407 = vperm.xlu1 %3010, %v3665_v19  }
 0x1b3   : > { %1411 = vperm.xlu1 %3010, %v3671_v23  }
 0x1b7   : > { %3012 = vset.pattern.permute.xlu1 %v3421_v33 }
 0x1b8   : > { %1427 = vperm.xlu1 %3012, %v3671_v23  }
 0x1bc   : > { %3013 = vset.pattern.permute.xlu1 %v3422_v34 }
 0x1bd   : > { %1439 = vperm.xlu1 %3013, %v3665_v19  }
 0x1bf   : > { %v1139_v38 = vpop.permute.xlu0 %1138 }
 0x1c1   : > { %3015 = vset.pattern.permute.xlu1 %v3426_v39  ;;  %v1272_v40 = vpop.permute.xlu1 %1271 }
 0x1c2   : > { %1455 = vperm.xlu1 %3015, %v3665_v19  }
 0x1c3   : > { %v1141_v41 = vpop.permute.xlu0 %1140 }
 0x1c4   : > { %v1146_v42 = vsel %vm656_vm2, %v1141_v41, 0 }
 0x1c5   : > { %2812 = vmatpush3.bf16.xpose.msra.mxu1 %v1146_v42  ;;  %v1274_v43 = vpop.permute.xlu1 %1273 }
 0x1c6   : > { %1459 = vperm.xlu1 %3015, %v3671_v23   ;;  %2823 = vmatprep.subr.bf16.mxu1 %v3410_v10  ;;  %v1279_v44 = vsel %vm656_vm2, %v1274_v43, 0 }
 0x1c7   : > { %v1624_v47 = vpop.permute.xlu0 %1623 }
 0x1c8   : > { %v1629_v48 = vsel %vm656_vm2, %v1624_v47, 0 }
 0x1c9   : > { %v1622_v46 = vpop.permute.xlu1 %1621 }
 0x1ca   : > { %3018 = vset.pattern.permute.xlu1 %v3423_v35 }
 0x1cb   : > { %1894 = vperm.xlu1 %3018, %v3671_v23   ;;  %v3777_v50 = vpop.permute.xlu0 %2106 }
 0x1cc   : > { %2814 = vmatmul.mubr.msk.bf16.vlgmr.msra.gmra.mrb[12].mxu1 %vm656_vm2, %v1139_v38  ;;  %v2112_v20 = vsel %vm656_vm2, %v3777_v50, 0 }
 0x1cd   : > { %2824 = vmatpush3.bf16.xpose.msra.mxu1 %v1279_v44  ;;  %2825 = vmatprep.mubr.msk.bf16.mxu1 %vm3411_vm1, %v3410_v10  ;;  %v3774_v49 = vpop.permute.xlu1 %1754 }
 0x1ce   : > { %2835 = vmatprep.subr.bf16.mxu1 %v3410_v10 }
 0x1cf   : > { %3019 = vset.pattern.permute.xlu1 %v3427_v45 }
 0x1d0   : > { %1906 = vperm.xlu1 %3019, %v3665_v19  }
 0x1d1   : > { %v3782_v53 = vpop.permute.xlu1 %2104 }
 0x1d4   : > { %1910 = vperm.xlu1 %3019, %v3671_v23   ;;  %2826 = vmatmul.mubr.msk.bf16.vlgmr.msra.gmra.mrb[16].mxu1 %vm656_vm2, %v1272_v40 }
 0x1d5   : > { %2836 = vmatpush3.bf16.xpose.msra.mxu1 %v1629_v48  ;;  %2837 = vmatprep.mubr.msk.bf16.mxu1 %vm3411_vm1, %v3410_v10  ;;  %v3789_v57 = vpop.permute.xlu1 %2237 }
 0x1d6   : > { %2847 = vmatprep.subr.bf16.mxu1 %v3410_v10 }
 0x1d8   : > { %3020 = vset.pattern.permute.xlu1 %v3428_v51 }
 0x1d9   : > { %1922 = vperm.xlu1 %3020, %v3665_v19  }
 0x1dc   : > { %v440_v54 = vpop.permute.xlu0 %439  ;;  %2838 = vmatmul.mubr.msk.bf16.vlgmr.msra.gmra.mrb[20].mxu1 %vm656_vm2, %v1622_v46 }
 0x1dd   : > { %1926 = vperm.xlu1 %3020, %v3671_v23   ;;  %2849 = vmatprep.mubr.msk.bf16.mxu1 %vm3411_vm1, %v3410_v10  ;;  %vm447_vm4 = vcmp.gt.f32.partialorder %v440_v54, %v3665_v19 }
 0x1de   : > { %v2627_v3 = vsel %vm447_vm4, 1.0, %v3410_v10 }
 0x1e0   : > { %v519_v55 = vpop.permute.xlu0 %518 }
 0x1e1   : > { %3021 = vset.pattern.permute.xlu1 %v3429_v56  ;;  %vm522_vm10 = vcmp.gt.f32.partialorder %v519_v55, %v3674_v24 }
 0x1e2   : > { %1938 = vperm.xlu1 %3021, %v3665_v19   ;;  %v2638_v44 = vsel %vm522_vm10, 1.0, %v3410_v10 }
 0x1e5   : > { %v3792_v58 = vpop.permute.xlu0 %546 }
 0x1e6   : > { %1942 = vperm.xlu1 %3021, %v3671_v23   ;;  %v3795_v59 = vpop.permute.xlu1 %444  ;;  %vm553_vm14 = vcmp.gt.f32.partialorder %v3792_v58, %v3668_v21 }
 0x1e7   : > { %v2641_v62 = vsel %vm553_vm14, 1.0, %v3410_v10 }
 0x1ea   : > { %v489_v61 = vpop.permute.xlu0 %488  ;;  %3022 = vset.pattern.permute.xlu1 %v3409_v0 }
 0x1eb   : > { %v457_v63 = vpop.permute.xlu1 %456  ;;  %vm495_vm5 = vcmp.gt.f32.partialorder %v489_v61, %v3665_v19 }
 0x1ec   : > { %vm463_vm3 = vcmp.gt.f32.partialorder %v457_v63, %v3665_v19  ;;  %v2633_v9 = vsel %vm495_vm5, 1.0, %v3410_v10 }
 0x1ed   : > { %v2629_v1 = vsel %vm463_vm3, 1.0, %v3410_v10 }
 0x1ee   : > { %v567_v2 = vpop.permute.xlu0 %566  ;;  %v469_v5 = vadd.f32 %v2629_v1, %v2627_v3 }
 0x1ef   : > { %vm570_vm12 = vcmp.gt.f32.partialorder %v567_v2, %v3674_v24 }
 0x1f0   : > { %v473_v4 = vpop.permute.xlu1 %472  ;;  %v2644_v61 = vsel %vm570_vm12, 1.0, %v3410_v10  ;;  %vm448_vm12 = vcmp.gt.f32.partialorder %v3795_v59, %v3671_v23 }
 0x1f1   : > { %vm479_vm6 = vcmp.gt.f32.partialorder %v473_v4, %v3665_v19 }
 0x1f2   : > { %v2631_v6 = vsel %vm479_vm6, 1.0, %v3410_v10 }
 0x1f3   : > { %v485_v7 = vadd.f32 %v2631_v6, %v469_v5  ;;  %v3805_v8 = vpop.permute.xlu0 %928 }
 0x1f4   : > { %v3808_v11 = vpop.permute.xlu1 %476 }
 0x1f5   : > { %v501_v12 = vadd.f32 %v2633_v9, %v485_v7 }
 0x1f7   : > { %vm503_vm7 = vcmp.lt.f32.partialorder %v501_v12, 2.0 }
 0x1f8   : > { %v2635_v14 = vsel %vm503_vm7, 1.0, %v3410_v10  ;;  %v3813_v15 = vpop.permute.xlu0 %956 }
 0x1f9   : > { %v3815_v16 = vpop.permute.xlu1 %492  ;;  %v509_v17 = vmul.f32 %v3810_v13, %v2635_v14  ;;  %vm963_vm7 = vcmp.gt.f32.partialorder %v3813_v15, %v3665_v19 }
 0x1fb   : > { %596 = vperm.xlu0 %3017, %v509_v17   ;;  %585 = vperm.xlu1 %3022, %v509_v17  }
 0x1fd   : > { %v3820_v22 = vpop.permute.xlu0 %976 }
 0x1fe   : > { %v514_v25 = vpop.permute.xlu1 %513 }
 0x1ff   : > { %3024 = vset.pattern.permute.xlu0 %v3416_v28  ;;  %3023 = vset.pattern.permute.xlu1 %v3415_v27  ;;  %vm521_vm11 = vcmp.gt.f32.partialorder %v514_v25, %v3668_v21 }
 0x200   : > { %636 = vperm.xlu0 %3024, %v509_v17   ;;  %616 = vperm.xlu1 %3023, %v509_v17   ;;  %v2637_v48 = vsel %vm521_vm11, 1.0, %v3410_v10 }
 0x202   : > { %v3824_v26 = vpop.permute.xlu0 %1423 }
 0x203   : > { %v531_v38 = vpop.permute.xlu1 %530 }
 0x204   : > { %3025 = vset.pattern.permute.xlu0 %v3424_v36  ;;  %3026 = vset.pattern.permute.xlu1 %v3419_v31  ;;  %vm537_vm8 = vcmp.gt.f32.partialorder %v531_v38, %v3668_v21 }
 0x205   : > { %v2639_v43 = vsel %vm537_vm8, 1.0, %v3410_v10 }
 0x206   : > { %v543_v54 = vadd.f32 %v2639_v43, %v2637_v48 }
 0x207   : > { %v3828_v40 = vpop.permute.xlu0 %1443  ;;  %v535_v41 = vpop.permute.xlu1 %534 }
 0x208   : > { %vm538_vm9 = vcmp.gt.f32.partialorder %v535_v41, %v3674_v24  ;;  %v559_v3 = vadd.f32 %v2641_v62, %v543_v54 }
 0x209   : > { %v2640_v42 = vsel %vm538_vm9, 1.0, %v3410_v10 }
 0x20a   : > { %v544_v52 = vadd.f32 %v2640_v42, %v2638_v44  ;;  %v2655_v44 = vsel %vm963_vm7, 1.0, %v3410_v10 }
 0x20c   : > { %v3837_v46 = vpop.permute.xlu0 %1890  ;;  %v551_v47 = vpop.permute.xlu1 %550 }
 0x20d   : > { %vm554_vm13 = vcmp.gt.f32.partialorder %v551_v47, %v3674_v24 }
 0x20e   : > { %v2642_v55 = vsel %vm554_vm13, 1.0, %v3410_v10  ;;  %vm1430_vm13 = vcmp.gt.f32.partialorder %v3824_v26, %v3665_v19 }
 0x20f   : > { %v560_v60 = vadd.f32 %v2642_v55, %v544_v52 }
 0x211   : > { %v576_v63 = vadd.f32 %v2644_v61, %v560_v60  ;;  %v3847_v1 = vpop.permute.xlu0 %460  ;;  %v563_v2 = vpop.permute.xlu1 %562 }
 0x212   : > { %vm569_vm15 = vcmp.gt.f32.partialorder %v563_v2, %v3668_v21  ;;  %vm464_vm10 = vcmp.gt.f32.partialorder %v3847_v1, %v3671_v23  ;;  %v2677_v1 = vsel %vm1430_vm13, 1.0, %v3410_v10 }
 0x213   : > { %v2643_v4 = vsel %vm569_vm15, 1.0, %v3410_v10  ;;  %vm578_vm3 = vcmp.lt.f32.partialorder %v576_v63, 2.0  ;;  %vm480_vm15 = vcmp.gt.f32.partialorder %v3808_v11, %v3671_v23 }
 0x214   : > { %v575_v5 = vadd.f32 %v2643_v4, %v559_v3  ;;  %v2646_v9 = vsel %vm578_vm3, 1.0, %v3410_v10 }
 0x215   : > { %v1757_v58 = vpop.permute.xlu0 %1756 }
 0x216   : > { %vm577_vm4 = vcmp.lt.f32.partialorder %v575_v5, 2.0  ;;  %v1762_v6 = vsel %vm656_vm2, %v1757_v58, 0  ;;  %v925_v7 = vpop.permute.xlu1 %924  ;;  %v2626_v5 = vmul.f32 -1.442695, %v3671_v23 }
 0x217   : > { %v2645_v12 = vsel %vm577_vm4, 1.0, %v3410_v10  ;;  %2848 = vmatpush3.bf16.xpose.msra.mxu1 %v1762_v6  ;;  %vm931_vm6 = vcmp.gt.f32.partialorder %v925_v7, %v3665_v19  ;;  %vm496_vm4 = vcmp.gt.f32.partialorder %v3815_v16, %v3671_v23 }
 0x218   : > { %2859 = vmatprep.subr.bf16.mxu1 %v3410_v10  ;;  %v3855_v14 = vpack.i.bf16 %v2646_v9, %v2645_v12  ;;  %v2651_v50 = vsel %vm931_vm6, 1.0, %v3410_v10  ;;  %3208 = vpow2.f32 %v2626_v5  ;;  %v2630_v9 = vsel %vm464_vm10, 1.0, %v3410_v10 }
 0x219   : > { %v2240_v38 = vpop.permute.xlu0 %2239  ;;  %v2634_v11 = vsel %vm496_vm4, 1.0, %v3410_v10  ;;  %vm980_vm10 = vcmp.gt.f32.partialorder %v3820_v22, %v3671_v23  ;;  %vm1897_vm4 = vcmp.gt.f32.partialorder %v3837_v46, %v3665_v19 }
 0x21b   : > { %v941_v17 = vpop.permute.xlu1 %940 }
 0x21c   : > { %vm947_vm5 = vcmp.gt.f32.partialorder %v941_v17, %v3665_v19  ;;  %v2628_v17 = vsel %vm448_vm12, 1.0, %v3410_v10 }
 0x21d   : > { %v2653_v41 = vsel %vm947_vm5, 1.0, %v3410_v10  ;;  %v470_v59 = vadd.f32 %v2630_v9, %v2628_v17  ;;  %v2658_v9 = vsel %vm980_vm10, 1.0, %v3410_v10 }
 0x21e   : > { %2850 = vmatmul.mubr.msk.bf16.vlgmr.msra.gmra.mrb[24].mxu1 %vm656_vm2, %v3774_v49  ;;  %v2245_v49 = vsel %vm656_vm2, %v2240_v38, 0  ;;  %v953_v43 = vadd.f32 %v2653_v41, %v2651_v50 }
 0x21f   : > { %v3861_v25 = vpop.permute.xlu1 %944  ;;  %2860 = vmatpush3.bf16.xpose.msra.mxu1 %v2112_v20  ;;  %2861 = vmatprep.mubr.msk.bf16.mxu1 %vm3411_vm1, %v3410_v10 }
 0x220   : > { %2871 = vmatprep.subr.bf16.mxu1 %v3410_v10  ;;  %v969_v52 = vadd.f32 %v2655_v44, %v953_v43  ;;  %vm948_vm6 = vcmp.gt.f32.partialorder %v3861_v25, %v3671_v23 }
 0x221   : > { %v2654_v16 = vsel %vm948_vm6, 1.0, %v3410_v10 }
 0x222   : > { %v3209_v38 = vpop.eup %3208 }
 0x223   : > { %v432_v44 = vadd.f32 1.0, %v3209_v38 }
 0x224   : > { %v3869_v42 = vpop.permute.xlu1 %960 }
 0x225   : > { %3210 = vrcp.f32 %v432_v44 }
 0x226   : > { %2862 = vmatmul.mubr.msk.bf16.vlgmr.msra.gmra.mrb[28].mxu1 %vm656_vm2, %v3782_v53 }
 0x227   : > { %2872 = vmatpush3.bf16.xpose.msra.mxu1 %v2245_v49  ;;  %2873 = vmatprep.mubr.msk.bf16.mxu1 %vm3411_vm1, %v3410_v10  ;;  %v2632_v49 = vsel %vm480_vm15, 1.0, %v3410_v10 }
 0x228   : > { %2883 = vmatprep.subr.bf16.mxu1 %v3410_v10 }
 0x229   : > { %v973_v47 = vpop.permute.xlu1 %972  ;;  %v3881_v48 = vpop.f32.mrb[4].mxu1 }
 0x22a   : > { %vm979_vm8 = vcmp.gt.f32.partialorder %v973_v47, %v3665_v19  ;;  %v2791_v15 = vpop.f32.mrb[5].mxu1  ;;  %v486_v47 = vadd.f32 %v2632_v49, %v470_v59 }
 0x22b   : > { %v2657_v54 = vsel %vm979_vm8, 1.0, %v3410_v10  ;;  %v700_v55 = vpop.f32.mrb[6].mxu1  ;;  %vm932_vm8 = vcmp.gt.f32.partialorder %v3805_v8, %v3671_v23 }
 0x22c   : > { %v985_v60 = vadd.f32 %v2657_v54, %v969_v52  ;;  %v2792_v53 = vpop.f32.mrb[7].mxu1  ;;  %v502_v55 = vadd.f32 %v2634_v11, %v486_v47  ;;  %v2652_v25 = vsel %vm932_vm8, 1.0, %v3410_v10 }
 0x22d   : > { %v954_v5 = vadd.f32 %v2654_v16, %v2652_v25 }
 0x22e   : > { %vm987_vm9 = vcmp.lt.f32.partialorder %v985_v60, 2.0  ;;  %v1408_v61 = vpop.permute.xlu1 %1407  ;;  %2874 = vmatmul.mubr.msk.bf16.vlgmr.msra.gmra.mrb[32].mxu1 %vm656_vm2, %v3789_v57  ;;  %vm504_vm7 = vcmp.lt.f32.partialorder %v502_v55, 2.0 }
 0x22f   : > { %v2659_v62 = vsel %vm987_vm9, 1.0, %v3410_v10  ;;  %2891 = vmatprep.mubr.msk.bf16.mxu1 %vm3411_vm1, %v3410_v10  ;;  %vm1414_vm11 = vcmp.gt.f32.partialorder %v1408_v61, %v3665_v19  ;;  %vm964_vm9 = vcmp.gt.f32.partialorder %v3869_v42, %v3671_v23  ;;  %v3943_v8 = vpop.eup %3210 }
 0x230   : > { %v993_v63 = vmul.f32 %v3810_v13, %v2659_v62  ;;  %v2675_v12 = vsel %vm1414_vm11, 1.0, %v3410_v10  ;;  %v2636_v62 = vsel %vm504_vm7, 1.0, %v3410_v10 }
 0x231   : > { %v3891_v2 = vpop.f32.mrb[8].mxu1  ;;  %v1436_v41 = vadd.f32 %v2677_v1, %v2675_v12  ;;  %v3946_v42 = vmul.f32 %v3943_v8, %v2636_v62 }
 0x232   : > { %1098 = vperm.xlu1 %3026, %v993_v63   ;;  %1078 = vperm.xlu0 %3025, %v993_v63   ;;  %v3893_v3 = vpop.permute.xlu1 %1411  ;;  %v2803_v4 = vpop.f32.mrb[9].mxu1 }
 0x233   : > { %v835_v58 = vpop.f32.mrb[10].mxu1  ;;  %v2656_v4 = vsel %vm964_vm9, 1.0, %v3410_v10  ;;  %vm1415_vm12 = vcmp.gt.f32.partialorder %v3893_v3, %v3671_v23 }
 0x234   : > { %v2804_v6 = vpop.f32.mrb[11].mxu1  ;;  %v970_v58 = vadd.f32 %v2656_v4, %v954_v5  ;;  %v2676_v1 = vsel %vm1415_vm12, 1.0, %v3410_v10 }
 0x235   : > { %v3952_v6 = vpop.f32.mrb[6].mxu0 }
 0x236   : > { %3027 = vset.pattern.permute.xlu0 %v3420_v32  ;;  %3029 = vset.pattern.permute.xlu1 %v3422_v34  ;;  %v986_v12 = vadd.f32 %v2658_v9, %v970_v58 }
 0x237   : > { %1118 = vperm.xlu0 %3027, %v993_v63   ;;  %v3898_v57 = vpop.permute.xlu1 %1427 }
 0x238   : > { %vm1431_vm11 = vcmp.gt.f32.partialorder %v3898_v57, %v3671_v23  ;;  %vm988_vm15 = vcmp.lt.f32.partialorder %v986_v12, 2.0 }
 0x239   : > { %v2678_v22 = vsel %vm1431_vm11, 1.0, %v3410_v10  ;;  %v2660_v59 = vsel %vm988_vm15, 1.0, %v3410_v10  ;;  %vm719_vm15 = vcmask 1043456  }
 0x23a   : > { %v1437_v57 = vadd.f32 %v2678_v22, %v2676_v1  ;;  %v994_v47 = vmul.f32 %v3943_v8, %v2660_v59 }
 0x23b   : > { %3028 = vset.pattern.permute.xlu0 %v3421_v33 }
 0x23c   : > { %v1440_v7 = vpop.permute.xlu1 %1439 }
 0x23d   : > { %vm1446_vm14 = vcmp.gt.f32.partialorder %v1440_v7, %v3665_v19  ;;  %v2786_v7 = vpop.f32.mrb[7].mxu0 }
 0x23e   : > { %v2679_v20 = vsel %vm1446_vm14, 1.0, %v3410_v10  ;;  %vm1447_vm14 = vcmp.gt.f32.partialorder %v3828_v40, %v3671_v23 }
 0x23f   : > { %v1452_v50 = vadd.f32 %v2679_v20, %v1436_v41  ;;  %v2680_v38 = vsel %vm1447_vm14, 1.0, %v3410_v10  ;;  %v2699_v41 = vsel %vm1897_vm4, 1.0, %v3410_v10  ;;  %vm703_vm14 = vcmask 64512  }
 0x240   : > { %v1453_v46 = vadd.f32 %v2680_v38, %v1437_v57 }
 0x241   : > { %v1456_v26 = vpop.permute.xlu1 %1455 }
 0x242   : > { %vm1462_vm3 = vcmp.gt.f32.partialorder %v1456_v26, %v3665_v19 }
 0x243   : > { %v2681_v43 = vsel %vm1462_vm3, 1.0, %v3410_v10 }
 0x244   : > { %v1468_v52 = vadd.f32 %v2681_v43, %v1452_v50 }
 0x245   : > { %v1460_v15 = vpop.permute.xlu1 %1459 }
 0x246   : > { %vm1470_vm5 = vcmp.lt.f32.partialorder %v1468_v52, 2.0  ;;  %vm1463_vm3 = vcmp.gt.f32.partialorder %v1460_v15, %v3671_v23 }
 0x247   : > { %v2683_v54 = vsel %vm1470_vm5, 1.0, %v3410_v10  ;;  %v2682_v40 = vsel %vm1463_vm3, 1.0, %v3410_v10 }
 0x248   : > { %v3924_v60 = vmul.f32 %v3810_v13, %v2683_v54  ;;  %v1469_v49 = vadd.f32 %v2682_v40, %v1453_v46 }
 0x24a   : > { %1581 = vperm.xlu1 %3029, %v3924_v60   ;;  %1561 = vperm.xlu0 %3028, %v3924_v60   ;;  %v3928_v53 = vpop.permute.xlu1 %1894  ;;  %vm1471_vm10 = vcmp.lt.f32.partialorder %v1469_v49, 2.0  ;;  %v704_v49 = vsel %vm703_vm14, %v3881_v48, -inf }
 0x24b   : > { %vm1898_vm7 = vcmp.gt.f32.partialorder %v3928_v53, %v3671_v23  ;;  %v2684_v25 = vsel %vm1471_vm10, 1.0, %v3410_v10 }
 0x24c   : > { %v2700_v15 = vsel %vm1898_vm7, 1.0, %v3410_v10  ;;  %v1477_v58 = vmul.f32 %v3943_v8, %v2684_v25 }
 0x24e   : > { %3034 = vset.pattern.permute.xlu1 %v3418_v30  ;;  %3030 = vset.pattern.permute.xlu0 %v3426_v39 }
 0x24f   : > { %1067 = vperm.xlu1 %3034, %v993_v63   ;;  %1601 = vperm.xlu0 %3030, %v3924_v60   ;;  %v1907_v61 = vpop.permute.xlu1 %1906 }
 0x250   : > { %vm1913_vm13 = vcmp.gt.f32.partialorder %v1907_v61, %v3665_v19 }
 0x251   : > { %v2701_v20 = vsel %vm1913_vm13, 1.0, %v3410_v10 }
 0x252   : > { %v1919_v50 = vadd.f32 %v2701_v20, %v2699_v41 }
 0x253   : > { %3036 = vset.pattern.permute.xlu1 %v3409_v0  ;;  %v1911_v63 = vpop.permute.xlu1 %1910  ;;  %3031 = vset.pattern.permute.xlu0 %v3427_v45 }
 0x254   : > { %590 = vperm.xlu1 %3036, %v3946_v42   ;;  %vm1914_vm6 = vcmp.gt.f32.partialorder %v1911_v63, %v3671_v23 }
 0x255   : > { %v2702_v43 = vsel %vm1914_vm6, 1.0, %v3410_v10 }
 0x256   : > { %v1920_v55 = vadd.f32 %v2702_v43, %v2700_v15 }
 0x258   : > { %3037 = vset.pattern.permute.xlu1 %v3417_v29  ;;  %v1923_v17 = vpop.permute.xlu1 %1922 }
 0x259   : > { %600 = vperm.xlu1 %3037, %v3946_v42   ;;  %vm1929_vm5 = vcmp.gt.f32.partialorder %v1923_v17, %v3665_v19 }
 0x25a   : > { %v2703_v26 = vsel %vm1929_vm5, 1.0, %v3410_v10 }
 0x25b   : > { %v1935_v52 = vadd.f32 %v2703_v26, %v1919_v50 }
 0x25c   : > { %v1927_v3 = vpop.permute.xlu1 %1926 }
 0x25d   : > { %3039 = vset.pattern.permute.xlu1 %v3416_v28  ;;  %vm1930_vm8 = vcmp.gt.f32.partialorder %v1927_v3, %v3671_v23 }
 0x25e   : > { %640 = vperm.xlu1 %3039, %v3946_v42   ;;  %v2704_v11 = vsel %vm1930_vm8, 1.0, %v3410_v10 }
 0x25f   : > { %v1936_v61 = vadd.f32 %v2704_v11, %v1920_v55 }
 0x261   : > { %v1939_v44 = vpop.permute.xlu1 %1938 }
 0x262   : > { %vm1945_vm9 = vcmp.gt.f32.partialorder %v1939_v44, %v3665_v19  ;;  %3040 = vset.pattern.permute.xlu1 %v3424_v36 }
 0x263   : > { %v2705_v54 = vsel %vm1945_vm9, 1.0, %v3410_v10  ;;  %1082 = vperm.xlu1 %3040, %v994_v47  }
 0x264   : > { %v1951_v53 = vadd.f32 %v2705_v54, %v1935_v52 }
 0x265   : > { %v1943_v16 = vpop.permute.xlu1 %1942 }
 0x266   : > { %vm1953_vm11 = vcmp.lt.f32.partialorder %v1951_v53, 2.0  ;;  %vm1946_vm12 = vcmp.gt.f32.partialorder %v1943_v16, %v3671_v23 }
 0x267   : > { %v2707_v62 = vsel %vm1953_vm11, 1.0, %v3410_v10  ;;  %v2706_v19 = vsel %vm1946_vm12, 1.0, %v3410_v10  ;;  %3041 = vset.pattern.permute.xlu1 %v3419_v31 }
 0x268   : > { %v3996_v4 = vmul.f32 %v3810_v13, %v2707_v62  ;;  %v1952_v5 = vadd.f32 %v2706_v19, %v1936_v61  ;;  %1102 = vperm.xlu1 %3041, %v994_v47   ;;  %v838_v13 = vsel %vm703_vm14, %v3891_v2, -inf }
 0x26a   : > { %vm1954_vm13 = vcmp.lt.f32.partialorder %v1952_v5, 2.0  ;;  %2044 = vperm.xlu0 %3031, %v3996_v4  }
 0x26b   : > { %v2708_v23 = vsel %vm1954_vm13, 1.0, %v3410_v10 }
 0x26c   : > { %3045 = vset.pattern.permute.xlu1 %v3426_v39  ;;  %v4005_v63 = vmul.f32 %v3943_v8, %v2708_v23 }
 0x26d   : > { %1605 = vperm.xlu1 %3045, %v1477_v58  }
 0x26e   : > { %3032 = vset.pattern.permute.xlu0 %v3428_v51 }
 0x26f   : > { %2064 = vperm.xlu0 %3032, %v3996_v4  }
 0x271   : > { %3046 = vset.pattern.permute.xlu1 %v3427_v45 }
 0x272   : > { %2048 = vperm.xlu1 %3046, %v4005_v63  }
 0x273   : > { %3033 = vset.pattern.permute.xlu0 %v3429_v56 }
 0x274   : > { %2084 = vperm.xlu0 %3033, %v3996_v4  }
 0x276   : > { %3049 = vset.pattern.permute.xlu1 %v3418_v30 }
 0x277   : > { %1072 = vperm.xlu1 %3049, %v994_v47  }
 0x278   : > { %3035 = vset.pattern.permute.xlu0 %v3425_v37 }
 0x279   : > { %1550 = vperm.xlu0 %3035, %v3924_v60  }
 0x27a   : > { %v4030_v9 = vpop.permute.xlu1 %585  ;;  %v597_v12 = vpop.permute.xlu0 %596 }
 0x27b   : > { %3052 = vset.pattern.permute.xlu1 %v3423_v35  ;;  %v603_v3 = vmul.f32 %v597_v12, %v3818_v18 }
 0x27d   : > { %3038 = vset.pattern.permute.xlu0 %v3415_v27 }
 0x27e   : > { %620 = vperm.xlu0 %3038, %v3946_v42  }
 0x27f   : > { %v617_v20 = vpop.permute.xlu1 %616  ;;  %v637_v59 = vpop.permute.xlu0 %636 }
 0x280   : > { %v623_v38 = vmul.f32 %v617_v20, %v3818_v18  ;;  %v643_v46 = vmul.f32 %v637_v59, %v3818_v18 }
 0x282   : > { %3042 = vset.pattern.permute.xlu0 %v3420_v32 }
 0x283   : > { %1122 = vperm.xlu0 %3042, %v994_v47  }
 0x287   : > { %3043 = vset.pattern.permute.xlu0 %v3421_v33 }
 0x288   : > { %1565 = vperm.xlu0 %3043, %v1477_v58  }
 0x28c   : > { %3044 = vset.pattern.permute.xlu0 %v3422_v34 }
 0x28d   : > { %1585 = vperm.xlu0 %3044, %v1477_v58  }
 0x291   : > { %3047 = vset.pattern.permute.xlu0 %v3428_v51 }
 0x292   : > { %2068 = vperm.xlu0 %3047, %v4005_v63  }
 0x296   : > { %3048 = vset.pattern.permute.xlu0 %v3429_v56 }
 0x297   : > { %2088 = vperm.xlu0 %3048, %v4005_v63  }
 0x29b   : > { %3050 = vset.pattern.permute.xlu0 %v3425_v37  ;;  %839 = vmax.xlane.f32.xlu1 %v838_v13 }
 0x29c   : > { %1555 = vperm.xlu0 %3050, %v1477_v58  }
 0x29f   : > { %v4027_v60 = vpop.f32.mrb[12].mxu1 }
 0x2a0   : > { %v2815_v8 = vpop.f32.mrb[13].mxu1  ;;  %3051 = vset.pattern.permute.xlu0 %v3423_v35 }
 0x2a1   : > { %v1185_v42 = vpop.f32.mrb[14].mxu1 }
 0x2a2   : > { %v2816_v7 = vpop.f32.mrb[15].mxu1 }
 0x2a7   : > { %v4032_v22 = vpop.f32.mrb[16].mxu1 }
 0x2a8   : > { %v2827_v17 = vpop.f32.mrb[17].mxu1 }
 0x2a9   : > { %v1318_v1 = vpop.f32.mrb[18].mxu1 }
 0x2aa   : > { %v2828_v57 = vpop.f32.mrb[19].mxu1 }
 0x2ac   : > { %607 = vrot.lane.b32.xlu1 %v603_v3, %s3412_s18 }
 0x2af   : > { %v4037_v40 = vpop.f32.mrb[20].mxu1 }
 0x2b0   : > { %v2839_v41 = vpop.f32.mrb[21].mxu1  ;;  %627 = vrot.lane.b32.xlu1 %v623_v38, %s3413_s20 }
 0x2b1   : > { %v1668_v26 = vpop.f32.mrb[22].mxu1  ;;  %v1099_v43 = vpop.permute.xlu1 %1098 }
 0x2b2   : > { %v2840_v50 = vpop.f32.mrb[23].mxu1  ;;  %v1079_v47 = vpop.permute.xlu0 %1078  ;;  %v1105_v11 = vmul.f32 %v1099_v43, %v3818_v18 }
 0x2b3   : > { %v1085_v15 = vmul.f32 %v1079_v47, %v3818_v18 }
 0x2b4   : > { %647 = vrot.lane.b32.xlu1 %v643_v46, %s3414_s29 }
 0x2b6   : > { %v1119_v55 = vpop.permute.xlu0 %1118 }
 0x2b7   : > { %v1125_v53 = vmul.f32 %v1119_v55, %v3818_v18 }
 0x2bb   : > { %705 = vmax.xlane.f32.xlu0 %v704_v49 }
 0x2c9   : > { %v1582_v44 = vpop.permute.xlu1 %1581  ;;  %v1562_v16 = vpop.permute.xlu0 %1561 }
 0x2ca   : > { %v1568_v62 = vmul.f32 %v1562_v16, %v3818_v18  ;;  %v1588_v25 = vmul.f32 %v1582_v44, %v3818_v18 }
 0x2ce   : > { %v4044_v52 = vpop.permute.xlu1 %1067  ;;  %v1602_v5 = vpop.permute.xlu0 %1601 }
 0x2cf   : > { %v1608_v23 = vmul.f32 %v1602_v5, %v3818_v18 }
 0x2d1   : > { %1089 = vrot.lane.b32.xlu0 %v1085_v15, %s3412_s18 }
 0x2d3   : > { %v4049_v54 = vpop.permute.xlu1 %590 }
 0x2d5   : > { %1109 = vrot.lane.b32.xlu0 %v1105_v11, %s3413_s20 }
 0x2d8   : > { %v601_v61 = vpop.permute.xlu1 %600 }
 0x2d9   : > { %1129 = vrot.lane.b32.xlu0 %v1125_v53, %s3414_s29  ;;  %v604_v13 = vmul.f32 %v601_v61, %v3952_v6 }
 0x2dd   : > { %v641_v19 = vpop.permute.xlu1 %640  ;;  %1572 = vrot.lane.b32.xlu0 %v1568_v62, %s3412_s18 }
 0x2de   : > { %v644_v7 = vmul.f32 %v641_v19, %v3952_v6 }
 0x2e1   : > { %1592 = vrot.lane.b32.xlu0 %v1588_v25, %s3413_s20 }
 0x2e2   : > { %v1083_v58 = vpop.permute.xlu1 %1082 }
 0x2e3   : > { %v1086_v1 = vmul.f32 %v1083_v58, %v3952_v6 }
 0x2e5   : > { %1612 = vrot.lane.b32.xlu0 %v1608_v23, %s3414_s29 }
 0x2e7   : > { %v1103_v8 = vpop.permute.xlu1 %1102 }
 0x2e8   : > { %v1106_v59 = vmul.f32 %v1103_v8, %v3952_v6 }
 0x2e9   : > { %v4061_v42 = vpop.permute.xlu0 %2044  ;;  %609 = vrot.lane.b32.xlu0 %v604_v13, %s3412_s18 }
 0x2ec   : > { %v4065_v12 = vpop.permute.xlu1 %1605 }
 0x2ed   : > { %649 = vrot.lane.b32.xlu0 %v644_v7, %s3414_s29 }
 0x2ee   : > { %v4068_v17 = vpop.permute.xlu0 %2064 }
 0x2f1   : > { %v2049_v57 = vpop.permute.xlu1 %2048  ;;  %v4071_v3 = vpop.f32.mrb[24].mxu1  ;;  %1091 = vrot.lane.b32.xlu0 %v1086_v1, %s3412_s18 }
 0x2f2   : > { %v4075_v20 = vmul.f32 %v2049_v57, %v3952_v6  ;;  %v2851_v38 = vpop.f32.mrb[25].mxu1 }
 0x2f3   : > { %v4078_v41 = vpop.permute.xlu0 %2084  ;;  %v1801_v46 = vpop.f32.mrb[26].mxu1  ;;  %v1188_v38 = vsel %vm703_vm14, %v4027_v60, -inf }
 0x2f4   : > { %v2852_v26 = vpop.f32.mrb[27].mxu1 }
 0x2f5   : > { %1111 = vrot.lane.b32.xlu0 %v1106_v59, %s3413_s20  ;;  %v1671_v26 = vsel %vm703_vm14, %v4037_v40, -inf }
 0x2f6   : > { %v1073_v50 = vpop.permute.xlu1 %1072 }
 0x2f7   : > { %v4082_v49 = vmul.f32 %v1073_v50, %v3952_v6 }
 0x2f8   : > { %v1551_v43 = vpop.permute.xlu0 %1550 }
 0x2f9   : > { %v1558_v44 = vmul.f32 %v1551_v43, %v3818_v18  ;;  %v4085_v47 = vpop.f32.mrb[28].mxu1  ;;  %v1804_v43 = vsel %vm703_vm14, %v4071_v3, -inf }
 0x2fa   : > { %v2863_v15 = vpop.f32.mrb[29].mxu1 }
 0x2fb   : > { %v2151_v11 = vpop.f32.mrb[30].mxu1 }
 0x2fc   : > { %v2864_v55 = vpop.f32.mrb[31].mxu1 }
 0x2fd   : > { %v621_v53 = vpop.permute.xlu0 %620 }
 0x2fe   : > { %v624_v16 = vmul.f32 %v621_v53, %v3952_v6 }
 0x300   : > { %629 = vrot.lane.b32.xlu1 %v624_v16, %s3413_s20  ;;  %v1321_v16 = vsel %vm703_vm14, %v4032_v22, -inf }
 0x301   : > { %v4089_v61 = vpop.f32.mrb[32].mxu1 }
 0x302   : > { %v1123_v62 = vpop.permute.xlu0 %1122  ;;  %v2875_v19 = vpop.f32.mrb[33].mxu1 }
 0x303   : > { %v1126_v25 = vmul.f32 %v1123_v62, %v3952_v6  ;;  %v2284_v5 = vpop.f32.mrb[34].mxu1  ;;  %v2154_v62 = vsel %vm703_vm14, %v4085_v47, -inf }
 0x304   : > { %v2876_v58 = vpop.f32.mrb[35].mxu1  ;;  %v2287_v5 = vsel %vm703_vm14, %v4089_v61, -inf }
 0x305   : > { %1131 = vrot.lane.b32.xlu1 %v1126_v25, %s3414_s29  ;;  %v1609_v58 = vmul.f32 %v4065_v12, %v3952_v6 }
 0x307   : > { %v1566_v23 = vpop.permute.xlu0 %1565 }
 0x308   : > { %v1569_v13 = vmul.f32 %v1566_v23, %v3952_v6  ;;  %v1075_v23 = vmul.f32 %v4044_v52, %v3818_v18 }
 0x30a   : > { %1574 = vrot.lane.b32.xlu1 %v1569_v13, %s3412_s18 }
 0x30c   : > { %v1586_v8 = vpop.permute.xlu0 %1585 }
 0x30d   : > { %v1589_v7 = vmul.f32 %v1586_v8, %v3952_v6 }
 0x30f   : > { %1594 = vrot.lane.b32.xlu1 %v1589_v7, %s3413_s20 }
 0x311   : > { %v2069_v1 = vpop.permute.xlu0 %2068 }
 0x312   : > { %v4098_v57 = vmul.f32 %v2069_v1, %v3952_v6 }
 0x314   : > { %1189 = vmax.xlane.f32.xlu0 %v1188_v38 }
 0x316   : > { %v2089_v59 = vpop.permute.xlu0 %2088 }
 0x317   : > { %v4103_v46 = vmul.f32 %v2089_v59, %v3952_v6 }
 0x318   : > { %1672 = vmax.xlane.f32.xlu0 %v1671_v26 }
 0x31b   : > { %v1556_v50 = vpop.permute.xlu0 %1555 }
 0x31c   : > { %v4110_v15 = vmul.f32 %v1556_v50, %v3952_v6  ;;  %1805 = vmax.xlane.f32.xlu0 %v1804_v43 }
 0x328   : > { %v840_v11 = vpop.xlane.xlu1 %839 }
 0x329   : > { %v841_v55 = vsub.f32 %v3891_v2, %v840_v11 }
 0x32b   : > { %v842_v53 = vmul.f32 1.442695, %v841_v55 }
 0x32d   : > { %3212 = vpow2.f32 %v842_v53 }
 0x333   : > { %1322 = vmax.xlane.f32.xlu1 %v1321_v16  ;;  %v608_v16 = vpop.permute.xlu1 %607 }
 0x337   : > { %v4117_v19 = vpop.eup %3212  ;;  %2155 = vmax.xlane.f32.xlu1 %v2154_v62 }
 0x338   : > { %v844_v25 = vsel %vm703_vm14, %v4117_v19, 0.0 }
 0x339   : > { %845 = vadd.xlane.f32.xlu0 %v844_v25 }
 0x33b   : > { %2288 = vmax.xlane.f32.xlu1 %v2287_v5 }
 0x348   : > { %v706_v2 = vpop.xlane.xlu0 %705 }
 0x349   : > { %v707_v43 = vsub.f32 %v3881_v48, %v706_v2  ;;  %v593_v48 = vmul.f32 %v4030_v9, %v3818_v18 }
 0x34b   : > { %v708_v55 = vmul.f32 1.442695, %v707_v43 }
 0x34c   : > { %v1090_v13 = vpop.permute.xlu0 %1089  ;;  %1614 = vrot.lane.b32.xlu1 %v1609_v58, %s3414_s29 }
 0x34d   : > { %v1095_v8 = vadd.f32 %v1090_v13, %v1075_v23  ;;  %3214 = vpow2.f32 %v708_v55 }
 0x34f   : > { %2033 = vperm.xlu0 %3051, %v3996_v4   ;;  %v628_v4 = vpop.permute.xlu1 %627 }
 0x350   : > { %v1110_v7 = vpop.permute.xlu0 %1109 }
 0x351   : > { %v1115_v1 = vadd.f32 %v1110_v7, %v1095_v8  ;;  %v613_v7 = vadd.f32 %v608_v16, %v593_v48 }
 0x353   : > { %3053 = vset.pattern.permute.xlu0 %v3418_v30  ;;  %v648_v13 = vpop.permute.xlu1 %647 }
 0x354   : > { %v1130_v38 = vpop.permute.xlu0 %1129 }
 0x355   : > { %v1135_v59 = vadd.f32 %v1130_v38, %v1115_v1 }
 0x357   : > { %v4133_v5 = vpop.eup %3214 }
 0x358   : > { %v1573_v26 = vpop.permute.xlu0 %1572  ;;  %v710_v2 = vsel %vm703_vm14, %v4133_v5, 0.0 }
 0x359   : > { %v1578_v50 = vadd.f32 %v1573_v26, %v1558_v44  ;;  %v594_v44 = vmul.f32 %v4049_v54, %v3952_v6 }
 0x35c   : > { %v1593_v12 = vpop.permute.xlu0 %1592 }
 0x35d   : > { %v1598_v11 = vadd.f32 %v1593_v12, %v1578_v50  ;;  %v633_v50 = vadd.f32 %v628_v4, %v613_v7 }
 0x35f   : > { %v653_v12 = vadd.f32 %v648_v13, %v633_v50 }
 0x360   : > { %v1613_v52 = vpop.permute.xlu0 %1612 }
 0x361   : > { %v4131_v53 = vadd.f32 %v1613_v52, %v1598_v11 }
 0x364   : > { %v610_v62 = vpop.permute.xlu0 %609 }
 0x365   : > { %v614_v1 = vadd.f32 %v610_v62, %v594_v44 }
 0x368   : > { %v650_v25 = vpop.permute.xlu0 %649 }
 0x36c   : > { %v1092_v58 = vpop.permute.xlu0 %1091 }
 0x36d   : > { %v1096_v23 = vadd.f32 %v1092_v58, %v4082_v49 }
 0x370   : > { %711 = vadd.xlane.f32.xlu1 %v710_v2  ;;  %v1112_v8 = vpop.permute.xlu0 %1111 }
 0x371   : > { %v1116_v38 = vadd.f32 %v1112_v8, %v1096_v23 }
 0x372   : > { %v630_v26 = vpop.permute.xlu1 %629 }
 0x373   : > { %v634_v43 = vadd.f32 %v630_v26, %v614_v1 }
 0x375   : > { %v654_v49 = vadd.f32 %v650_v25, %v634_v43 }
 0x377   : > { %v4142_v11 = vpack.c.bf16 %v654_v49, %v653_v12  ;;  %v1132_v9 = vpop.permute.xlu1 %1131 }
 0x378   : > { %v1136_v55 = vadd.f32 %v1132_v9, %v1116_v38 }
 0x379   : > { %v721_v54 = vsel %vm719_vm15, %v4142_v11, 0 }
 0x37a   : > { %v4146_v52 = vpack.c.bf16 %v1136_v55, %v1135_v59  ;;  %2794 = vmatpush3.bf16.msra.mxu0 %v721_v54 }
 0x37b   : > { %2805 = vmatprep.subr.bf16.mxu0 %v3410_v10 }
 0x37c   : > { %v1575_v16 = vpop.permute.xlu1 %1574 }
 0x37d   : > { %v1579_v62 = vadd.f32 %v1575_v16, %v4110_v15 }
 0x381   : > { %v1595_v4 = vpop.permute.xlu1 %1594 }
 0x382   : > { %v1599_v58 = vadd.f32 %v1595_v4, %v1579_v62 }
 0x3a1   : > { %v1190_v23 = vpop.xlane.xlu0 %1189 }
 0x3a2   : > { %v1191_v25 = vsub.f32 %v4027_v60, %v1190_v23 }
 0x3a4   : > { %v1192_v13 = vmul.f32 1.442695, %v1191_v25 }
 0x3a5   : > { %v1673_v48 = vpop.xlane.xlu0 %1672 }
 0x3a6   : > { %3216 = vpow2.f32 %v1192_v13  ;;  %v1674_v44 = vsub.f32 %v4037_v40, %v1673_v48  ;;  %v851_v48 = vrot.slane %v4142_v11, 4 }
 0x3a8   : > { %v1675_v2 = vmul.f32 1.442695, %v1674_v44 }
 0x3a9   : > { %v1806_v60 = vpop.xlane.xlu0 %1805 }
 0x3aa   : > { %3218 = vpow2.f32 %v1675_v2  ;;  %v1807_v1 = vsub.f32 %v4071_v3, %v1806_v60  ;;  %v856_v2 = vsel %vm719_vm15, %v851_v48, 0 }
 0x3ac   : > { %v1808_v26 = vmul.f32 1.442695, %v1807_v1 }
 0x3b0   : > { %v4152_v59 = vpop.eup %3216 }
 0x3b1   : > { %v1194_v8 = vsel %vm703_vm14, %v4152_v59, 0.0 }
 0x3b2   : > { %1195 = vadd.xlane.f32.xlu1 %v1194_v8  ;;  %v1204_v8 = vsel %vm719_vm15, %v4146_v52, 0 }
 0x3b4   : > { %v4156_v7 = vpop.eup %3218 }
 0x3b5   : > { %v1677_v15 = vsel %vm703_vm14, %v4156_v7, 0.0 }
 0x3b6   : > { %1678 = vadd.xlane.f32.xlu1 %v1677_v15  ;;  %v1334_v15 = vrot.slane %v4146_v52, 4 }
 0x3b8   : > { %v1339_v1 = vsel %vm719_vm15, %v1334_v15, 0 }
 0x3c0   : > { %v1323_v38 = vpop.xlane.xlu1 %1322 }
 0x3c1   : > { %v1324_v40 = vsub.f32 %v4032_v22, %v1323_v38 }
 0x3c3   : > { %v1325_v50 = vmul.f32 1.442695, %v1324_v40 }
 0x3c4   : > { %v2156_v43 = vpop.xlane.xlu1 %2155 }
 0x3c5   : > { %3220 = vpow2.f32 %v1325_v50  ;;  %v2157_v12 = vsub.f32 %v4085_v47, %v2156_v43 }
 0x3c6   : > { %3222 = vpow2.f32 %v1808_v26 }
 0x3c7   : > { %v2158_v49 = vmul.f32 1.442695, %v2157_v12 }
 0x3c8   : > { %v2289_v9 = vpop.xlane.xlu1 %2288 }
 0x3c9   : > { %3224 = vpow2.f32 %v2158_v49  ;;  %v2290_v25 = vsub.f32 %v4089_v61, %v2289_v9 }
 0x3cc   : > { %v1615_v55 = vpop.permute.xlu1 %1614 }
 0x3cd   : > { %v1619_v54 = vadd.f32 %v1615_v55, %v1599_v58  ;;  %v2071_v58 = vmul.f32 %v4068_v17, %v3818_v18 }
 0x3cf   : > { %v4163_v16 = vpop.eup %3220  ;;  %v4166_v62 = vpack.c.bf16 %v1619_v54, %v4131_v53  ;;  %v2051_v53 = vmul.f32 %v4061_v42, %v3818_v18  ;;  %v2091_v42 = vmul.f32 %v4078_v41, %v3818_v18 }
 0x3d0   : > { %v1327_v22 = vsel %vm703_vm14, %v4163_v16, 0.0  ;;  %v4170_v3 = vpop.eup %3222 }
 0x3d1   : > { %1328 = vadd.xlane.f32.xlu0 %v1327_v22  ;;  %v1810_v23 = vsel %vm703_vm14, %v4170_v3, 0.0 }
 0x3d3   : > { %v4172_v4 = vpop.eup %3224 }
 0x3d4   : > { %v2160_v47 = vsel %vm703_vm14, %v4172_v4, 0.0 }
 0x3d5   : > { %2161 = vadd.xlane.f32.xlu1 %v2160_v47  ;;  %1811 = vadd.xlane.f32.xlu0 %v1810_v23 }
 0x3e6   : > { %2038 = vperm.xlu1 %3052, %v4005_v63   ;;  %v2291_v63 = vmul.f32 1.442695, %v2290_v25 }
 0x3e8   : > { %3226 = vpow2.f32 %v2291_v63 }
 0x3ea   : > { %3054 = vset.pattern.permute.xlu1 %v3424_v36 }
 0x3eb   : > { %2055 = vrot.lane.b32.xlu0 %v2051_v53, %s3412_s18 }
 0x3ef   : > { %2057 = vrot.lane.b32.xlu0 %v4075_v20, %s3412_s18  ;;  %v846_v20 = vpop.xlane.xlu0 %845 }
 0x3f2   : > { %v4197_v17 = vpop.eup %3226 }
 0x3f3   : > { %2075 = vrot.lane.b32.xlu0 %v2071_v58, %s3413_s20  ;;  %v2293_v41 = vsel %vm703_vm14, %v4197_v17, 0.0  ;;  %v2034_v52 = vpop.permute.xlu0 %2033 }
 0x3f4   : > { %v2041_v25 = vmul.f32 %v2034_v52, %v3818_v18 }
 0x3f7   : > { %2077 = vrot.lane.b32.xlu0 %v4098_v57, %s3413_s20 }
 0x3fb   : > { %2095 = vrot.lane.b32.xlu0 %v2091_v42, %s3414_s29 }
 0x3fd   : > { %v712_v13 = vpop.xlane.xlu1 %711 }
 0x3fe   : > { %3228 = vrcp.f32 %v712_v13 }
 0x3ff   : > { %2097 = vrot.lane.b32.xlu0 %v4103_v46, %s3414_s29  ;;  %3230 = vrcp.f32 %v846_v20 }
 0x403   : > { %996 = vperm.xlu0 %3053, %v3668_v21  }
 0x407   : > { %1000 = vperm.xlu0 %3053, %v3674_v24  }
 0x408   : > { %v3229_v61 = vpop.eup %3228 }
 0x409   : > { %v714_v57 = vmul.f32 %v3229_v61, %v4133_v5  ;;  %v3231_v46 = vpop.eup %3230 }
 0x40a   : > { %2294 = vadd.xlane.f32.xlu1 %v2293_v41  ;;  %v848_v5 = vmul.f32 %v3231_v46, %v4117_v19 }
 0x40b   : > { %3055 = vset.pattern.permute.xlu0 %v3424_v36  ;;  %v715_v44 = vpack.c.bf16 %v714_v57, %v714_v57 }
 0x40c   : > { %1016 = vperm.xlu0 %3055, %v3674_v24   ;;  %v849_v11 = vpack.c.bf16 %v848_v5, %v848_v5 }
 0x40d   : > { %2796 = vmatmul.mubr.msk.bf16.vlgmr.msra.gmra.mrb[8].mxu0 %vm703_vm14, %v715_v44 }
 0x40e   : > { %2806 = vmatpush3.bf16.msra.mxu0 %v856_v2  ;;  %2807 = vmatprep.mubr.msk.bf16.mxu0 %vm3411_vm1, %v3410_v10 }
 0x40f   : > { %2817 = vmatprep.subr.bf16.mxu0 %v3410_v10 }
 0x410   : > { %3056 = vset.pattern.permute.xlu0 %v3419_v31 }
 0x411   : > { %1028 = vperm.xlu0 %3056, %v3668_v21  }
 0x415   : > { %3058 = vset.pattern.permute.xlu0 %v3425_v37  ;;  %2808 = vmatmul.mubr.msk.bf16.vlgmr.msra.gmra.mrb[12].mxu0 %vm703_vm14, %v849_v11 }
 0x416   : > { %2818 = vmatpush3.bf16.msra.mxu0 %v1204_v8  ;;  %1479 = vperm.xlu0 %3058, %v3668_v21  }
 0x417   : > { %2819 = vmatprep.mubr.msk.bf16.mxu0 %vm3411_vm1, %v3410_v10  ;;  %2829 = vmatprep.subr.bf16.mxu0 %v3410_v10 }
 0x41a   : > { %3061 = vset.pattern.permute.xlu0 %v3421_v33 }
 0x41b   : > { %1012 = vperm.xlu1 %3054, %v3668_v21   ;;  %1499 = vperm.xlu0 %3061, %v3674_v24  }
 0x41f   : > { %3057 = vset.pattern.permute.xlu1 %v3419_v31  ;;  %3063 = vset.pattern.permute.xlu0 %v3422_v34 }
 0x420   : > { %1032 = vperm.xlu1 %3057, %v3674_v24   ;;  %1511 = vperm.xlu0 %3063, %v3668_v21  }
 0x424   : > { %3059 = vset.pattern.permute.xlu1 %v3425_v37  ;;  %3066 = vset.pattern.permute.xlu0 %v3423_v35 }
 0x425   : > { %1483 = vperm.xlu1 %3059, %v3674_v24   ;;  %1966 = vperm.xlu0 %3066, %v3674_v24  }
 0x429   : > { %3060 = vset.pattern.permute.xlu1 %v3421_v33  ;;  %3068 = vset.pattern.permute.xlu0 %v3426_v39 }
 0x42a   : > { %1495 = vperm.xlu1 %3060, %v3668_v21   ;;  %1527 = vperm.xlu0 %3068, %v3668_v21  }
 0x42e   : > { %3062 = vset.pattern.permute.xlu1 %v3420_v32  ;;  %3071 = vset.pattern.permute.xlu0 %v3428_v51 }
 0x42f   : > { %1044 = vperm.xlu1 %3062, %v3668_v21   ;;  %1998 = vperm.xlu0 %3071, %v3674_v24  }
 0x433   : > { %1048 = vperm.xlu1 %3062, %v3674_v24   ;;  %3073 = vset.pattern.permute.xlu0 %v3417_v29 }
 0x434   : > { %3075 = vperm.xlu0 %3073, %v3855_v14  }
 0x437   : > { %3064 = vset.pattern.permute.xlu1 %v3422_v34 }
 0x438   : > { %1515 = vperm.xlu1 %3064, %v3674_v24   ;;  %3091 = vset.pattern.permute.xlu0 %v3419_v31 }
 0x43c   : > { %3065 = vset.pattern.permute.xlu1 %v3423_v35 }
 0x43d   : > { %1962 = vperm.xlu1 %3065, %v3668_v21  }
 0x43f   : > { %v1196_v19 = vpop.xlane.xlu1 %1195 }
 0x440   : > { %3232 = vrcp.f32 %v1196_v19 }
 0x441   : > { %3067 = vset.pattern.permute.xlu1 %v3427_v45 }
 0x442   : > { %1978 = vperm.xlu1 %3067, %v3668_v21  }
 0x443   : > { %v1679_v38 = vpop.xlane.xlu1 %1678 }
 0x446   : > { %1982 = vperm.xlu1 %3067, %v3674_v24  }
 0x44a   : > { %v3233_v29 = vpop.eup %3232  ;;  %3069 = vset.pattern.permute.xlu1 %v3426_v39 }
 0x44b   : > { %v1198_v60 = vmul.f32 %v3233_v29, %v4152_v59  ;;  %1531 = vperm.xlu1 %3069, %v3674_v24  }
 0x44d   : > { %v1199_v31 = vpack.c.bf16 %v1198_v60, %v1198_v60 }
 0x44f   : > { %3070 = vset.pattern.permute.xlu1 %v3428_v51  ;;  %2820 = vmatmul.mubr.msk.bf16.vlgmr.msra.gmra.mrb[16].mxu0 %vm703_vm14, %v1199_v31 }
 0x450   : > { %2830 = vmatpush3.bf16.msra.mxu0 %v1339_v1  ;;  %1994 = vperm.xlu1 %3070, %v3668_v21  }
 0x451   : > { %2831 = vmatprep.mubr.msk.bf16.mxu0 %vm3411_vm1, %v3410_v10  ;;  %2841 = vmatprep.subr.bf16.mxu0 %v3410_v10 }
 0x454   : > { %3072 = vset.pattern.permute.xlu1 %v3429_v56 }
 0x455   : > { %2010 = vperm.xlu1 %3072, %v3668_v21  }
 0x459   : > { %2014 = vperm.xlu1 %3072, %v3674_v24  }
 0x45d   : > { %3079 = vset.pattern.permute.xlu1 %v3424_v36  ;;  %v1687_v36 = vsel %vm719_vm15, %v4166_v62, 0 }
 0x45e   : > { %v1329_v59 = vpop.xlane.xlu0 %1328 }
 0x45f   : > { %3234 = vrcp.f32 %v1329_v59 }
 0x460   : > { %3236 = vrcp.f32 %v1679_v38 }
 0x462   : > { %v1812_v40 = vpop.xlane.xlu0 %1811  ;;  %v2162_v49 = vpop.xlane.xlu1 %2161 }
 0x463   : > { %3238 = vrcp.f32 %v1812_v40 }
 0x464   : > { %3240 = vrcp.f32 %v2162_v49 }
 0x466   : > { %v2056_v26 = vpop.permute.xlu0 %2055  ;;  %v2039_v47 = vpop.permute.xlu1 %2038 }
 0x467   : > { %v2042_v63 = vmul.f32 %v2039_v47, %v3952_v6  ;;  %v2061_v20 = vadd.f32 %v2056_v26, %v2041_v25 }
 0x469   : > { %v3235_v50 = vpop.eup %3234 }
 0x46a   : > { %v1331_v43 = vmul.f32 %v3235_v50, %v4163_v16  ;;  %v2058_v12 = vpop.permute.xlu0 %2057  ;;  %v3237_v55 = vpop.eup %3236  ;;  %v1817_v16 = vrot.slane %v4166_v62, 4 }
 0x46b   : > { %v1681_v22 = vmul.f32 %v3237_v55, %v4156_v7  ;;  %v2062_v7 = vadd.f32 %v2058_v12, %v2042_v63 }
 0x46c   : > { %v1332_v9 = vpack.c.bf16 %v1331_v43, %v1331_v43  ;;  %v1822_v13 = vsel %vm719_vm15, %v1817_v16, 0 }
 0x46d   : > { %v1682_v53 = vpack.c.bf16 %v1681_v22, %v1681_v22  ;;  %v3239_v58 = vpop.eup %3238 }
 0x46e   : > { %v2076_v54 = vpop.permute.xlu0 %2075  ;;  %2832 = vmatmul.mubr.msk.bf16.vlgmr.msra.gmra.mrb[20].mxu0 %vm703_vm14, %v1332_v9  ;;  %v1814_v62 = vmul.f32 %v3239_v58, %v4170_v3  ;;  %v3241_v44 = vpop.eup %3240 }
 0x46f   : > { %2842 = vmatpush3.bf16.msra.mxu0 %v1687_v36  ;;  %2843 = vmatprep.mubr.msk.bf16.mxu0 %vm3411_vm1, %v3410_v10  ;;  %v2081_v61 = vadd.f32 %v2076_v54, %v2061_v20  ;;  %v2164_v5 = vmul.f32 %v3241_v44, %v4172_v4 }
 0x470   : > { %2853 = vmatprep.subr.bf16.mxu0 %v3410_v10  ;;  %v1815_v48 = vpack.c.bf16 %v1814_v62, %v1814_v62 }
 0x471   : > { %v2165_v11 = vpack.c.bf16 %v2164_v5, %v2164_v5 }
 0x472   : > { %v2078_v23 = vpop.permute.xlu0 %2077 }
 0x473   : > { %v2082_v57 = vadd.f32 %v2078_v23, %v2062_v7 }
 0x476   : > { %v2096_v42 = vpop.permute.xlu0 %2095  ;;  %2844 = vmatmul.mubr.msk.bf16.vlgmr.msra.gmra.mrb[24].mxu0 %vm703_vm14, %v1682_v53 }
 0x477   : > { %2854 = vmatpush3.bf16.msra.mxu0 %v1822_v13  ;;  %2855 = vmatprep.mubr.msk.bf16.mxu0 %vm3411_vm1, %v3410_v10  ;;  %v2101_v41 = vadd.f32 %v2096_v42, %v2081_v61 }
 0x478   : > { %2865 = vmatprep.subr.bf16.mxu0 %v3410_v10 }
 0x47a   : > { %v2098_v18 = vpop.permute.xlu0 %2097 }
 0x47b   : > { %v2102_v6 = vadd.f32 %v2098_v18, %v2082_v57 }
 0x47d   : > { %v2103_v46 = vpack.c.bf16 %v2102_v6, %v2101_v41 }
 0x47e   : > { %2856 = vmatmul.mubr.msk.bf16.vlgmr.msra.gmra.mrb[28].mxu0 %vm703_vm14, %v1815_v48 }
 0x47f   : > { %v2170_v2 = vsel %vm719_vm15, %v2103_v46, 0  ;;  %2867 = vmatprep.mubr.msk.bf16.mxu0 %vm3411_vm1, %v3410_v10  ;;  %v2300_v3 = vrot.slane %v2103_v46, 4 }
 0x480   : > { %2866 = vmatpush3.bf16.msra.mxu0 %v2170_v2 }
 0x481   : > { %2877 = vmatprep.subr.bf16.mxu0 %v3410_v10  ;;  %v2305_v8 = vsel %vm719_vm15, %v2300_v3, 0 }
 0x482   : > { %v997_v19 = vpop.permute.xlu0 %996 }
 0x483   : > { %vm1003_vm4 = vcmp.gt.f32.partialorder %v997_v19, %v3668_v21 }
 0x484   : > { %v2661_v43 = vsel %vm1003_vm4, 1.0, %v3410_v10 }
 0x486   : > { %2868 = vmatmul.mubr.msk.bf16.vlgmr.msra.gmra.mrb[32].mxu0 %vm703_vm14, %v2165_v11  ;;  %v1001_v15 = vpop.permute.xlu0 %1000 }
 0x487   : > { %2878 = vmatpush3.bf16.msra.mxu0 %v2305_v8  ;;  %2879 = vmatprep.mubr.msk.bf16.mxu0 %vm3411_vm1, %v3410_v10  ;;  %vm1004_vm6 = vcmp.gt.f32.partialorder %v1001_v15, %v3674_v24 }
 0x488   : > { %v2662_v36 = vsel %vm1004_vm6, 1.0, %v3410_v10 }
 0x48b   : > { %v1017_v31 = vpop.permute.xlu0 %1016 }
 0x48c   : > { %vm1020_vm1 = vcmp.gt.f32.partialorder %v1017_v31, %v3674_v24 }
 0x48d   : > { %v2664_v49 = vsel %vm1020_vm1, 1.0, %v3410_v10 }
 0x48e   : > { %v1026_v23 = vadd.f32 %v2664_v49, %v2662_v36 }
 0x490   : > { %v1029_v59 = vpop.permute.xlu0 %1028 }
 0x491   : > { %vm1035_vm5 = vcmp.gt.f32.partialorder %v1029_v59, %v3668_v21 }
 0x492   : > { %v2665_v9 = vsel %vm1035_vm5, 1.0, %v3410_v10 }
 0x495   : > { %v1480_v12 = vpop.permute.xlu0 %1479 }
 0x496   : > { %vm1486_vm13 = vcmp.gt.f32.partialorder %v1480_v12, %v3668_v21 }
 0x497   : > { %v2295_v29 = vpop.xlane.xlu1 %2294  ;;  %v2685_v6 = vsel %vm1486_vm13, 1.0, %v3410_v10 }
 0x498   : > { %3242 = vrcp.f32 %v2295_v29 }
 0x49a   : > { %v1500_v22 = vpop.permute.xlu0 %1499 }
 0x49b   : > { %v1013_v60 = vpop.permute.xlu1 %1012 }
 0x49c   : > { %vm1019_vm3 = vcmp.gt.f32.partialorder %v1013_v60, %v3668_v21 }
 0x49d   : > { %v2663_v26 = vsel %vm1019_vm3, 1.0, %v3410_v10  ;;  %vm1503_vm3 = vcmp.gt.f32.partialorder %v1500_v22, %v3674_v24 }
 0x49e   : > { %v2688_v3 = vsel %vm1503_vm3, 1.0, %v3410_v10 }
 0x49f   : > { %v1033_v4 = vpop.permute.xlu1 %1032  ;;  %v1512_v13 = vpop.permute.xlu0 %1511 }
 0x4a0   : > { %vm1036_vm7 = vcmp.gt.f32.partialorder %v1033_v4, %v3674_v24 }
 0x4a1   : > { %v2666_v16 = vsel %vm1036_vm7, 1.0, %v3410_v10 }
 0x4a2   : > { %v3243_v1 = vpop.eup %3242  ;;  %v1042_v25 = vadd.f32 %v2666_v16, %v1026_v23 }
 0x4a3   : > { %v2297_v52 = vmul.f32 %v3243_v1, %v4197_v17  ;;  %v1025_v17 = vadd.f32 %v2663_v26, %v2661_v43 }
 0x4a4   : > { %v1484_v38 = vpop.permute.xlu1 %1483  ;;  %v1967_v57 = vpop.permute.xlu0 %1966 }
 0x4a5   : > { %v2298_v40 = vpack.c.bf16 %v2297_v52, %v2297_v52  ;;  %v1041_v54 = vadd.f32 %v2665_v9, %v1025_v17  ;;  %vm1487_vm15 = vcmp.gt.f32.partialorder %v1484_v38, %v3674_v24 }
 0x4a6   : > { %v2686_v5 = vsel %vm1487_vm15, 1.0, %v3410_v10 }
 0x4a7   : > { %2880 = vmatmul.mubr.msk.bf16.vlgmr.msra.gmra.mrb[36].mxu0 %vm703_vm14, %v2298_v40  ;;  %vm1518_vm14 = vcmp.gt.f32.partialorder %v1512_v13, %v3668_v21  ;;  %v1509_v19 = vadd.f32 %v2688_v3, %v2686_v5 }
 0x4a8   : > { %v2689_v2 = vsel %vm1518_vm14, 1.0, %v3410_v10 }
 0x4a9   : > { %v1496_v50 = vpop.permute.xlu1 %1495  ;;  %v1528_v46 = vpop.permute.xlu0 %1527 }
 0x4aa   : > { %vm1502_vm12 = vcmp.gt.f32.partialorder %v1496_v50, %v3668_v21  ;;  %vm1534_vm4 = vcmp.gt.f32.partialorder %v1528_v46, %v3668_v21 }
 0x4ab   : > { %v2687_v41 = vsel %vm1502_vm12, 1.0, %v3410_v10  ;;  %v2691_v11 = vsel %vm1534_vm4, 1.0, %v3410_v10  ;;  %vm1970_vm12 = vcmp.gt.f32.partialorder %v1967_v57, %v3674_v24 }
 0x4ac   : > { %v1508_v48 = vadd.f32 %v2687_v41, %v2685_v6  ;;  %v2710_v43 = vsel %vm1970_vm12, 1.0, %v3410_v10 }
 0x4ae   : > { %v1045_v55 = vpop.permute.xlu1 %1044  ;;  %v1999_v38 = vpop.permute.xlu0 %1998 }
 0x4af   : > { %vm1051_vm8 = vcmp.gt.f32.partialorder %v1045_v55, %v3668_v21  ;;  %vm2002_vm13 = vcmp.gt.f32.partialorder %v1999_v38, %v3674_v24 }
 0x4b0   : > { %v2667_v47 = vsel %vm1051_vm8, 1.0, %v3410_v10 }
 0x4b1   : > { %v1057_v53 = vadd.f32 %v2667_v47, %v1041_v54  ;;  %v2714_v54 = vsel %vm2002_vm13, 1.0, %v3410_v10 }
 0x4b2   : > { %v1049_v58 = vpop.permute.xlu1 %1048 }
 0x4b3   : > { %vm1052_vm9 = vcmp.gt.f32.partialorder %v1049_v58, %v3674_v24  ;;  %vm1059_vm10 = vcmp.lt.f32.partialorder %v1057_v53, 2.0 }
 0x4b4   : > { %v2668_v63 = vsel %vm1052_vm9, 1.0, %v3410_v10  ;;  %v2669_v7 = vsel %vm1059_vm10, 1.0, %v3410_v10 }
 0x4b5   : > { %v1058_v42 = vadd.f32 %v2668_v63, %v1042_v25 }
 0x4b7   : > { %vm1060_vm11 = vcmp.lt.f32.partialorder %v1058_v42, 2.0  ;;  %v1516_v20 = vpop.permute.xlu1 %1515 }
 0x4b8   : > { %v2670_v62 = vsel %vm1060_vm11, 1.0, %v3410_v10  ;;  %vm1519_vm1 = vcmp.gt.f32.partialorder %v1516_v20, %v3674_v24 }
 0x4b9   : > { %v4314_v61 = vpack.i.bf16 %v2670_v62, %v2669_v7  ;;  %v2690_v8 = vsel %vm1519_vm1, 1.0, %v3410_v10  ;;  %v3076_v7 = vpop.permute.xlu0 %3075  ;;  %vm2386_vm1 = vcmask 392192  }
 0x4ba   : > { %v1525_v15 = vadd.f32 %v2690_v8, %v1509_v19  ;;  %v3078_v6 = vunpack.i.h.bf16 %v3076_v7 }
 0x4bb   : > { %3093 = vperm.xlu0 %3091, %v4314_v61   ;;  %3081 = vperm.xlu1 %3079, %v4314_v61  }
 0x4bc   : > { %v1963_v18 = vpop.permute.xlu1 %1962 }
 0x4bd   : > { %vm1969_vm8 = vcmp.gt.f32.partialorder %v1963_v18, %v3668_v21 }
 0x4bf   : > { %3085 = vset.pattern.permute.xlu1 %v3415_v27  ;;  %3109 = vset.pattern.permute.xlu0 %v3421_v33  ;;  %v1524_v27 = vadd.f32 %v2689_v2, %v1508_v48 }
 0x4c0   : > { %3087 = vperm.xlu1 %3085, %v3855_v14  }
 0x4c1   : > { %v1979_v44 = vpop.permute.xlu1 %1978 }
 0x4c2   : > { %vm1985_vm7 = vcmp.gt.f32.partialorder %v1979_v44, %v3668_v21 }
 0x4c3   : > { %v2711_v1 = vsel %vm1985_vm7, 1.0, %v3410_v10 }
 0x4c4   : > { %3097 = vset.pattern.permute.xlu1 %v3416_v28  ;;  %v1540_v28 = vadd.f32 %v2691_v11, %v1524_v27 }
 0x4c5   : > { %v1983_v33 = vpop.permute.xlu1 %1982  ;;  %3099 = vperm.xlu1 %3097, %v3855_v14  }
 0x4c6   : > { %vm1542_vm6 = vcmp.lt.f32.partialorder %v1540_v28, 2.0  ;;  %vm1986_vm9 = vcmp.gt.f32.partialorder %v1983_v33, %v3674_v24 }
 0x4c7   : > { %v2693_v4 = vsel %vm1542_vm6, 1.0, %v3410_v10  ;;  %v2712_v40 = vsel %vm1986_vm9, 1.0, %v3410_v10  ;;  %vm2489_vm6 = vcmask 257024  }
 0x4c8   : > { %v1992_v17 = vadd.f32 %v2712_v40, %v2710_v43 }
 0x4c9   : > { %3103 = vset.pattern.permute.xlu1 %v3420_v32 }
 0x4ca   : > { %v1532_v29 = vpop.permute.xlu1 %1531  ;;  %3105 = vperm.xlu1 %3103, %v4314_v61   ;;  %v2008_v22 = vadd.f32 %v2714_v54, %v1992_v17 }
 0x4cb   : > { %vm1535_vm5 = vcmp.gt.f32.partialorder %v1532_v29, %v3674_v24 }
 0x4cc   : > { %v2692_v60 = vsel %vm1535_vm5, 1.0, %v3410_v10  ;;  %vm2436_vm5 = vcmask 523264  }
 0x4cd   : > { %v1541_v31 = vadd.f32 %v2692_v60, %v1525_v15 }
 0x4ce   : > { %3115 = vset.pattern.permute.xlu1 %v3422_v34  ;;  %v2709_v34 = vsel %vm1969_vm8, 1.0, %v3410_v10 }
 0x4cf   : > { %vm1543_vm10 = vcmp.lt.f32.partialorder %v1541_v31, 2.0  ;;  %v1995_v32 = vpop.permute.xlu1 %1994  ;;  %v1991_v50 = vadd.f32 %v2711_v1, %v2709_v34 }
 0x4d0   : > { %v2694_v52 = vsel %vm1543_vm10, 1.0, %v3410_v10  ;;  %vm2001_vm11 = vcmp.gt.f32.partialorder %v1995_v32, %v3668_v21 }
 0x4d1   : > { %v3116_v59 = vpack.i.bf16 %v2694_v52, %v2693_v4  ;;  %v2713_v26 = vsel %vm2001_vm11, 1.0, %v3410_v10 }
 0x4d2   : > { %v2007_v49 = vadd.f32 %v2713_v26, %v1991_v50 }
 0x4d3   : > { %3117 = vperm.xlu1 %3115, %v3116_v59   ;;  %3111 = vperm.xlu0 %3109, %v3116_v59  }
 0x4d4   : > { %v2011_v12 = vpop.permute.xlu1 %2010 }
 0x4d5   : > { %vm2017_vm14 = vcmp.gt.f32.partialorder %v2011_v12, %v3668_v21 }
 0x4d6   : > { %v2715_v9 = vsel %vm2017_vm14, 1.0, %v3410_v10 }
 0x4d7   : > { %v2023_v55 = vadd.f32 %v2715_v9, %v2007_v49  ;;  %3121 = vset.pattern.permute.xlu1 %v3426_v39  ;;  %3127 = vset.pattern.permute.xlu0 %v3427_v45 }
 0x4d8   : > { %v2015_v36 = vpop.permute.xlu1 %2014  ;;  %3123 = vperm.xlu1 %3121, %v3116_v59  }
 0x4d9   : > { %vm2018_vm15 = vcmp.gt.f32.partialorder %v2015_v36, %v3674_v24  ;;  %vm2025_vm3 = vcmp.lt.f32.partialorder %v2023_v55, 2.0 }
 0x4da   : > { %v2716_v16 = vsel %vm2018_vm15, 1.0, %v3410_v10  ;;  %v2717_v21 = vsel %vm2025_vm3, 1.0, %v3410_v10 }
 0x4db   : > { %v2024_v47 = vadd.f32 %v2716_v16, %v2008_v22 }
 0x4dc   : > { %3133 = vset.pattern.permute.xlu1 %v3428_v51 }
 0x4dd   : > { %vm2026_vm4 = vcmp.lt.f32.partialorder %v2024_v47, 2.0 }
 0x4de   : > { %v2718_v39 = vsel %vm2026_vm4, 1.0, %v3410_v10 }
 0x4df   : > { %v3134_v23 = vpack.i.bf16 %v2718_v39, %v2717_v21 }
 0x4e0   : > { %v4365_v45 = vpop.f32.mrb[8].mxu0 }
 0x4e1   : > { %3135 = vperm.xlu1 %3133, %v3134_v23   ;;  %3129 = vperm.xlu0 %3127, %v3134_v23   ;;  %v2797_v53 = vpop.f32.mrb[9].mxu0 }
 0x4e2   : > { %v760_v58 = vpop.f32.mrb[10].mxu0 }
 0x4e3   : > { %v2798_v25 = vpop.f32.mrb[11].mxu0 }
 0x4e5   : > { %3139 = vset.pattern.permute.xlu1 %v3429_v56  ;;  %3145 = vset.pattern.permute.xlu0 %v3409_v0  ;;  %v3200_v0 = vld [vmem:[#allocation7] sm:$0xff]  }
 0x4e6   : > { %3141 = vperm.xlu1 %3139, %v3134_v23   ;;  %3147 = vperm.xlu0 %3145, %v3855_v14   ;;  %v3201_v14 = vld [vmem:[#allocation7 + $0x8] sm:$0xff]  }
 0x4e7   : > { %2884 = vmatpush3.bf16.msra.mxu1 %v3200_v0 }
 0x4e8   : > { %v4370_v24 = vpop.f32.mrb[12].mxu0  ;;  %2885 = vmatprep.subr.bf16.mxu1 %v3410_v10 }
 0x4e9   : > { %v2809_v51 = vpop.f32.mrb[13].mxu0  ;;  %v909_v5 = vmul.f32 %v3078_v6, %v4370_v24 }
 0x4ea   : > { %3151 = vset.pattern.permute.xlu1 %v3418_v30  ;;  %3163 = vset.pattern.permute.xlu0 %v3423_v35  ;;  %v895_v63 = vpop.f32.mrb[14].mxu0 }
 0x4eb   : > { %3153 = vperm.xlu1 %3151, %v4314_v61   ;;  %3165 = vperm.xlu0 %3163, %v3134_v23   ;;  %v2810_v42 = vpop.f32.mrb[15].mxu0 }
 0x4ec   : > { %2886 = vmatpush3.bf16.msra.mxu1 %v3201_v14 }
 0x4ed   : > { %2887 = vmatprep.subr.bf16.mxu1 %v3410_v10 }
 0x4ef   : > { %3157 = vset.pattern.permute.xlu1 %v3425_v37  ;;  %3184 = vset.pattern.permute.xlu0 %v3429_v56  ;;  %v3077_v37 = vunpack.i.l.bf16 %v3076_v7 }
 0x4f0   : > { %3159 = vperm.xlu1 %3157, %v3116_v59  }
 0x4f1   : > { %v774_v56 = vmul.f32 %v3077_v37, %v4365_v45 }
 0x522   : > { %v4379_v30 = vpop.f32.mrb[16].mxu0 }
 0x523   : > { %v2821_v35 = vpop.f32.mrb[17].mxu0 }
 0x524   : > { %v1243_v13 = vpop.f32.mrb[18].mxu0 }
 0x525   : > { %v2822_v20 = vpop.f32.mrb[19].mxu0 }
 0x53a   : > { %v3082_v62 = vpop.permute.xlu1 %3081  ;;  %v3094_v61 = vpop.permute.xlu0 %3093 }
 0x53b   : > { %v3083_v57 = vunpack.i.l.bf16 %v3082_v62  ;;  %v3095_v41 = vunpack.i.l.bf16 %v3094_v61  ;;  %v3084_v46 = vunpack.i.h.bf16 %v3082_v62  ;;  %v3096_v2 = vunpack.i.h.bf16 %v3094_v61 }
 0x53d   : > { %v1257_v18 = vmul.f32 %v3083_v57, %v4379_v30  ;;  %v1263_v3 = vmul.f32 %v3095_v41, %v4379_v30 }
 0x53f   : > { %v1258_v48 = vadd.f32 %v1257_v18, %v774_v56  ;;  %v3088_v44 = vpop.permute.xlu1 %3087 }
 0x540   : > { %v3090_v27 = vunpack.i.h.bf16 %v3088_v44  ;;  %v3089_v33 = vunpack.i.l.bf16 %v3088_v44 }
 0x541   : > { %v4385_v11 = vpop.f32.mrb[20].mxu0 }
 0x542   : > { %v780_v8 = vmul.f32 %v3089_v33, %v4365_v45  ;;  %v915_v19 = vmul.f32 %v3090_v27, %v4370_v24  ;;  %v1392_v28 = vmul.f32 %v3084_v46, %v4385_v11  ;;  %v1398_v29 = vmul.f32 %v3096_v2, %v4385_v11  ;;  %v2833_v15 = vpop.f32.mrb[21].mxu0 }
 0x543   : > { %v1378_v60 = vpop.f32.mrb[22].mxu0 }
 0x544   : > { %v1264_v31 = vadd.f32 %v1263_v3, %v780_v8  ;;  %v3100_v32 = vpop.permute.xlu1 %3099  ;;  %v2834_v4 = vpop.f32.mrb[23].mxu0  ;;  %v1399_v1 = vadd.f32 %v1398_v29, %v915_v19  ;;  %v1393_v52 = vadd.f32 %v1392_v28, %v909_v5 }
 0x545   : > { %v3102_v59 = vunpack.i.h.bf16 %v3100_v32  ;;  %v3101_v38 = vunpack.i.l.bf16 %v3100_v32 }
 0x547   : > { %v786_v17 = vmul.f32 %v3101_v38, %v4365_v45  ;;  %v921_v49 = vmul.f32 %v3102_v59, %v4370_v24 }
 0x549   : > { %v3106_v34 = vpop.permute.xlu1 %3105  ;;  %v4391_v40 = vpop.f32.mrb[24].mxu0 }
 0x54a   : > { %v3108_v26 = vunpack.i.h.bf16 %v3106_v34  ;;  %v3107_v50 = vunpack.i.l.bf16 %v3106_v34  ;;  %v2845_v43 = vpop.f32.mrb[25].mxu0 }
 0x54b   : > { %v1726_v12 = vpop.f32.mrb[26].mxu0 }
 0x54c   : > { %v1269_v9 = vmul.f32 %v3107_v50, %v4379_v30  ;;  %v1404_v55 = vmul.f32 %v3108_v26, %v4385_v11  ;;  %v2846_v54 = vpop.f32.mrb[27].mxu0 }
 0x54e   : > { %v1270_v36 = vadd.f32 %v1269_v9, %v786_v17  ;;  %v1405_v22 = vadd.f32 %v1404_v55, %v921_v49 }
 0x551   : > { %v1858_v16 = vpop.f32.mrb[28].mxu0 }
 0x552   : > { %v3118_v47 = vpop.permute.xlu1 %3117  ;;  %v3112_v21 = vpop.permute.xlu0 %3111 }
 0x553   : > { %v3120_v39 = vunpack.i.h.bf16 %v3118_v47  ;;  %v3119_v23 = vunpack.i.l.bf16 %v3118_v47  ;;  %v3114_v53 = vunpack.i.h.bf16 %v3112_v21  ;;  %v3113_v58 = vunpack.i.l.bf16 %v3112_v21  ;;  %v2857_v25 = vpop.f32.mrb[29].mxu0 }
 0x554   : > { %v1861_v51 = vpop.f32.mrb[30].mxu0 }
 0x555   : > { %v1746_v63 = vmul.f32 %v3119_v23, %v4391_v40  ;;  %v1881_v42 = vmul.f32 %v3120_v39, %v1858_v16  ;;  %v1740_v0 = vmul.f32 %v3113_v58, %v4391_v40  ;;  %v1875_v14 = vmul.f32 %v3114_v53, %v1858_v16  ;;  %v2858_v35 = vpop.f32.mrb[31].mxu0  ;;  %v3202_v58 = vld [vmem:[#allocation7 + $0x10] sm:$0xff]  }
 0x556   : > { %2888 = vmatpush3.bf16.msra.mxu1 %v3202_v58 }
 0x557   : > { %v1747_v13 = vadd.f32 %v1746_v63, %v1264_v31  ;;  %v4399_v20 = vadd.f32 %v1881_v42, %v1399_v1  ;;  %v1741_v7 = vadd.f32 %v1740_v0, %v1258_v48  ;;  %v4401_v62 = vadd.f32 %v1875_v14, %v1393_v52  ;;  %v3124_v61 = vpop.permute.xlu1 %3123  ;;  %2889 = vmatprep.subr.bf16.mxu1 %v3410_v10  ;;  %v3203_v63 = vld [vmem:[#allocation7 + $0x18] sm:$0xff]  }
 0x558   : > { %v3126_v37 = vunpack.i.h.bf16 %v3124_v61  ;;  %v3125_v57 = vunpack.i.l.bf16 %v3124_v61 }
 0x559   : > { %v2206_v56 = vpop.f32.mrb[32].mxu0 }
 0x55a   : > { %v1752_v18 = vmul.f32 %v3125_v57, %v4391_v40  ;;  %v1887_v41 = vmul.f32 %v3126_v37, %v1858_v16  ;;  %v2869_v6 = vpop.f32.mrb[33].mxu0  ;;  %2890 = vmatpush3.bf16.msra.mxu1 %v3203_v63 }
 0x55b   : > { %v2209_v44 = vpop.f32.mrb[34].mxu0 }
 0x55c   : > { %v1753_v46 = vadd.f32 %v1752_v18, %v1270_v36  ;;  %v1888_v2 = vadd.f32 %v1887_v41, %v1405_v22  ;;  %v2870_v27 = vpop.f32.mrb[35].mxu0 }
 0x560   : > { %v3136_v33 = vpop.permute.xlu1 %3135  ;;  %v3130_v5 = vpop.permute.xlu0 %3129 }
 0x561   : > { %v3137_v3 = vunpack.i.l.bf16 %v3136_v33  ;;  %v3131_v8 = vunpack.i.l.bf16 %v3130_v5 }
 0x563   : > { %v2229_v19 = vmul.f32 %v3137_v3, %v2206_v56  ;;  %v2223_v48 = vmul.f32 %v3131_v8, %v2206_v56 }
 0x565   : > { %v2230_v28 = vadd.f32 %v2229_v19, %v1747_v13  ;;  %v2224_v29 = vadd.f32 %v2223_v48, %v1741_v7  ;;  %v3142_v15 = vpop.permute.xlu1 %3141  ;;  %v3148_v31 = vpop.permute.xlu0 %3147 }
 0x566   : > { %v3143_v60 = vunpack.i.l.bf16 %v3142_v15  ;;  %v3150_v4 = vunpack.i.h.bf16 %v3148_v31  ;;  %v3149_v1 = vunpack.i.l.bf16 %v3148_v31  ;;  %v3144_v25 = vunpack.i.h.bf16 %v3142_v15 }
 0x568   : > { %v2235_v32 = vmul.f32 %v3143_v60, %v2206_v56  ;;  %v768_v26 = vmul.f32 %v3149_v1, %v4365_v45  ;;  %v903_v50 = vmul.f32 %v3150_v4, %v4370_v24  ;;  %v3138_v24 = vunpack.i.h.bf16 %v3136_v33 }
 0x56a   : > { %v2236_v52 = vadd.f32 %v2235_v32, %v1753_v46  ;;  %v3154_v59 = vpop.permute.xlu1 %3153  ;;  %v3166_v17 = vpop.permute.xlu0 %3165 }
 0x56b   : > { %v3156_v38 = vunpack.i.h.bf16 %v3154_v59  ;;  %v3155_v34 = vunpack.i.l.bf16 %v3154_v59  ;;  %v3167_v54 = vunpack.i.l.bf16 %v3166_v17 }
 0x56d   : > { %v1251_v43 = vmul.f32 %v3155_v34, %v4379_v30  ;;  %v1386_v12 = vmul.f32 %v3156_v38, %v4385_v11  ;;  %v2217_v39 = vmul.f32 %v3167_v54, %v2206_v56  ;;  %v3132_v30 = vunpack.i.h.bf16 %v3130_v5 }
 0x56e   : > { %v3168_v11 = vunpack.i.h.bf16 %v3166_v17 }
 0x56f   : > { %v1252_v49 = vadd.f32 %v1251_v43, %v768_v26  ;;  %v1387_v9 = vadd.f32 %v1386_v12, %v903_v50  ;;  %v3160_v55 = vpop.permute.xlu1 %3159 }
 0x570   : > { %v3162_v36 = vunpack.i.h.bf16 %v3160_v55  ;;  %v3161_v22 = vunpack.i.l.bf16 %v3160_v55 }
 0x572   : > { %v1734_v47 = vmul.f32 %v3161_v22, %v4391_v40  ;;  %v1869_v21 = vmul.f32 %v3162_v36, %v1858_v16 }
 0x574   : > { %v1735_v23 = vadd.f32 %v1734_v47, %v1252_v49  ;;  %v1870_v53 = vadd.f32 %v1869_v21, %v1387_v9 }
 0x576   : > { %v2218_v45 = vadd.f32 %v2217_v39, %v1735_v23 }
 0x57a   : > { %v2341_v51 = vpop.f32.mrb[36].mxu0 }
 0x57b   : > { %v2352_v42 = vmul.f32 %v3168_v11, %v2341_v51  ;;  %v2358_v0 = vmul.f32 %v3132_v30, %v2341_v51  ;;  %v2364_v14 = vmul.f32 %v3138_v24, %v2341_v51  ;;  %v2370_v35 = vmul.f32 %v3144_v25, %v2341_v51  ;;  %v2881_v40 = vpop.f32.mrb[37].mxu0 }
 0x57c   : > { %v2344_v16 = vpop.f32.mrb[38].mxu0 }
 0x57d   : > { %v2353_v13 = vadd.f32 %v2352_v42, %v1870_v53  ;;  %v2359_v7 = vadd.f32 %v2358_v0, %v4401_v62  ;;  %v2365_v61 = vadd.f32 %v2364_v14, %v4399_v20  ;;  %v2371_v37 = vadd.f32 %v2370_v35, %v1888_v2  ;;  %v2882_v57 = vpop.f32.mrb[39].mxu0 }
 0x57f   : > { %v3179_v56 = vpack.i.bf16 %v2371_v37, %v2236_v52  ;;  %v3169_v18 = vpack.i.bf16 %v2359_v7, %v2224_v29  ;;  %v3174_v41 = vpack.i.bf16 %v2365_v61, %v2230_v28 }
 0x581   : > { %3180 = vrot.lane.b32.xlu0 %v3179_v56, %s3430_s30  ;;  %3170 = vrot.lane.b32.xlu1 %v3169_v18, %s3431_s24 }
 0x585   : > { %3175 = vrot.lane.b32.xlu1 %v3174_v41, %s3432_s27 }
 0x5f3   : > { %v3171_v10 = vpop.permute.xlu1 %3170  ;;  %v3181_v46 = vpop.permute.xlu0 %3180 }
 0x5f4   : > { %v3173_v6 = vunpack.i.h.bf16 %v3171_v10  ;;  %v3172_v44 = vunpack.i.l.bf16 %v3171_v10  ;;  %v3183_v2 = vunpack.i.h.bf16 %v3181_v46  ;;  %v3182_v33 = vunpack.i.l.bf16 %v3181_v46 }
 0x5f6   : > { %v2384_v5 = vsel %vm656_vm2, %v2218_v45, %v3172_v44  ;;  %v2400_v3 = vsel %vm656_vm2, %v2353_v13, %v3173_v6 }
 0x5f7   : > { %v3176_v27 = vpop.permute.xlu1 %3175 }
 0x5f8   : > { %v3178_v20 = vunpack.i.h.bf16 %v3176_v27  ;;  %v3177_v62 = vunpack.i.l.bf16 %v3176_v27 }
 0x5fa   : > { %v2385_v8 = vsel %vm292_vm0, %v2384_v5, %v3177_v62  ;;  %v2401_v19 = vsel %vm292_vm0, %v2400_v3, %v3178_v20 }
 0x5fb   : > { %v2387_v48 = vsel %vm2386_vm1, %v2385_v8, %v3182_v33  ;;  %v2402_v28 = vsel %vm2386_vm1, %v2401_v19, %v3183_v2 }
 0x5fc   : > { %v2403_v29 = vpack.c.bf16 %v2402_v28, %v2387_v48 }
 0x5fe   : > { %2892 = vmatmul.mubr.msk.bf16.vlgmr.msra.gmra.mrb[36].mxu1 %vm2436_vm5, %v2403_v29 }
 0x6d1   : > { %v2474_v15 = vpop.f32.mrb[36].mxu1 }
 0x6d2   : > { %v2736_v60 = vpack.c.bf16 %v2474_v15, %v2474_v15  ;;  %v2893_v31 = vpop.f32.mrb[37].mxu1 }
 0x6d3   : > { %v2477_v32 = vpop.f32.mrb[38].mxu1 }
 0x6d4   : > { %2490 = vst.msk [vmem:[%s217_s22] sm:$0xf] %vm2489_vm6, %v2736_v60  ;;  %v2737_v4 = vpack.c.bf16 %v2477_v32, %v2477_v32  ;;  %v2894_v1 = vpop.f32.mrb[39].mxu1 }
 0x6d6   : > { %2491 = vst.msk [vmem:[%s217_s22 + $0x4] sm:$0xf] %vm2489_vm6, %v2737_v4 }
 0x6d7   : > { %3343 = shalt.err (!%p3340_p2)
}
 0x6d8   : > { %s3344_s28 = scalar_lea.hbm %s4424_s17, 128  ;;  %s3348_s29 = scalar_lea.hbm %s4471_s3, 256 }
 0x6d9   : > { %p3345_p13 = scmp.ne.s32.totalorder %s4424_s17, %s3344_s28  ;;  %p3349_p4 = scmp.lt.u32.totalorder %s4424_s17, %s4471_s3 }
 0x6da   : > { %p3350_p7 = scmp.lt.u32.totalorder %s3348_s29, %s3344_s28  ;;  %p3352_p11 = scmp.lt.u32.totalorder %s3344_s28, %s4424_s17 }
 0x6db   : > { %p3346_p6 = pnand %p3345_p13, %p4485_p0 }
 0x6dc   : > { %p3351_p8 = por %p3350_p7, %p3349_p4 }
 0x6dd   : > { %p3347_p10 = pneg %p3346_p6 }
 0x6de   : > { %p3353_p1 = por %p3352_p11, %p3351_p8 }
 0x6e0   : > { %p3354_p3 = pnand %p3353_p1, %p3347_p10 }
 0x6e2   : > { %3357 = shalt.err (!%p3354_p3)
}
 0x6e3   : > { %s3434_s27 = smov 64   ;;  %s3435_s22 = smov 4  }
 0x6e4   : > { %2905 = dma.vmem_to_hbm [thread:$0]  (%p4485_p0), %s4419_s8, 128, %s4424_s17, %s2493_s16, %s3434_s27, %s3434_s27, %s3435_s22  }
 0x6e5 PF: > { %s2521_s11 = sand.u32 1, %s3388_s12   ;;  %p4486_p5 = scmp.ne.s32.totalorder %s4476_s19, 0 }
 0x6e6   : > { %p4487_p9 = scmp.ge.s32.totalorder %s3400_s15, 2  ;;  %s2522_s25 = scalar_lea.sflag [#allocation4], %s2521_s11 }
 0x6e8   : > { %p2919_p12 = pnand %p4487_p9, %p4486_p5 }
 0x6ea   : > { %3383 = dma.done.wait (!%p2919_p12), %s2522_s25, 128  }
 0x6eb   : > { %3385 = vsyncadd (!%p2919_p12), %s2522_s25, 4294967168  ;;  %p17_p2 = scmp.ge.s32.totalorder %s3569_s6, 4   ;;  %s4488_s12 = smov %s3392_s13 }
 0x6ec   : > { %s4489_s13 = smov %s3396_s14  ;;  %s4490_s14 = smov %s3578_s9 }
 0x6ed   : > { %s4491_s15 = smov %s3569_s6  ;;  %19 = sbr.rel (!%p17_p2) target bundleno = 6 (0x6), region = 85 }
 0x6f4   :  { %2527 = vsyncpa [#allocation3], 1 }
 0x6f5   :  { %2529 = vsyncpa [#allocation3 + $0x1], 1 }
 0x6f6   :  { %2530 = vsyncpa [#allocation6], 1 }
 0x6f7   :  { %2531 = vsyncpa [#allocation4], 1 }
 0x6f8   :  { %2533 = vsyncpa [#allocation4 + $0x1], 1 }

</bundles_post_ra>
